<compile_context>
chip_gen: v7x
topology: tpu7x:2x2x1
jax: 0.10.0
libtpu: 0.0.40
codegen_flags: <defaults>
</compile_context>

<pallas_src>
import functools

import jax
import jax.numpy as jnp
from jax import lax
from jax.experimental import pallas as pl
from jax.experimental.pallas import tpu as pltpu


def _round_up(x, m):
    return (x + m - 1) // m * m


def _fold_bn(w_oihw, gamma, beta, mean, var, eps):
    """Fold eval-mode BatchNorm into the conv weight; returns (scaled W, shift)."""
    scale = gamma * lax.rsqrt(var + eps)                       # (O,)
    return w_oihw * scale[:, None, None, None], beta - mean * scale


def _fire_kernel(x_ref, mask_ref, wsq_ref, bsq_ref, wexp_ref, bexp_ref,
                 o_ref, sq_ref, *, wp, m_out):
    """One image of the Fire block.

    x_ref   : (R, Cin)            spatially zero-padded input, flattened row-major
    mask_ref: (R, 1)              1.0 on interior pixels, 0.0 on the padding ring
    wsq_ref : (Cin, S_pad)        squeeze 1x1 weight, BN scale folded in
    bsq_ref : (1, S_pad)          squeeze BN shift
    wexp_ref: (9, S_pad, Cout_p)  packed expand weights; tap k = (k//3, k%3),
                                  expand1x1 lives only in the center tap (k=4)
    bexp_ref: (1, Cout_p)         packed expand BN shift
    o_ref   : (m_out, Cout_p)     output, row-major with padded width wp
    sq_ref  : (R, S_pad)          VMEM scratch holding the padded squeeze map
    """
    # Squeeze: 1x1 conv + BN + ReLU; border rows forced to zero so they act as
    # the 3x3 conv's zero padding.
    sq = jnp.dot(x_ref[...], wsq_ref[...], preferred_element_type=jnp.float32)
    sq_ref[...] = jnp.maximum(sq + bsq_ref[...], 0.0) * mask_ref[...]

    # Expand1x1 + Expand3x3 in one accumulator: 9 shifted-window matmuls.
    o_ref[...] = jnp.zeros_like(o_ref)
    for k in range(9):
        off = (k // 3) * wp + (k % 3)              # static row offset of tap k
        o_ref[...] += jnp.dot(sq_ref[pl.ds(off, m_out), :], wexp_ref[k],
                              preferred_element_type=jnp.float32)
    o_ref[...] = jnp.maximum(o_ref[...] + bexp_ref[...], 0.0)


@functools.partial(jax.jit, static_argnames=("eps",))
def fire_forward(x_nchw, params, eps=1e-3):
    """Forward of Fire.  x_nchw: (N, Cin, H, W) f32 -> (N, E1+E3, H, W) f32."""
    n, cin, h, w = x_nchw.shape
    s = params["squeeze_w"].shape[0]
    e1 = params["expand1x1_w"].shape[0]
    e3 = params["expand3x3_w"].shape[0]

    hp, wp = h + 2, w + 2                    # spatial pad for the 3x3 conv
    m_out = h * wp                           # output rows per image (padded width)
    r = _round_up(hp * wp + 2, 8)            # squeeze rows + slop for the last taps
    s_pad = _round_up(s, 128)                # lane-dense intermediate
    cout = e1 + e3
    cout_pad = _round_up(cout, 128)          # lane-dense (unmasked) output stores
    f32 = jnp.float32

    # ---- fold BN, pack both expand convs into 9 taps ------------------------
    wsq, bsq = _fold_bn(params["squeeze_w"], params["squeeze_gamma"],
                        params["squeeze_beta"], params["squeeze_mean"],
                        params["squeeze_var"], eps)
    we1, be1 = _fold_bn(params["expand1x1_w"], params["expand1x1_gamma"],
                        params["expand1x1_beta"], params["expand1x1_mean"],
                        params["expand1x1_var"], eps)
    we3, be3 = _fold_bn(params["expand3x3_w"], params["expand3x3_gamma"],
                        params["expand3x3_beta"], params["expand3x3_mean"],
                        params["expand3x3_var"], eps)

    wsq_p = jnp.zeros((cin, s_pad), f32).at[:, :s].set(wsq.reshape(s, cin).T)
    bsq_p = jnp.zeros((1, s_pad), f32).at[0, :s].set(bsq)

    w3_taps = jnp.transpose(we3, (2, 3, 1, 0)).reshape(9, s, e3)   # (tap, S, E3)
    wexp = jnp.zeros((9, s_pad, cout_pad), f32)
    wexp = wexp.at[4, :s, :e1].set(we1.reshape(e1, s).T)           # 1x1 = center
    wexp = wexp.at[:, :s, e1:cout].set(w3_taps)
    bexp = jnp.zeros((1, cout_pad), f32).at[0, :e1].set(be1).at[0, e1:cout].set(be3)

    # ---- activation layout: NCHW -> NHWC -> spatial zero-pad -> flat rows ----
    x_pad = jnp.pad(jnp.transpose(x_nchw, (0, 2, 3, 1)).astype(f32),
                    ((0, 0), (1, 1), (1, 1), (0, 0)))
    x_flat = jnp.pad(x_pad.reshape(n, hp * wp, cin),
                     ((0, 0), (0, r - hp * wp), (0, 0)))

    hh = jnp.arange(hp * wp, dtype=jnp.int32) // wp
    ww = jnp.arange(hp * wp, dtype=jnp.int32) % wp
    interior = ((hh >= 1) & (hh <= h) & (ww >= 1) & (ww <= w)).astype(f32)
    mask = jnp.pad(interior, (0, r - hp * wp)).reshape(r, 1)

    kernel = functools.partial(_fire_kernel, wp=wp, m_out=m_out)

    out = pl.pallas_call(
        kernel,
        out_shape=jax.ShapeDtypeStruct((n, m_out, cout_pad), f32),
        grid_spec=pltpu.PrefetchScalarGridSpec(
            num_scalar_prefetch=0,
            grid=(n,),
            in_specs=[
                pl.BlockSpec((None, r, cin), lambda i: (i, 0, 0)),
                pl.BlockSpec((r, 1), lambda i: (0, 0)),
                pl.BlockSpec((cin, s_pad), lambda i: (0, 0)),
                pl.BlockSpec((1, s_pad), lambda i: (0, 0)),
                pl.BlockSpec((9, s_pad, cout_pad), lambda i: (0, 0, 0)),
                pl.BlockSpec((1, cout_pad), lambda i: (0, 0)),
            ],
            out_specs=pl.BlockSpec((None, m_out, cout_pad), lambda i: (i, 0, 0)),
            scratch_shapes=[pltpu.VMEM((r, s_pad), jnp.float32)],
        ),
        compiler_params=pltpu.CompilerParams(
            dimension_semantics=("parallel",),
            vmem_limit_bytes=64 * 1024 * 1024),
    )(x_flat, mask, wsq_p, bsq_p, wexp, bexp)

    # Drop the padded width columns and padded channels, back to NCHW.
    out = out.reshape(n, h, wp, cout_pad)[:, :, :w, :cout]
    return jnp.transpose(out, (0, 3, 1, 2))


# ------------------------------ plain-JAX reference --------------------------
def _basic_conv2d_ref(x, w, gamma, beta, mean, var, *, stride=1, padding=0, eps=1e-3):
    y = lax.conv_general_dilated(
        x, w, window_strides=(stride, stride),
        padding=[(padding, padding), (padding, padding)],
        dimension_numbers=("NCHW", "OIHW", "NCHW"))
    inv = lax.rsqrt(var + eps)
    y = (y - mean[None, :, None, None]) * (gamma * inv)[None, :, None, None] \
        + beta[None, :, None, None]
    return jnp.maximum(y, 0.0)


def _fire_reference(x, params, eps=1e-3):
    sq = _basic_conv2d_ref(x, params["squeeze_w"], params["squeeze_gamma"],
                           params["squeeze_beta"], params["squeeze_mean"],
                           params["squeeze_var"], eps=eps)
    e1 = _basic_conv2d_ref(sq, params["expand1x1_w"], params["expand1x1_gamma"],
                           params["expand1x1_beta"], params["expand1x1_mean"],
                           params["expand1x1_var"], eps=eps)
    e3 = _basic_conv2d_ref(sq, params["expand3x3_w"], params["expand3x3_gamma"],
                           params["expand3x3_beta"], params["expand3x3_mean"],
                           params["expand3x3_var"], padding=1, eps=eps)
    return jnp.concatenate([e1, e3], axis=1)


if __name__ == "__main__":
    key = jax.random.PRNGKey(0)
    keys = jax.random.split(key, 8)

    # Small shapes consistent with Fire: N=2, Cin=4, H=W=16, squeeze=4, expand=8+8.
    N, CIN, H, W = 2, 4, 16, 16
    SQ, E1, E3 = 4, 8, 8

    def conv_init(k, shape):
        return 0.1 * jax.random.normal(k, shape, dtype=jnp.float32)

    def bn_init(k, c):
        kg, kb, km, kv = jax.random.split(k, 4)
        return (1.0 + 0.1 * jax.random.normal(kg, (c,), jnp.float32),
                0.1 * jax.random.normal(kb, (c,), jnp.float32),
                0.1 * jax.random.normal(km, (c,), jnp.float32),
                jnp.abs(jax.random.normal(kv, (c,), jnp.float32)) + 0.5)

    x = jax.random.normal(keys[0], (N, CIN, H, W), dtype=jnp.float32)

    g_sq, b_sq, m_sq, v_sq = bn_init(keys[2], SQ)
    g_e1, b_e1, m_e1, v_e1 = bn_init(keys[4], E1)
    g_e3, b_e3, m_e3, v_e3 = bn_init(keys[6], E3)

    params = dict(
        squeeze_w=conv_init(keys[1], (SQ, CIN, 1, 1)),
        squeeze_gamma=g_sq, squeeze_beta=b_sq, squeeze_mean=m_sq, squeeze_var=v_sq,
        expand1x1_w=conv_init(keys[3], (E1, SQ, 1, 1)),
        expand1x1_gamma=g_e1, expand1x1_beta=b_e1,
        expand1x1_mean=m_e1, expand1x1_var=v_e1,
        expand3x3_w=conv_init(keys[5], (E3, SQ, 3, 3)),
        expand3x3_gamma=g_e3, expand3x3_beta=b_e3,
        expand3x3_mean=m_e3, expand3x3_var=v_e3,
    )

    out = fire_forward(x, params)
    out = jax.block_until_ready(out)

    ref = _fire_reference(x, params)
    assert out.shape == (N, E1 + E3, H, W), out.shape
    max_err = float(jnp.max(jnp.abs(out - ref)))
    assert jnp.allclose(out, ref, atol=2e-3, rtol=2e-3), max_err

    print("KERNEL_OK")
</pallas_src>

<mosaic_0001>
module attributes {stable_mosaic.version = 11 : i64} {
  func.func @_fire_kernel(%arg0: i32, %arg1: memref<1x328x4xf32, #tpu.memory_space<vmem>>, %arg2: memref<328x1xf32, #tpu.memory_space<vmem>>, %arg3: memref<4x128xf32, #tpu.memory_space<vmem>>, %arg4: memref<1x128xf32, #tpu.memory_space<vmem>>, %arg5: memref<9x128x128xf32, #tpu.memory_space<vmem>>, %arg6: memref<1x128xf32, #tpu.memory_space<vmem>>, %arg7: memref<1x288x128xf32, #tpu.memory_space<vmem>>, %arg8: memref<328x128xf32, #tpu.memory_space<vmem>>) attributes {dimension_semantics = [#tpu.dimension_semantics<parallel>], iteration_bounds = array<i64: 2>, scalar_prefetch = 0 : i64, scratch_operands = 1 : i64, tpu.core_type = #tpu.core_type<tc>, window_params = [{transform_indices = @transform_0, window_bounds = array<i64: 1, 328, 4>}, {pipeline_mode = #tpu.pipeline_mode<synchronous>, transform_indices = @transform_1, window_bounds = array<i64: 328, 1>}, {pipeline_mode = #tpu.pipeline_mode<synchronous>, transform_indices = @transform_2, window_bounds = array<i64: 4, 128>}, {pipeline_mode = #tpu.pipeline_mode<synchronous>, transform_indices = @transform_3, window_bounds = array<i64: 1, 128>}, {pipeline_mode = #tpu.pipeline_mode<synchronous>, transform_indices = @transform_4, window_bounds = array<i64: 9, 128, 128>}, {pipeline_mode = #tpu.pipeline_mode<synchronous>, transform_indices = @transform_5, window_bounds = array<i64: 1, 128>}, {transform_indices = @transform_6, window_bounds = array<i64: 1, 288, 128>}]} {
    %c0 = arith.constant 0 : index
    %c0_0 = arith.constant 0 : index
    %c0_1 = arith.constant 0 : index
    %0 = vector.load %arg1[%c0, %c0_0, %c0_1] : memref<1x328x4xf32, #tpu.memory_space<vmem>>, vector<1x328x4xf32>
    %1 = vector.shape_cast %0 : vector<1x328x4xf32> to vector<328x4xf32>
    %c0_2 = arith.constant 0 : index
    %c0_3 = arith.constant 0 : index
    %2 = vector.load %arg3[%c0_2, %c0_3] : memref<4x128xf32, #tpu.memory_space<vmem>>, vector<4x128xf32>
    %cst = arith.constant dense<0.000000e+00> : vector<328x128xf32>
    %3 = tpu.matmul %1, %2, %cst {dimension_numbers = #tpu.dot_dimension_numbers<[1], [0], [0], [1], [0, 0, 1, 1], [], []>} : vector<328x4xf32>, vector<4x128xf32>, vector<328x128xf32> -> vector<328x128xf32>
    %c0_4 = arith.constant 0 : index
    %c0_5 = arith.constant 0 : index
    %4 = vector.load %arg4[%c0_4, %c0_5] : memref<1x128xf32, #tpu.memory_space<vmem>>, vector<1x128xf32>
    %5 = vector.broadcast %4 : vector<1x128xf32> to vector<328x128xf32>
    %6 = arith.addf %3, %5 : vector<328x128xf32>
    %cst_6 = arith.constant 0.000000e+00 : f32
    %7 = vector.broadcast %cst_6 : f32 to vector<328x128xf32>
    %8 = arith.maximumf %6, %7 : vector<328x128xf32>
    %c0_7 = arith.constant 0 : index
    %c0_8 = arith.constant 0 : index
    %9 = vector.load %arg2[%c0_7, %c0_8] : memref<328x1xf32, #tpu.memory_space<vmem>>, vector<328x1xf32>
    %10 = vector.broadcast %9 : vector<328x1xf32> to vector<328x128xf32>
    %11 = arith.mulf %8, %10 : vector<328x128xf32>
    %c0_9 = arith.constant 0 : index
    %c0_10 = arith.constant 0 : index
    %12 = vector.load %arg8[%c0_9, %c0_10] : memref<328x128xf32, #tpu.memory_space<vmem>>, vector<328x128xf32>
    tpu.vector_store %arg8[%c0_9, %c0_10], %11 {strides = array<i32>} : memref<328x128xf32, #tpu.memory_space<vmem>>, vector<328x128xf32>,
    %cst_11 = arith.constant 0.000000e+00 : f32
    %13 = vector.broadcast %cst_11 : f32 to vector<288x128xf32>
    %c0_12 = arith.constant 0 : index
    %c0_13 = arith.constant 0 : index
    %c0_14 = arith.constant 0 : index
    %14 = vector.load %arg7[%c0_12, %c0_13, %c0_14] : memref<1x288x128xf32, #tpu.memory_space<vmem>>, vector<1x288x128xf32>
    %15 = vector.shape_cast %14 : vector<1x288x128xf32> to vector<288x128xf32>
    %16 = vector.shape_cast %13 : vector<288x128xf32> to vector<1x288x128xf32>
    tpu.vector_store %arg7[%c0_12, %c0_13, %c0_14], %16 {strides = array<i32>} : memref<1x288x128xf32, #tpu.memory_space<vmem>>, vector<1x288x128xf32>,
    %c0_15 = arith.constant 0 : index
    %c0_16 = arith.constant 0 : index
    %c0_17 = arith.constant 0 : index
    %17 = vector.load %arg7[%c0_15, %c0_16, %c0_17] : memref<1x288x128xf32, #tpu.memory_space<vmem>>, vector<1x288x128xf32>
    %18 = vector.shape_cast %17 : vector<1x288x128xf32> to vector<288x128xf32>
    %c0_18 = arith.constant 0 : index
    %c0_19 = arith.constant 0 : index
    %19 = vector.load %arg8[%c0_18, %c0_19] : memref<328x128xf32, #tpu.memory_space<vmem>>, vector<288x128xf32>
    %c0_20 = arith.constant 0 : index
    %c0_21 = arith.constant 0 : index
    %c0_22 = arith.constant 0 : index
    %20 = vector.load %arg5[%c0_20, %c0_21, %c0_22] : memref<9x128x128xf32, #tpu.memory_space<vmem>>, vector<1x128x128xf32>
    %21 = vector.shape_cast %20 : vector<1x128x128xf32> to vector<128x128xf32>
    %cst_23 = arith.constant dense<0.000000e+00> : vector<288x128xf32>
    %22 = tpu.matmul %19, %21, %cst_23 {dimension_numbers = #tpu.dot_dimension_numbers<[1], [0], [0], [1], [0, 0, 1, 1], [], []>} : vector<288x128xf32>, vector<128x128xf32>, vector<288x128xf32> -> vector<288x128xf32>
    %23 = arith.addf %18, %22 : vector<288x128xf32>
    %c0_24 = arith.constant 0 : index
    %c0_25 = arith.constant 0 : index
    %c0_26 = arith.constant 0 : index
    %24 = vector.load %arg7[%c0_24, %c0_25, %c0_26] : memref<1x288x128xf32, #tpu.memory_space<vmem>>, vector<1x288x128xf32>
    %25 = vector.shape_cast %24 : vector<1x288x128xf32> to vector<288x128xf32>
    %26 = vector.shape_cast %23 : vector<288x128xf32> to vector<1x288x128xf32>
    tpu.vector_store %arg7[%c0_24, %c0_25, %c0_26], %26 {strides = array<i32>} : memref<1x288x128xf32, #tpu.memory_space<vmem>>, vector<1x288x128xf32>,
    %c0_27 = arith.constant 0 : index
    %c0_28 = arith.constant 0 : index
    %c0_29 = arith.constant 0 : index
    %27 = vector.load %arg7[%c0_27, %c0_28, %c0_29] : memref<1x288x128xf32, #tpu.memory_space<vmem>>, vector<1x288x128xf32>
    %28 = vector.shape_cast %27 : vector<1x288x128xf32> to vector<288x128xf32>
    %c1 = arith.constant 1 : index
    %c0_30 = arith.constant 0 : index
    %29 = vector.load %arg8[%c1, %c0_30] : memref<328x128xf32, #tpu.memory_space<vmem>>, vector<288x128xf32>
    %c1_31 = arith.constant 1 : index
    %c0_32 = arith.constant 0 : index
    %c0_33 = arith.constant 0 : index
    %30 = vector.load %arg5[%c1_31, %c0_32, %c0_33] : memref<9x128x128xf32, #tpu.memory_space<vmem>>, vector<1x128x128xf32>
    %31 = vector.shape_cast %30 : vector<1x128x128xf32> to vector<128x128xf32>
    %cst_34 = arith.constant dense<0.000000e+00> : vector<288x128xf32>
    %32 = tpu.matmul %29, %31, %cst_34 {dimension_numbers = #tpu.dot_dimension_numbers<[1], [0], [0], [1], [0, 0, 1, 1], [], []>} : vector<288x128xf32>, vector<128x128xf32>, vector<288x128xf32> -> vector<288x128xf32>
    %33 = arith.addf %28, %32 : vector<288x128xf32>
    %c0_35 = arith.constant 0 : index
    %c0_36 = arith.constant 0 : index
    %c0_37 = arith.constant 0 : index
    %34 = vector.load %arg7[%c0_35, %c0_36, %c0_37] : memref<1x288x128xf32, #tpu.memory_space<vmem>>, vector<1x288x128xf32>
    %35 = vector.shape_cast %34 : vector<1x288x128xf32> to vector<288x128xf32>
    %36 = vector.shape_cast %33 : vector<288x128xf32> to vector<1x288x128xf32>
    tpu.vector_store %arg7[%c0_35, %c0_36, %c0_37], %36 {strides = array<i32>} : memref<1x288x128xf32, #tpu.memory_space<vmem>>, vector<1x288x128xf32>,
    %c0_38 = arith.constant 0 : index
    %c0_39 = arith.constant 0 : index
    %c0_40 = arith.constant 0 : index
    %37 = vector.load %arg7[%c0_38, %c0_39, %c0_40] : memref<1x288x128xf32, #tpu.memory_space<vmem>>, vector<1x288x128xf32>
    %38 = vector.shape_cast %37 : vector<1x288x128xf32> to vector<288x128xf32>
    %c2 = arith.constant 2 : index
    %c0_41 = arith.constant 0 : index
    %39 = vector.load %arg8[%c2, %c0_41] : memref<328x128xf32, #tpu.memory_space<vmem>>, vector<288x128xf32>
    %c2_42 = arith.constant 2 : index
    %c0_43 = arith.constant 0 : index
    %c0_44 = arith.constant 0 : index
    %40 = vector.load %arg5[%c2_42, %c0_43, %c0_44] : memref<9x128x128xf32, #tpu.memory_space<vmem>>, vector<1x128x128xf32>
    %41 = vector.shape_cast %40 : vector<1x128x128xf32> to vector<128x128xf32>
    %cst_45 = arith.constant dense<0.000000e+00> : vector<288x128xf32>
    %42 = tpu.matmul %39, %41, %cst_45 {dimension_numbers = #tpu.dot_dimension_numbers<[1], [0], [0], [1], [0, 0, 1, 1], [], []>} : vector<288x128xf32>, vector<128x128xf32>, vector<288x128xf32> -> vector<288x128xf32>
    %43 = arith.addf %38, %42 : vector<288x128xf32>
    %c0_46 = arith.constant 0 : index
    %c0_47 = arith.constant 0 : index
    %c0_48 = arith.constant 0 : index
    %44 = vector.load %arg7[%c0_46, %c0_47, %c0_48] : memref<1x288x128xf32, #tpu.memory_space<vmem>>, vector<1x288x128xf32>
    %45 = vector.shape_cast %44 : vector<1x288x128xf32> to vector<288x128xf32>
    %46 = vector.shape_cast %43 : vector<288x128xf32> to vector<1x288x128xf32>
    tpu.vector_store %arg7[%c0_46, %c0_47, %c0_48], %46 {strides = array<i32>} : memref<1x288x128xf32, #tpu.memory_space<vmem>>, vector<1x288x128xf32>,
    %c0_49 = arith.constant 0 : index
    %c0_50 = arith.constant 0 : index
    %c0_51 = arith.constant 0 : index
    %47 = vector.load %arg7[%c0_49, %c0_50, %c0_51] : memref<1x288x128xf32, #tpu.memory_space<vmem>>, vector<1x288x128xf32>
    %48 = vector.shape_cast %47 : vector<1x288x128xf32> to vector<288x128xf32>
    %c18 = arith.constant 18 : index
    %c0_52 = arith.constant 0 : index
    %49 = vector.load %arg8[%c18, %c0_52] : memref<328x128xf32, #tpu.memory_space<vmem>>, vector<288x128xf32>
    %c3 = arith.constant 3 : index
    %c0_53 = arith.constant 0 : index
    %c0_54 = arith.constant 0 : index
    %50 = vector.load %arg5[%c3, %c0_53, %c0_54] : memref<9x128x128xf32, #tpu.memory_space<vmem>>, vector<1x128x128xf32>
    %51 = vector.shape_cast %50 : vector<1x128x128xf32> to vector<128x128xf32>
    %cst_55 = arith.constant dense<0.000000e+00> : vector<288x128xf32>
    %52 = tpu.matmul %49, %51, %cst_55 {dimension_numbers = #tpu.dot_dimension_numbers<[1], [0], [0], [1], [0, 0, 1, 1], [], []>} : vector<288x128xf32>, vector<128x128xf32>, vector<288x128xf32> -> vector<288x128xf32>
    %53 = arith.addf %48, %52 : vector<288x128xf32>
    %c0_56 = arith.constant 0 : index
    %c0_57 = arith.constant 0 : index
    %c0_58 = arith.constant 0 : index
    %54 = vector.load %arg7[%c0_56, %c0_57, %c0_58] : memref<1x288x128xf32, #tpu.memory_space<vmem>>, vector<1x288x128xf32>
    %55 = vector.shape_cast %54 : vector<1x288x128xf32> to vector<288x128xf32>
    %56 = vector.shape_cast %53 : vector<288x128xf32> to vector<1x288x128xf32>
    tpu.vector_store %arg7[%c0_56, %c0_57, %c0_58], %56 {strides = array<i32>} : memref<1x288x128xf32, #tpu.memory_space<vmem>>, vector<1x288x128xf32>,
    %c0_59 = arith.constant 0 : index
    %c0_60 = arith.constant 0 : index
    %c0_61 = arith.constant 0 : index
    %57 = vector.load %arg7[%c0_59, %c0_60, %c0_61] : memref<1x288x128xf32, #tpu.memory_space<vmem>>, vector<1x288x128xf32>
    %58 = vector.shape_cast %57 : vector<1x288x128xf32> to vector<288x128xf32>
    %c19 = arith.constant 19 : index
    %c0_62 = arith.constant 0 : index
    %59 = vector.load %arg8[%c19, %c0_62] : memref<328x128xf32, #tpu.memory_space<vmem>>, vector<288x128xf32>
    %c4 = arith.constant 4 : index
    %c0_63 = arith.constant 0 : index
    %c0_64 = arith.constant 0 : index
    %60 = vector.load %arg5[%c4, %c0_63, %c0_64] : memref<9x128x128xf32, #tpu.memory_space<vmem>>, vector<1x128x128xf32>
    %61 = vector.shape_cast %60 : vector<1x128x128xf32> to vector<128x128xf32>
    %cst_65 = arith.constant dense<0.000000e+00> : vector<288x128xf32>
    %62 = tpu.matmul %59, %61, %cst_65 {dimension_numbers = #tpu.dot_dimension_numbers<[1], [0], [0], [1], [0, 0, 1, 1], [], []>} : vector<288x128xf32>, vector<128x128xf32>, vector<288x128xf32> -> vector<288x128xf32>
    %63 = arith.addf %58, %62 : vector<288x128xf32>
    %c0_66 = arith.constant 0 : index
    %c0_67 = arith.constant 0 : index
    %c0_68 = arith.constant 0 : index
    %64 = vector.load %arg7[%c0_66, %c0_67, %c0_68] : memref<1x288x128xf32, #tpu.memory_space<vmem>>, vector<1x288x128xf32>
    %65 = vector.shape_cast %64 : vector<1x288x128xf32> to vector<288x128xf32>
    %66 = vector.shape_cast %63 : vector<288x128xf32> to vector<1x288x128xf32>
    tpu.vector_store %arg7[%c0_66, %c0_67, %c0_68], %66 {strides = array<i32>} : memref<1x288x128xf32, #tpu.memory_space<vmem>>, vector<1x288x128xf32>,
    %c0_69 = arith.constant 0 : index
    %c0_70 = arith.constant 0 : index
    %c0_71 = arith.constant 0 : index
    %67 = vector.load %arg7[%c0_69, %c0_70, %c0_71] : memref<1x288x128xf32, #tpu.memory_space<vmem>>, vector<1x288x128xf32>
    %68 = vector.shape_cast %67 : vector<1x288x128xf32> to vector<288x128xf32>
    %c20 = arith.constant 20 : index
    %c0_72 = arith.constant 0 : index
    %69 = vector.load %arg8[%c20, %c0_72] : memref<328x128xf32, #tpu.memory_space<vmem>>, vector<288x128xf32>
    %c5 = arith.constant 5 : index
    %c0_73 = arith.constant 0 : index
    %c0_74 = arith.constant 0 : index
    %70 = vector.load %arg5[%c5, %c0_73, %c0_74] : memref<9x128x128xf32, #tpu.memory_space<vmem>>, vector<1x128x128xf32>
    %71 = vector.shape_cast %70 : vector<1x128x128xf32> to vector<128x128xf32>
    %cst_75 = arith.constant dense<0.000000e+00> : vector<288x128xf32>
    %72 = tpu.matmul %69, %71, %cst_75 {dimension_numbers = #tpu.dot_dimension_numbers<[1], [0], [0], [1], [0, 0, 1, 1], [], []>} : vector<288x128xf32>, vector<128x128xf32>, vector<288x128xf32> -> vector<288x128xf32>
    %73 = arith.addf %68, %72 : vector<288x128xf32>
    %c0_76 = arith.constant 0 : index
    %c0_77 = arith.constant 0 : index
    %c0_78 = arith.constant 0 : index
    %74 = vector.load %arg7[%c0_76, %c0_77, %c0_78] : memref<1x288x128xf32, #tpu.memory_space<vmem>>, vector<1x288x128xf32>
    %75 = vector.shape_cast %74 : vector<1x288x128xf32> to vector<288x128xf32>
    %76 = vector.shape_cast %73 : vector<288x128xf32> to vector<1x288x128xf32>
    tpu.vector_store %arg7[%c0_76, %c0_77, %c0_78], %76 {strides = array<i32>} : memref<1x288x128xf32, #tpu.memory_space<vmem>>, vector<1x288x128xf32>,
    %c0_79 = arith.constant 0 : index
    %c0_80 = arith.constant 0 : index
    %c0_81 = arith.constant 0 : index
    %77 = vector.load %arg7[%c0_79, %c0_80, %c0_81] : memref<1x288x128xf32, #tpu.memory_space<vmem>>, vector<1x288x128xf32>
    %78 = vector.shape_cast %77 : vector<1x288x128xf32> to vector<288x128xf32>
    %c36 = arith.constant 36 : index
    %c0_82 = arith.constant 0 : index
    %79 = vector.load %arg8[%c36, %c0_82] : memref<328x128xf32, #tpu.memory_space<vmem>>, vector<288x128xf32>
    %c6 = arith.constant 6 : index
    %c0_83 = arith.constant 0 : index
    %c0_84 = arith.constant 0 : index
    %80 = vector.load %arg5[%c6, %c0_83, %c0_84] : memref<9x128x128xf32, #tpu.memory_space<vmem>>, vector<1x128x128xf32>
    %81 = vector.shape_cast %80 : vector<1x128x128xf32> to vector<128x128xf32>
    %cst_85 = arith.constant dense<0.000000e+00> : vector<288x128xf32>
    %82 = tpu.matmul %79, %81, %cst_85 {dimension_numbers = #tpu.dot_dimension_numbers<[1], [0], [0], [1], [0, 0, 1, 1], [], []>} : vector<288x128xf32>, vector<128x128xf32>, vector<288x128xf32> -> vector<288x128xf32>
    %83 = arith.addf %78, %82 : vector<288x128xf32>
    %c0_86 = arith.constant 0 : index
    %c0_87 = arith.constant 0 : index
    %c0_88 = arith.constant 0 : index
    %84 = vector.load %arg7[%c0_86, %c0_87, %c0_88] : memref<1x288x128xf32, #tpu.memory_space<vmem>>, vector<1x288x128xf32>
    %85 = vector.shape_cast %84 : vector<1x288x128xf32> to vector<288x128xf32>
    %86 = vector.shape_cast %83 : vector<288x128xf32> to vector<1x288x128xf32>
    tpu.vector_store %arg7[%c0_86, %c0_87, %c0_88], %86 {strides = array<i32>} : memref<1x288x128xf32, #tpu.memory_space<vmem>>, vector<1x288x128xf32>,
    %c0_89 = arith.constant 0 : index
    %c0_90 = arith.constant 0 : index
    %c0_91 = arith.constant 0 : index
    %87 = vector.load %arg7[%c0_89, %c0_90, %c0_91] : memref<1x288x128xf32, #tpu.memory_space<vmem>>, vector<1x288x128xf32>
    %88 = vector.shape_cast %87 : vector<1x288x128xf32> to vector<288x128xf32>
    %c37 = arith.constant 37 : index
    %c0_92 = arith.constant 0 : index
    %89 = vector.load %arg8[%c37, %c0_92] : memref<328x128xf32, #tpu.memory_space<vmem>>, vector<288x128xf32>
    %c7 = arith.constant 7 : index
    %c0_93 = arith.constant 0 : index
    %c0_94 = arith.constant 0 : index
    %90 = vector.load %arg5[%c7, %c0_93, %c0_94] : memref<9x128x128xf32, #tpu.memory_space<vmem>>, vector<1x128x128xf32>
    %91 = vector.shape_cast %90 : vector<1x128x128xf32> to vector<128x128xf32>
    %cst_95 = arith.constant dense<0.000000e+00> : vector<288x128xf32>
    %92 = tpu.matmul %89, %91, %cst_95 {dimension_numbers = #tpu.dot_dimension_numbers<[1], [0], [0], [1], [0, 0, 1, 1], [], []>} : vector<288x128xf32>, vector<128x128xf32>, vector<288x128xf32> -> vector<288x128xf32>
    %93 = arith.addf %88, %92 : vector<288x128xf32>
    %c0_96 = arith.constant 0 : index
    %c0_97 = arith.constant 0 : index
    %c0_98 = arith.constant 0 : index
    %94 = vector.load %arg7[%c0_96, %c0_97, %c0_98] : memref<1x288x128xf32, #tpu.memory_space<vmem>>, vector<1x288x128xf32>
    %95 = vector.shape_cast %94 : vector<1x288x128xf32> to vector<288x128xf32>
    %96 = vector.shape_cast %93 : vector<288x128xf32> to vector<1x288x128xf32>
    tpu.vector_store %arg7[%c0_96, %c0_97, %c0_98], %96 {strides = array<i32>} : memref<1x288x128xf32, #tpu.memory_space<vmem>>, vector<1x288x128xf32>,
    %c0_99 = arith.constant 0 : index
    %c0_100 = arith.constant 0 : index
    %c0_101 = arith.constant 0 : index
    %97 = vector.load %arg7[%c0_99, %c0_100, %c0_101] : memref<1x288x128xf32, #tpu.memory_space<vmem>>, vector<1x288x128xf32>
    %98 = vector.shape_cast %97 : vector<1x288x128xf32> to vector<288x128xf32>
    %c38 = arith.constant 38 : index
    %c0_102 = arith.constant 0 : index
    %99 = vector.load %arg8[%c38, %c0_102] : memref<328x128xf32, #tpu.memory_space<vmem>>, vector<288x128xf32>
    %c8 = arith.constant 8 : index
    %c0_103 = arith.constant 0 : index
    %c0_104 = arith.constant 0 : index
    %100 = vector.load %arg5[%c8, %c0_103, %c0_104] : memref<9x128x128xf32, #tpu.memory_space<vmem>>, vector<1x128x128xf32>
    %101 = vector.shape_cast %100 : vector<1x128x128xf32> to vector<128x128xf32>
    %cst_105 = arith.constant dense<0.000000e+00> : vector<288x128xf32>
    %102 = tpu.matmul %99, %101, %cst_105 {dimension_numbers = #tpu.dot_dimension_numbers<[1], [0], [0], [1], [0, 0, 1, 1], [], []>} : vector<288x128xf32>, vector<128x128xf32>, vector<288x128xf32> -> vector<288x128xf32>
    %103 = arith.addf %98, %102 : vector<288x128xf32>
    %c0_106 = arith.constant 0 : index
    %c0_107 = arith.constant 0 : index
    %c0_108 = arith.constant 0 : index
    %104 = vector.load %arg7[%c0_106, %c0_107, %c0_108] : memref<1x288x128xf32, #tpu.memory_space<vmem>>, vector<1x288x128xf32>
    %105 = vector.shape_cast %104 : vector<1x288x128xf32> to vector<288x128xf32>
    %106 = vector.shape_cast %103 : vector<288x128xf32> to vector<1x288x128xf32>
    tpu.vector_store %arg7[%c0_106, %c0_107, %c0_108], %106 {strides = array<i32>} : memref<1x288x128xf32, #tpu.memory_space<vmem>>, vector<1x288x128xf32>,
    %c0_109 = arith.constant 0 : index
    %c0_110 = arith.constant 0 : index
    %c0_111 = arith.constant 0 : index
    %107 = vector.load %arg7[%c0_109, %c0_110, %c0_111] : memref<1x288x128xf32, #tpu.memory_space<vmem>>, vector<1x288x128xf32>
    %108 = vector.shape_cast %107 : vector<1x288x128xf32> to vector<288x128xf32>
    %c0_112 = arith.constant 0 : index
    %c0_113 = arith.constant 0 : index
    %109 = vector.load %arg6[%c0_112, %c0_113] : memref<1x128xf32, #tpu.memory_space<vmem>>, vector<1x128xf32>
    %110 = vector.broadcast %109 : vector<1x128xf32> to vector<288x128xf32>
    %111 = arith.addf %108, %110 : vector<288x128xf32>
    %cst_114 = arith.constant 0.000000e+00 : f32
    %112 = vector.broadcast %cst_114 : f32 to vector<288x128xf32>
    %113 = arith.maximumf %111, %112 : vector<288x128xf32>
    %c0_115 = arith.constant 0 : index
    %c0_116 = arith.constant 0 : index
    %c0_117 = arith.constant 0 : index
    %114 = vector.load %arg7[%c0_115, %c0_116, %c0_117] : memref<1x288x128xf32, #tpu.memory_space<vmem>>, vector<1x288x128xf32>
    %115 = vector.shape_cast %114 : vector<1x288x128xf32> to vector<288x128xf32>
    %116 = vector.shape_cast %113 : vector<288x128xf32> to vector<1x288x128xf32>
    tpu.vector_store %arg7[%c0_115, %c0_116, %c0_117], %116 {strides = array<i32>} : memref<1x288x128xf32, #tpu.memory_space<vmem>>, vector<1x288x128xf32>,
    return
  }
  func.func @transform_0(%arg0: i32) -> (i32, i32, i32) {
    %c0_i32 = arith.constant 0 : i32
    %c0_i32_0 = arith.constant 0 : i32
    %c0_i32_1 = arith.constant 0 : i32
    return %arg0, %c0_i32, %c0_i32_0 : i32, i32, i32
  }
  func.func @transform_1(%arg0: i32) -> (i32, i32) {
    %c0_i32 = arith.constant 0 : i32
    %c0_i32_0 = arith.constant 0 : i32
    %c0_i32_1 = arith.constant 0 : i32
    return %c0_i32, %c0_i32_0 : i32, i32
  }
  func.func @transform_2(%arg0: i32) -> (i32, i32) {
    %c0_i32 = arith.constant 0 : i32
    %c0_i32_0 = arith.constant 0 : i32
    %c0_i32_1 = arith.constant 0 : i32
    return %c0_i32, %c0_i32_0 : i32, i32
  }
  func.func @transform_3(%arg0: i32) -> (i32, i32) {
    %c0_i32 = arith.constant 0 : i32
    %c0_i32_0 = arith.constant 0 : i32
    %c0_i32_1 = arith.constant 0 : i32
    return %c0_i32, %c0_i32_0 : i32, i32
  }
  func.func @transform_4(%arg0: i32) -> (i32, i32, i32) {
    %c0_i32 = arith.constant 0 : i32
    %c0_i32_0 = arith.constant 0 : i32
    %c0_i32_1 = arith.constant 0 : i32
    %c0_i32_2 = arith.constant 0 : i32
    return %c0_i32, %c0_i32_0, %c0_i32_1 : i32, i32, i32
  }
  func.func @transform_5(%arg0: i32) -> (i32, i32) {
    %c0_i32 = arith.constant 0 : i32
    %c0_i32_0 = arith.constant 0 : i32
    %c0_i32_1 = arith.constant 0 : i32
    return %c0_i32, %c0_i32_0 : i32, i32
  }
  func.func @transform_6(%arg0: i32) -> (i32, i32, i32) {
    %c0_i32 = arith.constant 0 : i32
    %c0_i32_0 = arith.constant 0 : i32
    %c0_i32_1 = arith.constant 0 : i32
    return %arg0, %c0_i32, %c0_i32_0 : i32, i32, i32
  }
}

</mosaic_0001>

<bundles_post_ra>
// kernel: fire_forward.1
= control target key start
LH: loop header
LB: loop body
LE: loop exit
PB: predicated region body
PF: predicated region fallthrough
CT: control target
= control target key end

     0   :  { %11 = vsyncpa [#allocation4], 0  ;;  %s8882_s0 = inlined_call_operand.hbm [shape: f32[2,328,4], index: 0, kind: input, shape index: {}]   ;;  %s8883_s1 = inlined_call_operand.hbm [shape: f32[328,1], index: 1, kind: input, shape index: {}]   ;;  %s8884_s2 = inlined_call_operand.hbm [shape: f32[4,128], index: 2, kind: input, shape index: {}]   ;;  %s8885_s3 = inlined_call_operand.hbm [shape: f32[1,128], index: 3, kind: input, shape index: {}]   ;;  %s8886_s4 = inlined_call_operand.hbm [shape: f32[9,128,128], index: 4, kind: input, shape index: {}]   ;;  %s8887_s5 = inlined_call_operand.hbm [shape: f32[1,128], index: 5, kind: input, shape index: {}]   ;;  %s8888_s6 = inlined_call_operand.hbm [shape: f32[2,288,128], index: 6, kind: output, shape index: {}]  }
   0x1   :  { %13 = vsyncpa [#allocation4 + $0x1], 0 }
   0x2   :  { %14 = vsyncpa [#allocation7], 0 }
   0x3   :  { %15 = vsyncpa [#allocation10], 0 }
   0x4   :  { %16 = vsyncpa [#allocation13], 0 }
   0x5   :  { %17 = vsyncpa [#allocation5], 0 }
   0x6   :  { %19 = vsyncpa [#allocation5 + $0x1], 0  ;;  %s7781_s21 = smov 0   ;;  %s7783_s22 = smov 0  }
   0x7   :  { %s7785_s23 = smov 0   ;;  %s7787_s24 = smov 0  }
   0x8 LB: > { %s7732_s25 = smov [#allocation6]   ;;  %s7802_s27 = sadd.s32 4294967295, %s7730_s24   ;;  %s7730_s24 = sphi %s7787_s24, %s8921_s24   ;;  %s7726_s23 = sphi %s7785_s23, %s8920_s23   ;;  %s7722_s22 = sphi %s7783_s22, %s8919_s22   ;;  %s7718_s21 = sphi %s7781_s21, %s8918_s21  }
   0x9   : > { %s199_s26 = sshll.u32 %s7732_s25, 4  ;;  %p5129_p0 = scmp.ge.s32.totalorder %s7730_s24, 1  ;;  %s7807_s26 = int_to_ptr.vmem [resolvable:$true] %s199_s26 }
   0xa   : > { %p8889_p1 = scmp.eq.s32.totalorder %s7802_s27, 0  ;;  %p187_p2 = scmp.lt.s32.totalorder %s7730_s24, 3 }
   0xb   : > { %s7733_s29 = smov [#allocation9]   ;;  %s7734_s8 = smov [#allocation8]  }
   0xc   : > { %p7809_p3 = pnand %p5129_p0, %p187_p2  ;;  %s224_s30 = sshll.u32 %s7733_s29, 4  ;;  %s7822_s30 = int_to_ptr.vmem [resolvable:$true] %s224_s30 }
   0xd   : > { %s213_s9 = sshll.u32 %s7734_s8, 4  ;;  %s7482_s12 = scalar_lea.hbm %s8883_s1, 5248  ;;  %s7824_s9 = int_to_ptr.vmem [resolvable:$true] %s213_s9 }
   0xe   : > { %s8896_s28 = scalar_select %p7809_p3, 1, 0 }
   0xf   : > { %p7400_p5 = pneg %p7809_p3  ;;  %p7483_p7 = scmp.ne.s32.totalorder %s8883_s1, %s7482_s12 }
  0x10   : > { %p7489_p11 = scmp.lt.u32.totalorder %s7482_s12, %s8883_s1 }
  0x11   : > { %p7818_p6 = pnand %p7400_p5, %p8889_p1 }
  0x13   : > { %p7834_p8 = pneg %p7818_p6 }
  0x15   : > { %p7485_p9 = pnand %p7834_p8, %p7483_p7 }
  0x17   : > { %p7486_p10 = pneg %p7485_p9 }
  0x19   : > { %p7491_p12 = pnand %p7489_p11, %p7486_p10 }
  0x1b   : > { %7494 = shalt.err (!%p7491_p12)
}
  0x1c   : > { %s7495_s18 = scalar_lea.vmem %s7807_s26, 5248  ;;  %p7503_p5 = scmp.lt.s32.totalorder %s7807_s26, %s7807_s26 }
  0x1d   : > { %p7496_p13 = scmp.ne.s32.totalorder %s7807_s26, %s7495_s18  ;;  %p7504_p4 = scmp.lt.s32.totalorder %s7495_s18, %s7495_s18 }
  0x1f   : > { %p7498_p0 = pnand %p7496_p13, %p7834_p8  ;;  %p7505_p7 = por %p7504_p4, %p7503_p5 }
  0x21   : > { %p7499_p2 = pneg %p7498_p0 }
  0x23   : > { %p7506_p9 = pnand %p7505_p7, %p7499_p2 }
  0x25   : > { %7509 = shalt.err (!%p7506_p9)
}
  0x26   : > { %s8891_s19 = smov 128   ;;  %s8892_s20 = smov 8  }
  0x27   : > { %7403 = dma.hbm_to_vmem [thread:$0]  (!%p7818_p6), %s8883_s1, 5248, %s7807_s26, [#allocation7], %s8891_s19, %s8891_s19, %s8892_s20  }
  0x28   : > { %s7510_s11 = scalar_lea.hbm %s8885_s3, 16 }
  0x29   : > { %p7511_p4 = scmp.ne.s32.totalorder %s8885_s3, %s7510_s11  ;;  %p7517_p12 = scmp.lt.u32.totalorder %s7510_s11, %s8885_s3 }
  0x2b   : > { %p7513_p10 = pnand %p7511_p4, %p7834_p8 }
  0x2d   : > { %p7514_p11 = pneg %p7513_p10 }
  0x2f   : > { %p7519_p13 = pnand %p7517_p12, %p7514_p11 }
  0x31   : > { %7522 = shalt.err (!%p7519_p13)
}
  0x32   : > { %s7523_s26 = scalar_lea.vmem %s7822_s30, 16  ;;  %s7530_s17 = scalar_lea.vmem %s7822_s30, 32 }
  0x33   : > { %p7524_p0 = scmp.ne.s32.totalorder %s7822_s30, %s7523_s26  ;;  %p7531_p7 = scmp.lt.s32.totalorder %s7822_s30, %s7822_s30 }
  0x34   : > { %p7532_p9 = scmp.lt.s32.totalorder %s7530_s17, %s7523_s26 }
  0x35   : > { %p7526_p2 = pnand %p7524_p0, %p7834_p8 }
  0x36   : > { %p7533_p4 = por %p7532_p9, %p7531_p7 }
  0x37   : > { %p7527_p5 = pneg %p7526_p2 }
  0x39   : > { %p7534_p10 = pnand %p7533_p4, %p7527_p5 }
  0x3b   : > { %7537 = shalt.err (!%p7534_p10)
}
  0x3c   : > { %7409 = dma.hbm_to_vmem [thread:$0]  (!%p7818_p6), %s8885_s3, 16, %s7822_s30, [#allocation10]  }
  0x3d   : > { %s7538_s10 = scalar_lea.hbm %s8884_s2, 64 }
  0x3e   : > { %p7539_p11 = scmp.ne.s32.totalorder %s8884_s2, %s7538_s10  ;;  %p7545_p0 = scmp.lt.u32.totalorder %s7538_s10, %s8884_s2 }
  0x40   : > { %p7541_p12 = pnand %p7539_p11, %p7834_p8 }
  0x42   : > { %p7542_p13 = pneg %p7541_p12 }
  0x44   : > { %p7547_p2 = pnand %p7545_p0, %p7542_p13 }
  0x46   : > { %7550 = shalt.err (!%p7547_p2)
}
  0x47   : > { %s7551_s30 = scalar_lea.vmem %s7824_s9, 64  ;;  %p7559_p4 = scmp.lt.s32.totalorder %s7824_s9, %s7824_s9 }
  0x48   : > { %p7552_p5 = scmp.ne.s32.totalorder %s7824_s9, %s7551_s30  ;;  %p7560_p10 = scmp.lt.s32.totalorder %s7551_s30, %s7551_s30 }
  0x4a   : > { %p7554_p7 = pnand %p7552_p5, %p7834_p8  ;;  %p7561_p11 = por %p7560_p10, %p7559_p4 }
  0x4c   : > { %p7555_p9 = pneg %p7554_p7 }
  0x4e   : > { %p7562_p12 = pnand %p7561_p11, %p7555_p9 }
  0x50   : > { %7565 = shalt.err (!%p7562_p12)
}
  0x51   : > { %7406 = dma.hbm_to_vmem [thread:$0]  (!%p7818_p6), %s8884_s2, 64, %s7824_s9, [#allocation7]  }
  0x52   : > { %s7737_s17 = smov [#allocation11]   ;;  %s7738_s25 = smov [#allocation12]  }
  0x53   : > { %s234_s18 = sshll.u32 %s7737_s17, 4  ;;  %s248_s29 = sshll.u32 %s7738_s25, 4  ;;  %s235_s18 = int_to_ptr.vmem [resolvable:$true] %s234_s18  ;;  %s249_s29 = int_to_ptr.vmem [resolvable:$true] %s248_s29 }
  0x54   : > { %s7566_s11 = scalar_lea.hbm %s8886_s4, 18432 }
  0x55   : > { %p7567_p13 = scmp.ne.s32.totalorder %s8886_s4, %s7566_s11  ;;  %p7573_p5 = scmp.lt.u32.totalorder %s7566_s11, %s8886_s4 }
  0x57   : > { %p7569_p0 = pnand %p7567_p13, %p7834_p8 }
  0x59   : > { %p7570_p2 = pneg %p7569_p0 }
  0x5b   : > { %p7575_p7 = pnand %p7573_p5, %p7570_p2 }
  0x5d   : > { %7578 = shalt.err (!%p7575_p7)
}
  0x5e   : > { %s7579_s9 = scalar_lea.vmem %s235_s18, 18432  ;;  %p7587_p11 = scmp.lt.s32.totalorder %s235_s18, %s235_s18 }
  0x5f   : > { %p7580_p9 = scmp.ne.s32.totalorder %s235_s18, %s7579_s9  ;;  %p7588_p12 = scmp.lt.s32.totalorder %s7579_s9, %s7579_s9 }
  0x61   : > { %p7582_p4 = pnand %p7580_p9, %p7834_p8  ;;  %p7589_p1 = por %p7588_p12, %p7587_p11 }
  0x63   : > { %p7583_p10 = pneg %p7582_p4 }
  0x65   : > { %p7590_p3 = pnand %p7589_p1, %p7583_p10 }
  0x67   : > { %7593 = shalt.err (!%p7590_p3)
}
  0x68   : > { %7412 = dma.hbm_to_vmem [thread:$0]  (!%p7818_p6), %s8886_s4, 18432, %s235_s18, [#allocation10], %s8891_s19, %s8891_s19, %s8892_s20  }
  0x69   : > { %s7594_s8 = scalar_lea.hbm %s8887_s5, 16 }
  0x6a   : > { %p7595_p1 = scmp.ne.s32.totalorder %s8887_s5, %s7594_s8  ;;  %p7601_p0 = scmp.lt.u32.totalorder %s7594_s8, %s8887_s5 }
  0x6c   : > { %p7597_p3 = pnand %p7595_p1, %p7834_p8 }
  0x6e   : > { %p7598_p13 = pneg %p7597_p3 }
  0x70   : > { %p7603_p2 = pnand %p7601_p0, %p7598_p13 }
  0x72   : > { %7606 = shalt.err (!%p7603_p2)
}
  0x73   : > { %s7607_s14 = scalar_lea.vmem %s249_s29, 16  ;;  %s7614_s18 = scalar_lea.vmem %s249_s29, 32 }
  0x74   : > { %p7608_p5 = scmp.ne.s32.totalorder %s249_s29, %s7607_s14  ;;  %p7615_p4 = scmp.lt.s32.totalorder %s249_s29, %s249_s29 }
  0x75   : > { %p7616_p10 = scmp.lt.s32.totalorder %s7614_s18, %s7607_s14 }
  0x76   : > { %p7610_p7 = pnand %p7608_p5, %p7834_p8 }
  0x77   : > { %p7617_p11 = por %p7616_p10, %p7615_p4 }
  0x78   : > { %p7611_p9 = pneg %p7610_p7 }
  0x7a   : > { %p7618_p12 = pnand %p7617_p11, %p7611_p9 }
  0x7c   : > { %7621 = shalt.err (!%p7618_p12)
}
  0x7d   : > { %7415 = dma.hbm_to_vmem [thread:$0]  (!%p7818_p6), %s8887_s5, 16, %s249_s29, [#allocation13]  }
  0x7e   : > { %s5128_s15 = sadd.s32 4294967294, %s7730_s24   ;;  %s7946_s7 = sadd.s32 1, %s7730_s24  }
  0x7f   : > { %s32_s16 = sadd.s32 1, %s7726_s23  ;;  %s29_s26 = ssub.s32 %s7730_s24, %s7946_s7 }
  0x80   : > { %p39_p8 = scmp.ne.s32.totalorder %s7726_s23, %s7722_s22  ;;  %p30_p1 = scmp.eq.s32.totalorder %s29_s26, 0 }
  0x81   : > { %p40_p3 = scmp.eq.s32.totalorder %s7730_s24, 0  ;;  %p45_p13 = scmp.ne.s32.totalorder %s7722_s22, %s7718_s21 }
  0x82   : > { %p174_p0 = scmp.eq.s32.totalorder %s7802_s27, 1  ;;  %p8899_p5 = scmp.eq.s32.totalorder %s7802_s27, 0 }
  0x83   : > { %s7958_s17 = scalar_select %p30_p1, %s7726_s23, %s32_s16  }
  0x84   : > { %p41_p2 = por %p40_p3, %p39_p8  ;;  %p7962_p7 = por %p8899_p5, %p45_p13 }
  0x85   : > { %p7966_p6 = por %p174_p0, %p39_p8  ;;  %p180_p9 = scmp.eq.s32.totalorder %s5128_s15, 1 }
  0x86   : > { %p7429_p4 = scmp.lt.s32.totalorder %s7730_s24, 2  ;;  %s259_s8 = sand.u32 1, %s7726_s23  }
  0x87   : > { %s8901_s29 = scalar_select %p7966_p6, 1, 0 }
  0x88   : > { %p7972_p10 = por %p180_p9, %p45_p13  ;;  %s7371_s11 = smul.u32 328, %s259_s8 }
  0x89   : > { %p7976_p11 = pnand %p7429_p4, %p41_p2  ;;  %s7372_s13 = smul.u32 5248, %s7730_s24 }
  0x8a   : > { %s8902_s10 = scalar_select %p7972_p10, 1, 0 }
  0x8b   : > { %s7984_s30 = scalar_lea.hbm %s8882_s0, %s7372_s13  ;;  %s263_s9 = scalar_lea.vmem [#allocation3], %s7371_s11 }
  0x8c   : > { %s270_s15 = sshll.u32 %s263_s9, 4  ;;  %s7988_s16 = scalar_lea.sflag [#allocation4], %s259_s8  ;;  %s7986_s15 = int_to_ptr.vmem [resolvable:$true] %s270_s15 }
  0x8d   : > { %s7622_s26 = scalar_lea.hbm %s7984_s30, 5248  ;;  %p7624_p8 = pneg %p7976_p11 }
  0x8e   : > { %p7623_p12 = scmp.ne.s32.totalorder %s7984_s30, %s7622_s26  ;;  %s7627_s18 = scalar_lea.hbm %s8882_s0, 10496 }
  0x8f   : > { %p7628_p13 = scmp.lt.u32.totalorder %s7984_s30, %s8882_s0  ;;  %p7629_p0 = scmp.lt.u32.totalorder %s7627_s18, %s7622_s26 }
  0x90   : > { %p7625_p1 = pnand %p7624_p8, %p7623_p12  ;;  %p7631_p5 = scmp.lt.u32.totalorder %s7622_s26, %s7984_s30 }
  0x91   : > { %p7630_p2 = por %p7629_p0, %p7628_p13 }
  0x92   : > { %p7626_p3 = pneg %p7625_p1 }
  0x93   : > { %p7632_p9 = por %p7631_p5, %p7630_p2 }
  0x95   : > { %p7633_p4 = pnand %p7632_p9, %p7626_p3 }
  0x97   : > { %7636 = shalt.err (!%p7633_p4)
}
  0x98   : > { %s7637_s8 = scalar_lea.vmem %s7986_s15, 5248  ;;  %s7739_s11 = smov [#allocation3]  }
  0x99   : > { %p7638_p12 = scmp.ne.s32.totalorder %s7986_s15, %s7637_s8  ;;  %s7642_s9 = sshll.u32 %s7739_s11, 4  ;;  %s7643_s9 = int_to_ptr.vmem [resolvable:$false] %s7642_s9 }
  0x9a   : > { %s7644_s19 = scalar_lea.vmem %s7643_s9, 10496  ;;  %p7645_p6 = scmp.lt.s32.totalorder %s7986_s15, %s7643_s9 }
  0x9b   : > { %p7640_p1 = pnand %p7638_p12, %p7624_p8  ;;  %p7646_p13 = scmp.lt.s32.totalorder %s7644_s19, %s7637_s8 }
  0x9d   : > { %p7641_p10 = pneg %p7640_p1  ;;  %p7647_p0 = por %p7646_p13, %p7645_p6 }
  0x9f   : > { %p7648_p2 = pnand %p7647_p0, %p7641_p10 }
  0xa1   : > { %7651 = shalt.err (!%p7648_p2)
}
  0xa2   : > { %s8904_s20 = smov 8   ;;  %s8905_s26 = smov 128  }
  0xa3   : > { %7419 = dma.hbm_to_vmem [thread:$0]  (!%p7976_p11), %s7984_s30, 5248, %s7986_s15, %s7988_s16, %s8905_s26, %s8905_s26, %s8904_s20  }
  0xa4   : > { %p8906_p8 = scmp.ne.s32.totalorder %s8896_s28, 0 }
  0xa6   : > { %282 = sbr.rel (%p8906_p8) target bundleno = 1164 (0x48c), region = 44 }
  0xad   : > { %s8022_s13 = sand.u32 1, %s7722_s22  }
  0xae   : > { %s7373_s14 = smul.u32 328, %s8022_s13  ;;  %s285_s18 = scalar_lea.sflag [#allocation4], %s8022_s13 }
  0xb0   : > { %s8026_s8 = scalar_lea.vmem [#allocation3], %s7373_s14 }
  0xb1   : > { %7697 = dma.done.wait (%p7962_p7), %s285_s18, 5248  }
  0xb2   : > { %7699 = vsyncadd (%p7962_p7), %s285_s18, 4294962048  ;;  %p8907_p6 = scmp.eq.s32.totalorder %s7802_s27, 0 }
  0xb4   : > { %7701 = dma.done.wait (%p8907_p6), [#allocation7], 5312   ;;  %p8908_p10 = pmov %p8907_p6 }
  0xb5   : > { %p8909_p11 = pmov %p8907_p6 }
  0xb6   : > { %7703 = vsyncadd (%p8908_p10), [#allocation7], 4294961984 }
  0xb7   : > { %7705 = dma.done.wait (%p8909_p11), [#allocation10], 18448   ;;  %p8910_p3 = pmov %p8907_p6 }
  0xb9   : > { %7707 = vsyncadd (%p8910_p3), [#allocation10], 4294948848  ;;  %p8911_p5 = pmov %p8910_p3 }
  0xba   : > { %p8912_p9 = pmov %p8910_p3 }
  0xbb   : > { %7709 = dma.done.wait (%p8911_p5), [#allocation13], 16  }
  0xbc   : > { %7711 = vsyncadd (%p8912_p9), [#allocation13], 4294967280  ;;  %v7740_v0 = vmov 0.0   ;;  %vm7741_vm0 = vmmov 0   ;;  %v7742_v1 = vmov 0   ;;  %vm510_vm1 = vcmask 1043456  }
  0xbd   : > { %5700 = vmatprep.subr.mxu0 %v7740_v0  ;;  %5702 = vmatprep.mubr.msk.f32.mxu0 %vm7741_vm0, %v7740_v0  ;;  %vm386_vm2 = vcmask 31744   ;;  %v378_v2 = vld [vmem:[#allocation8] sm:$0xf]  ;;  %v337_v3 = vld [vmem:[%s8026_s8] sm:$0xff]  ;;  %v849_v4 = vld [vmem:[#allocation6 + $0xc0] sm:$0xff]  ;;  %s7374_s28 = smul.u32 288, %s8022_s13 }
  0xbe   : > { %7481 = vset.pattern.permute.xlu1 %v7742_v1  ;;  %7480 = vset.pattern.permute.xlu0 %v7742_v1  ;;  %v847_v5 = vld [vmem:[#allocation6 + $0xb0] sm:$0xff]  ;;  %v338_v6 = vld [vmem:[%s8026_s8 + $0x8] sm:$0xff]  ;;  %v850_v7 = vld [vmem:[#allocation6 + $0xc8] sm:$0xff]  ;;  %s7375_s12 = smul.u32 4608, %s7802_s27  ;;  %s4994_s27 = scalar_lea.sflag [#allocation5], %s8022_s13 }
  0xbf   : > { %5701 = vmatpush3.msk.msra.mxu0 %vm510_vm1, %v378_v2  ;;  %988 = vperm.xlu1 %7481, %v849_v4   ;;  %v848_v8 = vld [vmem:[#allocation6 + $0xb8] sm:$0xff]  ;;  %v339_v9 = vld [vmem:[%s8026_s8 + $0x10] sm:$0xff]  ;;  %v851_v11 = vld [vmem:[#allocation6 + $0xd0] sm:$0xff]  ;;  %s8734_s25 = scalar_lea.vmem [#allocation14], %s7374_s28  ;;  %p8915_p4 = scmp.ne.s32.totalorder %s8901_s29, 0 }
  0xc0   : > { %5703 = vmatmul.mubr.msk.f32.vlgmr.msra.gmra.mrb[0].mxu0 %vm386_vm2, %v337_v3  ;;  %978 = vperm.xlu0 %7480, %v847_v5   ;;  %v852_v10 = vld [vmem:[#allocation6 + $0xd8] sm:$0xff]  ;;  %v340_v12 = vld [vmem:[%s8026_s8 + $0x18] sm:$0xff]  ;;  %v853_v14 = vld [vmem:[#allocation6 + $0xe0] sm:$0xff]  ;;  %s5007_s30 = sshll.u32 %s8734_s25, 4  ;;  %s8834_s11 = scalar_lea.hbm %s8888_s6, %s7375_s12  ;;  %s8836_s30 = int_to_ptr.vmem [resolvable:$true] %s5007_s30 }
  0xc1   : > { %5705 = vmatprep.mubr.msk.f32.mxu0 %vm7741_vm0, %v7740_v0  ;;  %v854_v13 = vld [vmem:[#allocation6 + $0xe8] sm:$0xff]  ;;  %v341_v15 = vld [vmem:[%s8026_s8 + $0x20] sm:$0xff]  ;;  %v342_v18 = vld [vmem:[%s8026_s8 + $0x28] sm:$0xff]  ;;  %s7652_s9 = scalar_lea.vmem %s8836_s30, 4608  ;;  %s7743_s19 = smov [#allocation14]  }
  0xc2   : > { %v856_v16 = vld [vmem:[#allocation6 + $0xf8] sm:$0xff]  ;;  %v855_v17 = vld [vmem:[#allocation6 + $0xf0] sm:$0xff]  ;;  %v858_v19 = vld [vmem:[#allocation6 + $0x108] sm:$0xff]  ;;  %p7653_p7 = scmp.ne.s32.totalorder %s8836_s30, %s7652_s9  ;;  %s7656_s20 = sshll.u32 %s7743_s19, 4  ;;  %s7657_s20 = int_to_ptr.vmem [resolvable:$false] %s7656_s20 }
  0xc3   : > { %993 = vperm.xlu1 %7481, %v850_v7   ;;  %v857_v20 = vld [vmem:[#allocation6 + $0x100] sm:$0xff]  ;;  %v860_v22 = vld [vmem:[#allocation6 + $0x118] sm:$0xff]  ;;  %v859_v23 = vld [vmem:[#allocation6 + $0x110] sm:$0xff]  ;;  %s7658_s26 = scalar_lea.vmem %s7657_s20, 9216  ;;  %p7659_p13 = scmp.lt.s32.totalorder %s8836_s30, %s7657_s20 }
  0xc4   : > { %5706 = vmatmul.mubr.msk.f32.gmra.mrb[2].mxu0 %vm386_vm2, %v338_v6  ;;  %983 = vperm.xlu0 %7480, %v848_v8   ;;  %v343_v21 = vld [vmem:[%s8026_s8 + $0x30] sm:$0xff]  ;;  %v344_v24 = vld [vmem:[%s8026_s8 + $0x38] sm:$0xff]  ;;  %v345_v27 = vld [vmem:[%s8026_s8 + $0x40] sm:$0xff]  ;;  %p7654_p12 = pnand %p7653_p7, %p8915_p4  ;;  %p7660_p0 = scmp.lt.s32.totalorder %s7658_s26, %s7652_s9 }
  0xc5   : > { %5708 = vmatprep.mubr.msk.f32.mxu0 %vm7741_vm0, %v7740_v0  ;;  %v862_v25 = vld [vmem:[#allocation6 + $0x128] sm:$0xff]  ;;  %v861_v26 = vld [vmem:[#allocation6 + $0x120] sm:$0xff]  ;;  %v827_v28 = vld [vmem:[#allocation6 + $0x10] sm:$0xff] }
  0xc6   : > { %v863_v29 = vld [vmem:[#allocation6 + $0x130] sm:$0xff]  ;;  %v346_v30 = vld [vmem:[%s8026_s8 + $0x48] sm:$0xff]  ;;  %v347_v33 = vld [vmem:[%s8026_s8 + $0x50] sm:$0xff]  ;;  %p7655_p1 = pneg %p7654_p12  ;;  %p7661_p2 = por %p7660_p0, %p7659_p13 }
  0xc7   : > { %1003 = vperm.xlu1 %7481, %v852_v10   ;;  %v829_v31 = vld [vmem:[#allocation6 + $0x20] sm:$0xff]  ;;  %v828_v32 = vld [vmem:[#allocation6 + $0x18] sm:$0xff]  ;;  %v831_v34 = vld [vmem:[#allocation6 + $0x30] sm:$0xff] }
  0xc8   : > { %5709 = vmatmul.mubr.msk.f32.gmra.mrb[4].mxu0 %vm386_vm2, %v339_v9  ;;  %998 = vperm.xlu0 %7480, %v851_v11   ;;  %v830_v35 = vld [vmem:[#allocation6 + $0x28] sm:$0xff]  ;;  %v833_v37 = vld [vmem:[#allocation6 + $0x40] sm:$0xff]  ;;  %v832_v38 = vld [vmem:[#allocation6 + $0x38] sm:$0xff]  ;;  %p7662_p8 = pnand %p7661_p2, %p7655_p1 }
  0xc9   : > { %5711 = vmatprep.mubr.msk.f32.mxu0 %vm7741_vm0, %v7740_v0  ;;  %v348_v36 = vld [vmem:[%s8026_s8 + $0x58] sm:$0xff]  ;;  %v349_v39 = vld [vmem:[%s8026_s8 + $0x60] sm:$0xff]  ;;  %v350_v42 = vld [vmem:[%s8026_s8 + $0x68] sm:$0xff] }
  0xca   : > { %v835_v40 = vld [vmem:[#allocation6 + $0x50] sm:$0xff]  ;;  %v834_v41 = vld [vmem:[#allocation6 + $0x48] sm:$0xff]  ;;  %v837_v43 = vld [vmem:[#allocation6 + $0x60] sm:$0xff] }
  0xcb   : > { %1013 = vperm.xlu1 %7481, %v854_v13   ;;  %v836_v44 = vld [vmem:[#allocation6 + $0x58] sm:$0xff]  ;;  %v1261_v45 = vld [vmem:[#allocation11] sm:$0xff]  ;;  %v1264_v52 = vld [vmem:[#allocation11 + $0x18] sm:$0xff] }
  0xcc   : > { %5712 = vmatmul.mubr.msk.f32.gmra.mrb[6].mxu0 %vm386_vm2, %v340_v12  ;;  %1008 = vperm.xlu0 %7480, %v853_v14   ;;  %v1262_v46 = vld [vmem:[#allocation11 + $0x8] sm:$0xff]  ;;  %v351_v47 = vld [vmem:[%s8026_s8 + $0x70] sm:$0xff] }
  0xcd   : > { %5714 = vmatprep.mubr.msk.f32.mxu0 %vm7741_vm0, %v7740_v0  ;;  %v839_v48 = vld [vmem:[#allocation6 + $0x70] sm:$0xff]  ;;  %v6599_v49 = vpack.c.bf16 %v1262_v46, %v1261_v45  ;;  %v838_v50 = vld [vmem:[#allocation6 + $0x68] sm:$0xff]  ;;  %v1263_v51 = vld [vmem:[#allocation11 + $0x10] sm:$0xff] }
  0xce   : > { %v352_v53 = vld [vmem:[%s8026_s8 + $0x78] sm:$0xff]  ;;  %v841_v54 = vld [vmem:[#allocation6 + $0x80] sm:$0xff]  ;;  %v6603_v55 = vpack.c.bf16 %v1264_v52, %v1263_v51  ;;  %v840_v56 = vld [vmem:[#allocation6 + $0x78] sm:$0xff] }
  0xcf   : > { %1023 = vperm.xlu1 %7481, %v856_v16   ;;  %6600 = vmatprep.subr.bf16.mxu0 %v6599_v49  ;;  %v1265_v57 = vld [vmem:[#allocation11 + $0x20] sm:$0xff]  ;;  %v1266_v58 = vld [vmem:[#allocation11 + $0x28] sm:$0xff]  ;;  %v1267_v63 = vld [vmem:[#allocation11 + $0x30] sm:$0xff] }
  0xd0   : > { %5715 = vmatmul.mubr.msk.f32.gmra.mrb[8].mxu0 %vm386_vm2, %v341_v15  ;;  %1018 = vperm.xlu0 %7480, %v855_v17   ;;  %v353_v59 = vld [vmem:[%s8026_s8 + $0x80] sm:$0xff]  ;;  %v6607_v61 = vpack.c.bf16 %v1266_v58, %v1265_v57  ;;  %v842_v62 = vld [vmem:[#allocation6 + $0x88] sm:$0xff]  ;;  %v354_v1 = vld [vmem:[%s8026_s8 + $0x88] sm:$0xff] }
  0xd1   : > { %5717 = vmatprep.mubr.msk.f32.mxu0 %vm7741_vm0, %v7740_v0  ;;  %6602 = vmatpush3.bf16.msra.mxu0 %v6599_v49  ;;  %v843_v60 = vld [vmem:[#allocation6 + $0x90] sm:$0xff]  ;;  %v845_v2 = vld [vmem:[#allocation6 + $0xa0] sm:$0xff]  ;;  %v844_v4 = vld [vmem:[#allocation6 + $0x98] sm:$0xff] }
  0xd2   : > { %6604 = vmatprep.subr.bf16.mxu0 %v6603_v55  ;;  %v1268_v3 = vld [vmem:[#allocation11 + $0x38] sm:$0xff]  ;;  %v864_v10 = vld [vmem:[#allocation6 + $0x138] sm:$0xff]  ;;  %v1269_v12 = vld [vmem:[#allocation11 + $0x40] sm:$0xff] }
  0xd3   : > { %1033 = vperm.xlu1 %7481, %v858_v19   ;;  %v6611_v5 = vpack.c.bf16 %v1268_v3, %v1267_v63  ;;  %v355_v6 = vld [vmem:[%s8026_s8 + $0x90] sm:$0xff]  ;;  %v356_v9 = vld [vmem:[%s8026_s8 + $0x98] sm:$0xff]  ;;  %v357_v15 = vld [vmem:[%s8026_s8 + $0xa0] sm:$0xff] }
  0xd4   : > { %5718 = vmatmul.mubr.msk.f32.gmra.mrb[10].mxu0 %vm386_vm2, %v342_v18  ;;  %1028 = vperm.xlu0 %7480, %v857_v20   ;;  %v825_v7 = vld [vmem:[#allocation6] sm:$0xff]  ;;  %v846_v8 = vld [vmem:[#allocation6 + $0xa8] sm:$0xff]  ;;  %v1270_v13 = vld [vmem:[#allocation11 + $0x48] sm:$0xff] }
  0xd5   : > { %5720 = vmatprep.mubr.msk.f32.mxu0 %vm7741_vm0, %v7740_v0  ;;  %6606 = vmatpush3.bf16.msra.mxu0 %v6603_v55  ;;  %v826_v11 = vld [vmem:[#allocation6 + $0x8] sm:$0xff]  ;;  %v6615_v14 = vpack.c.bf16 %v1270_v13, %v1269_v12  ;;  %v865_v16 = vld [vmem:[#allocation6 + $0x140] sm:$0xff]  ;;  %v373_v49 = vld [vmem:[%s8026_s8 + $0x120] sm:$0xff] }
  0xd6   : > { %6608 = vmatprep.subr.bf16.mxu0 %v6607_v61  ;;  %v1271_v17 = vld [vmem:[#allocation11 + $0x50] sm:$0xff]  ;;  %v1272_v18 = vld [vmem:[#allocation11 + $0x58] sm:$0xff]  ;;  %v2479_v63 = vld [vmem:[#allocation11 + $0x180] sm:$0xff] }
  0xd7   : > { %1043 = vperm.xlu1 %7481, %v860_v22   ;;  %v6619_v19 = vpack.c.bf16 %v1272_v18, %v1271_v17  ;;  %v358_v20 = vld [vmem:[%s8026_s8 + $0xa8] sm:$0xff]  ;;  %v372_v46 = vld [vmem:[%s8026_s8 + $0x118] sm:$0xff]  ;;  %v375_v55 = vld [vmem:[%s8026_s8 + $0x130] sm:$0xff] }
  0xd8   : > { %5721 = vmatmul.mubr.msk.f32.gmra.mrb[12].mxu0 %vm386_vm2, %v343_v21  ;;  %1038 = vperm.xlu0 %7480, %v859_v23   ;;  %v1273_v21 = vld [vmem:[#allocation11 + $0x60] sm:$0xff]  ;;  %v1274_v22 = vld [vmem:[#allocation11 + $0x68] sm:$0xff] }
  0xd9   : > { %5723 = vmatprep.mubr.msk.f32.mxu0 %vm7741_vm0, %v7740_v0  ;;  %6610 = vmatpush3.bf16.msra.mxu0 %v6607_v61  ;;  %v6623_v23 = vpack.c.bf16 %v1274_v22, %v1273_v21  ;;  %v374_v52 = vld [vmem:[%s8026_s8 + $0x128] sm:$0xff]  ;;  %v376_v58 = vld [vmem:[%s8026_s8 + $0x138] sm:$0xff]  ;;  %v377_v61 = vld [vmem:[%s8026_s8 + $0x140] sm:$0xff] }
  0xda   : > { %6612 = vmatprep.subr.bf16.mxu0 %v6611_v5  ;;  %v2487_v18 = vld [vmem:[#allocation11 + $0x1c0] sm:$0xff] }
  0xdb   : > { %1053 = vperm.xlu1 %7481, %v862_v25   ;;  %v1275_v25 = vld [vmem:[#allocation11 + $0x70] sm:$0xff] }
  0xdc   : > { %5724 = vmatmul.mubr.msk.f32.gmra.mrb[14].mxu0 %vm386_vm2, %v344_v24  ;;  %1048 = vperm.xlu0 %7480, %v861_v26   ;;  %v359_v24 = vld [vmem:[%s8026_s8 + $0xb0] sm:$0xff] }
  0xdd   : > { %5726 = vmatprep.mubr.msk.f32.mxu0 %vm7741_vm0, %v7740_v0  ;;  %6614 = vmatpush3.bf16.msra.mxu0 %v6611_v5  ;;  %v1276_v26 = vld [vmem:[#allocation11 + $0x78] sm:$0xff]  ;;  %v2481_v5 = vld [vmem:[#allocation11 + $0x190] sm:$0xff] }
  0xde   : > { %6616 = vmatprep.subr.bf16.mxu0 %v6615_v14 }
  0xdf   : > { %878 = vperm.xlu1 %7481, %v827_v28   ;;  %v360_v28 = vld [vmem:[%s8026_s8 + $0xb8] sm:$0xff] }
  0xe0   : > { %5727 = vmatmul.mubr.msk.f32.gmra.mrb[16].mxu0 %vm386_vm2, %v345_v27  ;;  %1058 = vperm.xlu0 %7480, %v863_v29   ;;  %v6627_v27 = vpack.c.bf16 %v1276_v26, %v1275_v25  ;;  %v361_v29 = vld [vmem:[%s8026_s8 + $0xc0] sm:$0xff] }
  0xe1   : > { %5729 = vmatprep.mubr.msk.f32.mxu0 %vm7741_vm0, %v7740_v0  ;;  %6618 = vmatpush3.bf16.msra.mxu0 %v6615_v14  ;;  %v2485_v14 = vld [vmem:[#allocation11 + $0x1b0] sm:$0xff] }
  0xe2   : > { %6620 = vmatprep.subr.bf16.mxu0 %v6619_v19 }
  0xe3   : > { %888 = vperm.xlu1 %7481, %v829_v31   ;;  %v363_v31 = vld [vmem:[%s8026_s8 + $0xd0] sm:$0xff] }
  0xe4   : > { %5730 = vmatmul.mubr.msk.f32.gmra.mrb[18].mxu0 %vm386_vm2, %v346_v30  ;;  %883 = vperm.xlu0 %7480, %v828_v32   ;;  %v362_v30 = vld [vmem:[%s8026_s8 + $0xc8] sm:$0xff]  ;;  %v364_v32 = vld [vmem:[%s8026_s8 + $0xd8] sm:$0xff] }
  0xe5   : > { %5732 = vmatprep.mubr.msk.f32.mxu0 %vm7741_vm0, %v7740_v0  ;;  %6622 = vmatpush3.bf16.msra.mxu0 %v6619_v19  ;;  %v2488_v19 = vld [vmem:[#allocation11 + $0x1c8] sm:$0xff] }
  0xe6   : > { %6624 = vmatprep.subr.bf16.mxu0 %v6623_v23  ;;  %v8275_v21 = vpack.c.bf16 %v2488_v19, %v2487_v18 }
  0xe7   : > { %898 = vperm.xlu1 %7481, %v831_v34   ;;  %v366_v34 = vld [vmem:[%s8026_s8 + $0xe8] sm:$0xff] }
  0xe8   : > { %5733 = vmatmul.mubr.msk.f32.gmra.mrb[20].mxu0 %vm386_vm2, %v347_v33  ;;  %893 = vperm.xlu0 %7480, %v830_v35   ;;  %v365_v33 = vld [vmem:[%s8026_s8 + $0xe0] sm:$0xff]  ;;  %v367_v35 = vld [vmem:[%s8026_s8 + $0xf0] sm:$0xff] }
  0xe9   : > { %5735 = vmatprep.mubr.msk.f32.mxu0 %vm7741_vm0, %v7740_v0  ;;  %6626 = vmatpush3.bf16.msra.mxu0 %v6623_v23  ;;  %v2489_v23 = vld [vmem:[#allocation11 + $0x1d0] sm:$0xff] }
  0xea   : > { %6628 = vmatprep.subr.bf16.mxu0 %v6627_v27 }
  0xeb   : > { %908 = vperm.xlu1 %7481, %v833_v37   ;;  %v369_v37 = vld [vmem:[%s8026_s8 + $0x100] sm:$0xff] }
  0xec   : > { %5736 = vmatmul.mubr.msk.f32.gmra.mrb[22].mxu0 %vm386_vm2, %v348_v36  ;;  %903 = vperm.xlu0 %7480, %v832_v38   ;;  %v368_v36 = vld [vmem:[%s8026_s8 + $0xf8] sm:$0xff] }
  0xed   : > { %5738 = vmatprep.mubr.msk.f32.mxu0 %vm7741_vm0, %v7740_v0  ;;  %6630 = vmatpush3.bf16.msra.mxu0 %v6627_v27 }
  0xef   : > { %918 = vperm.xlu1 %7481, %v835_v40   ;;  %v370_v40 = vld [vmem:[%s8026_s8 + $0x108] sm:$0xff] }
  0xf0   : > { %5739 = vmatmul.mubr.msk.f32.gmra.mrb[24].mxu0 %vm386_vm2, %v349_v39  ;;  %913 = vperm.xlu0 %7480, %v834_v41  }
  0xf1   : > { %5741 = vmatprep.mubr.msk.f32.mxu0 %vm7741_vm0, %v7740_v0 }
  0xf3   : > { %928 = vperm.xlu1 %7481, %v837_v43   ;;  %v371_v43 = vld [vmem:[%s8026_s8 + $0x110] sm:$0xff] }
  0xf4   : > { %5742 = vmatmul.mubr.msk.f32.gmra.mrb[26].mxu0 %vm386_vm2, %v350_v42  ;;  %923 = vperm.xlu0 %7480, %v836_v44  }
  0xf5   : > { %5744 = vmatprep.mubr.msk.f32.mxu0 %vm7741_vm0, %v7740_v0 }
  0xf7   : > { %938 = vperm.xlu1 %7481, %v839_v48  }
  0xf8   : > { %5745 = vmatmul.mubr.msk.f32.gmra.mrb[28].mxu0 %vm386_vm2, %v351_v47  ;;  %933 = vperm.xlu0 %7480, %v838_v50  }
  0xf9   : > { %5747 = vmatprep.mubr.msk.f32.mxu0 %vm7741_vm0, %v7740_v0 }
  0xfb   : > { %948 = vperm.xlu1 %7481, %v841_v54  }
  0xfc   : > { %5748 = vmatmul.mubr.msk.f32.gmra.mrb[30].mxu0 %vm386_vm2, %v352_v53  ;;  %943 = vperm.xlu0 %7480, %v840_v56  }
  0xfd   : > { %5750 = vmatprep.mubr.msk.f32.mxu0 %vm7741_vm0, %v7740_v0 }
  0xff   : > { %958 = vperm.xlu1 %7481, %v843_v60  }
 0x100   : > { %5751 = vmatmul.mubr.msk.f32.gmra.mrb[32].mxu0 %vm386_vm2, %v353_v59  ;;  %953 = vperm.xlu0 %7480, %v842_v62  }
 0x101   : > { %5753 = vmatprep.mubr.msk.f32.mxu0 %vm7741_vm0, %v7740_v0 }
 0x103   : > { %968 = vperm.xlu1 %7481, %v845_v2  }
 0x104   : > { %5754 = vmatmul.mubr.msk.f32.gmra.mrb[34].mxu0 %vm386_vm2, %v354_v1  ;;  %963 = vperm.xlu0 %7480, %v844_v4   ;;  %v2480_v1 = vld [vmem:[#allocation11 + $0x188] sm:$0xff] }
 0x105   : > { %5756 = vmatprep.mubr.msk.f32.mxu0 %vm7741_vm0, %v7740_v0  ;;  %v8245_v3 = vpack.c.bf16 %v2480_v1, %v2479_v63 }
 0x107   : > { %868 = vperm.xlu1 %7481, %v825_v7   ;;  %6887 = vmatprep.subr.bf16.mxu1 %v8245_v3 }
 0x108   : > { %5757 = vmatmul.mubr.msk.f32.gmra.mrb[36].mxu0 %vm386_vm2, %v355_v6  ;;  %973 = vperm.xlu0 %7480, %v846_v8   ;;  %v2482_v6 = vld [vmem:[#allocation11 + $0x198] sm:$0xff] }
 0x109   : > { %5759 = vmatprep.mubr.msk.f32.mxu0 %vm7741_vm0, %v7740_v0  ;;  %6895 = vmatpush3.bf16.msra.mxu1 %v8245_v3  ;;  %v8253_v7 = vpack.c.bf16 %v2482_v6, %v2481_v5 }
 0x10b   : > { %1063 = vperm.xlu1 %7481, %v864_v10   ;;  %6888 = vmatprep.subr.bf16.mxu1 %v8253_v7  ;;  %v2484_v10 = vld [vmem:[#allocation11 + $0x1a8] sm:$0xff] }
 0x10c   : > { %5760 = vmatmul.mubr.msk.f32.gmra.mrb[38].mxu0 %vm386_vm2, %v356_v9  ;;  %873 = vperm.xlu0 %7480, %v826_v11   ;;  %v2483_v9 = vld [vmem:[#allocation11 + $0x1a0] sm:$0xff] }
 0x10d   : > { %5762 = vmatprep.mubr.msk.f32.mxu0 %vm7741_vm0, %v7740_v0  ;;  %6896 = vmatpush3.bf16.msra.mxu1 %v8253_v7  ;;  %v8261_v12 = vpack.c.bf16 %v2484_v10, %v2483_v9 }
 0x10f   : > { %6889 = vmatprep.subr.bf16.mxu1 %v8261_v12 }
 0x110   : > { %5763 = vmatmul.mubr.msk.f32.gmra.mrb[40].mxu0 %vm386_vm2, %v357_v15  ;;  %1068 = vperm.xlu0 %7480, %v865_v16   ;;  %v2486_v15 = vld [vmem:[#allocation11 + $0x1b8] sm:$0xff] }
 0x111   : > { %5765 = vmatprep.mubr.msk.f32.mxu0 %vm7741_vm0, %v7740_v0  ;;  %6897 = vmatpush3.bf16.msra.mxu1 %v8261_v12  ;;  %v8269_v17 = vpack.c.bf16 %v2486_v15, %v2485_v14 }
 0x113   : > { %6890 = vmatprep.subr.bf16.mxu1 %v8269_v17 }
 0x114   : > { %5766 = vmatmul.mubr.msk.f32.gmra.mrb[42].mxu0 %vm386_vm2, %v358_v20 }
 0x115   : > { %5768 = vmatprep.mubr.msk.f32.mxu0 %vm7741_vm0, %v7740_v0  ;;  %6898 = vmatpush3.bf16.msra.mxu1 %v8269_v17 }
 0x116   : > { %6891 = vmatprep.subr.bf16.mxu1 %v8275_v21 }
 0x118   : > { %5769 = vmatmul.mubr.msk.f32.gmra.mrb[44].mxu0 %vm386_vm2, %v359_v24  ;;  %v2490_v24 = vld [vmem:[#allocation11 + $0x1d8] sm:$0xff] }
 0x119   : > { %5771 = vmatprep.mubr.msk.f32.mxu0 %vm7741_vm0, %v7740_v0  ;;  %6899 = vmatpush3.bf16.msra.mxu1 %v8275_v21  ;;  %v8281_v25 = vpack.c.bf16 %v2490_v24, %v2489_v23  ;;  %v1669_v24 = vld [vmem:[#allocation11 + $0x90] sm:$0xff] }
 0x11b   : > { %6892 = vmatprep.subr.bf16.mxu1 %v8281_v25 }
 0x11c   : > { %5772 = vmatmul.mubr.msk.f32.gmra.mrb[46].mxu0 %vm386_vm2, %v360_v28  ;;  %v2491_v28 = vld [vmem:[#allocation11 + $0x1e0] sm:$0xff] }
 0x11d   : > { %5774 = vmatprep.mubr.msk.f32.mxu0 %vm7741_vm0, %v7740_v0  ;;  %6900 = vmatpush3.bf16.msra.mxu1 %v8281_v25 }
 0x120   : > { %5775 = vmatmul.mubr.msk.f32.gmra.mrb[48].mxu0 %vm386_vm2, %v361_v29  ;;  %v2492_v29 = vld [vmem:[#allocation11 + $0x1e8] sm:$0xff] }
 0x121   : > { %5777 = vmatprep.mubr.msk.f32.mxu0 %vm7741_vm0, %v7740_v0 }
 0x124   : > { %5778 = vmatmul.mubr.msk.f32.gmra.mrb[50].mxu0 %vm386_vm2, %v362_v30  ;;  %v8289_v30 = vpack.c.bf16 %v2492_v29, %v2491_v28  ;;  %v1670_v28 = vld [vmem:[#allocation11 + $0x98] sm:$0xff] }
 0x125   : > { %5780 = vmatprep.mubr.msk.f32.mxu0 %vm7741_vm0, %v7740_v0 }
 0x126   : > { %6893 = vmatprep.subr.bf16.mxu1 %v8289_v30 }
 0x127   : > { %6901 = vmatpush3.bf16.msra.mxu1 %v8289_v30 }
 0x128   : > { %5781 = vmatmul.mubr.msk.f32.gmra.mrb[52].mxu0 %vm386_vm2, %v363_v31 }
 0x129   : > { %5783 = vmatprep.mubr.msk.f32.mxu0 %vm7741_vm0, %v7740_v0 }
 0x12c   : > { %5784 = vmatmul.mubr.msk.f32.gmra.mrb[54].mxu0 %vm386_vm2, %v364_v32  ;;  %v2493_v32 = vld [vmem:[#allocation11 + $0x1f0] sm:$0xff] }
 0x12d   : > { %5786 = vmatprep.mubr.msk.f32.mxu0 %vm7741_vm0, %v7740_v0 }
 0x130   : > { %5787 = vmatmul.mubr.msk.f32.gmra.mrb[56].mxu0 %vm386_vm2, %v365_v33  ;;  %v2494_v33 = vld [vmem:[#allocation11 + $0x1f8] sm:$0xff] }
 0x131   : > { %5789 = vmatprep.mubr.msk.f32.mxu0 %vm7741_vm0, %v7740_v0 }
 0x134   : > { %5790 = vmatmul.mubr.msk.f32.gmra.mrb[58].mxu0 %vm386_vm2, %v366_v34  ;;  %v8295_v34 = vpack.c.bf16 %v2494_v33, %v2493_v32  ;;  %v2885_v33 = vld [vmem:[#allocation11 + $0x200] sm:$0xff] }
 0x135   : > { %5792 = vmatprep.mubr.msk.f32.mxu0 %vm7741_vm0, %v7740_v0 }
 0x136   : > { %8913 = vst [vmem:[#allocation20_spill] sm:$0xff] %v8295_v34  ;;  %6894 = vmatprep.subr.bf16.mxu1 %v8295_v34 }
 0x137   : > { %6902 = vmatpush3.bf16.msra.mxu1 %v8295_v34  ;;  %v6635_v34 = vpack.c.bf16 %v1670_v28, %v1669_v24  ;;  %v1674_v24 = vld [vmem:[#allocation11 + $0xb8] sm:$0xff] }
 0x138   : > { %5793 = vmatmul.mubr.msk.f32.gmra.mrb[60].mxu0 %vm386_vm2, %v367_v35 }
 0x139   : > { %5795 = vmatprep.mubr.msk.f32.mxu0 %vm7741_vm0, %v7740_v0 }
 0x13c   : > { %5796 = vmatmul.mubr.msk.f32.gmra.mrb[62].mxu0 %vm386_vm2, %v368_v36 }
 0x13d   : > { %5798 = vmatprep.mubr.msk.f32.mxu0 %vm7741_vm0, %v7740_v0 }
 0x13e   : > { %v8176_v38 = vpop.permute.xlu1 %988 }
 0x13f   : > { %v8179_v39 = vpop.permute.xlu0 %978 }
 0x140   : > { %5799 = vmatmul.mubr.msk.f32.gmra.mrb[64].mxu0 %vm386_vm2, %v369_v37 }
 0x141   : > { %5801 = vmatprep.mubr.msk.f32.mxu0 %vm7741_vm0, %v7740_v0 }
 0x142   : > { %v8184_v41 = vpop.permute.xlu1 %993 }
 0x143   : > { %v8187_v42 = vpop.permute.xlu0 %983 }
 0x144   : > { %5802 = vmatmul.mubr.msk.f32.gmra.mrb[66].mxu0 %vm386_vm2, %v370_v40 }
 0x145   : > { %5804 = vmatprep.mubr.msk.f32.mxu0 %vm7741_vm0, %v7740_v0 }
 0x146   : > { %v8192_v44 = vpop.permute.xlu1 %1003 }
 0x147   : > { %v8195_v45 = vpop.permute.xlu0 %998 }
 0x148   : > { %5805 = vmatmul.mubr.msk.f32.gmra.mrb[68].mxu0 %vm386_vm2, %v371_v43  ;;  %v1667_v43 = vld [vmem:[#allocation11 + $0x80] sm:$0xff] }
 0x149   : > { %5807 = vmatprep.mubr.msk.f32.mxu0 %vm7741_vm0, %v7740_v0 }
 0x14a   : > { %v8200_v47 = vpop.permute.xlu1 %1013 }
 0x14b   : > { %v8203_v48 = vpop.permute.xlu0 %1008 }
 0x14c   : > { %5808 = vmatmul.mubr.msk.f32.gmra.mrb[70].mxu0 %vm386_vm2, %v372_v46  ;;  %v1668_v46 = vld [vmem:[#allocation11 + $0x88] sm:$0xff] }
 0x14d   : > { %5810 = vmatprep.mubr.msk.f32.mxu0 %vm7741_vm0, %v7740_v0 }
 0x14e   : > { %v8208_v50 = vpop.permute.xlu1 %1023 }
 0x14f   : > { %v8211_v51 = vpop.permute.xlu0 %1018 }
 0x150   : > { %5811 = vmatmul.mubr.msk.f32.gmra.mrb[72].mxu0 %vm386_vm2, %v373_v49  ;;  %v6631_v49 = vpack.c.bf16 %v1668_v46, %v1667_v43  ;;  %v2886_v43 = vld [vmem:[#allocation11 + $0x208] sm:$0xff] }
 0x151   : > { %5813 = vmatprep.mubr.msk.f32.mxu0 %vm7741_vm0, %v7740_v0 }
 0x152   : > { %v8216_v53 = vpop.permute.xlu1 %1033  ;;  %6632 = vmatprep.subr.bf16.mxu0 %v6631_v49 }
 0x153   : > { %v8219_v54 = vpop.permute.xlu0 %1028 }
 0x154   : > { %5814 = vmatmul.mubr.msk.f32.gmra.mrb[74].mxu0 %vm386_vm2, %v374_v52 }
 0x155   : > { %5816 = vmatprep.mubr.msk.f32.mxu0 %vm7741_vm0, %v7740_v0 }
 0x156   : > { %v8224_v56 = vpop.permute.xlu1 %1043 }
 0x157   : > { %v8227_v57 = vpop.permute.xlu0 %1038 }
 0x158   : > { %5817 = vmatmul.mubr.msk.f32.gmra.mrb[76].mxu0 %vm386_vm2, %v375_v55 }
 0x159   : > { %5819 = vmatprep.mubr.msk.f32.mxu0 %vm7741_vm0, %v7740_v0 }
 0x15a   : > { %v8232_v59 = vpop.permute.xlu1 %1053 }
 0x15b   : > { %v8235_v60 = vpop.permute.xlu0 %1048 }
 0x15c   : > { %5820 = vmatmul.mubr.msk.f32.gmra.mrb[78].mxu0 %vm386_vm2, %v376_v58 }
 0x15d   : > { %5822 = vmatprep.mubr.msk.f32.mxu0 %vm7741_vm0, %v7740_v0 }
 0x15e   : > { %v8240_v62 = vpop.permute.xlu1 %878 }
 0x15f   : > { %v8243_v2 = vpop.permute.xlu0 %1058 }
 0x160   : > { %5823 = vmatmul.mubr.msk.f32.gmra.mrb[80].mxu0 %vm386_vm2, %v377_v61  ;;  %v8313_v61 = vld [vmem:[#allocation9] ss:$0 sm:$0xff] }
 0x162   : > { %v8248_v4 = vpop.permute.xlu1 %888 }
 0x163   : > { %v8251_v0 = vpop.permute.xlu0 %883 }
 0x166   : > { %v8256_v8 = vpop.permute.xlu1 %898 }
 0x167   : > { %v8259_v11 = vpop.permute.xlu0 %893 }
 0x16a   : > { %v8264_v13 = vpop.permute.xlu1 %908 }
 0x16b   : > { %v8267_v16 = vpop.permute.xlu0 %903 }
 0x16e   : > { %v8277_v22 = vpop.permute.xlu1 %918 }
 0x16f   : > { %v8273_v20 = vpop.permute.xlu0 %913 }
 0x172   : > { %v8286_v27 = vpop.permute.xlu1 %928 }
 0x173   : > { %v8283_v26 = vpop.permute.xlu0 %923 }
 0x176   : > { %v8297_v35 = vpop.permute.xlu1 %938 }
 0x177   : > { %v8292_v31 = vpop.permute.xlu0 %933 }
 0x17a   : > { %v8303_v37 = vpop.permute.xlu1 %948 }
 0x17b   : > { %v8301_v36 = vpop.permute.xlu0 %943 }
 0x17e   : > { %v8307_v52 = vpop.permute.xlu1 %958 }
 0x17f   : > { %v8305_v40 = vpop.permute.xlu0 %953 }
 0x182   : > { %v8311_v58 = vpop.permute.xlu1 %968 }
 0x183   : > { %v8309_v55 = vpop.permute.xlu0 %963 }
 0x186   : > { %v869_v9 = vpop.permute.xlu1 %868 }
 0x187   : > { %v8315_v1 = vpop.permute.xlu0 %973 }
 0x18b   : > { %v874_v23 = vpop.permute.xlu0 %873 }
 0x193   : > { %v580_v63 = vpop.f32.mrb[0].mxu0 }
 0x194   : > { %v581_v5 = vadd.f32 %v8313_v61, %v580_v63  ;;  %v5704_v6 = vpop.f32.mrb[1].mxu0 }
 0x196   : > { %v784_v10 = vmax.f32 %v581_v5, 0.0  ;;  %v8320_v5 = vpack.c.bf16 %v2886_v43, %v2885_v33 }
 0x197   : > { %v585_v14 = vpop.f32.mrb[2].mxu0 }
 0x198   : > { %v1071_v15 = vmul.f32 %v869_v9, %v784_v10  ;;  %v586_v18 = vadd.f32 %v8313_v61, %v585_v14  ;;  %v5707_v19 = vpop.f32.mrb[3].mxu0  ;;  %v1671_v9 = vld [vmem:[#allocation11 + $0xa0] sm:$0xff]  ;;  %v1672_v10 = vld [vmem:[#allocation11 + $0xa8] sm:$0xff]  ;;  %6728 = vmatprep.subr.bf16.mxu1 %v8320_v5 }
 0x19a   : > { %1112 = vst [vmem:[#allocation2] sm:$0xff] %v1071_v15  ;;  %v785_v29 = vmax.f32 %v586_v18, 0.0  ;;  %5857 = vmatprep.mubr.f32.mxu0 %v1071_v15 }
 0x19b   : > { %v590_v32 = vpop.f32.mrb[4].mxu0 }
 0x19c   : > { %v1072_v46 = vmul.f32 %v874_v23, %v785_v29  ;;  %v591_v63 = vadd.f32 %v8313_v61, %v590_v32  ;;  %v5710_v6 = vpop.f32.mrb[5].mxu0  ;;  %v6639_v29 = vpack.c.bf16 %v1672_v10, %v1671_v9  ;;  %v1673_v32 = vld [vmem:[#allocation11 + $0xb0] sm:$0xff] }
 0x19d   : > { %v1676_v6 = vld [vmem:[#allocation11 + $0xc8] sm:$0xff] }
 0x19e   : > { %1113 = vst [vmem:[#allocation2 + $0x8] sm:$0xff] %v1072_v46  ;;  %v786_v14 = vmax.f32 %v591_v63, 0.0  ;;  %5858 = vmatmul.mubr.f32.vlgmr.msra.gmra.mrb[82].mxu0 %v1072_v46 }
 0x19f   : > { %v595_v19 = vpop.f32.mrb[6].mxu0  ;;  %6634 = vmatpush3.bf16.msra.mxu0 %v6631_v49  ;;  %v6643_v49 = vpack.c.bf16 %v1674_v24, %v1673_v32 }
 0x1a0   : > { %v1073_v15 = vmul.f32 %v8240_v62, %v786_v14  ;;  %v596_v18 = vadd.f32 %v8313_v61, %v595_v19  ;;  %v5713_v23 = vpop.f32.mrb[7].mxu0  ;;  %6636 = vmatprep.subr.bf16.mxu0 %v6635_v34  ;;  %v1675_v62 = vld [vmem:[#allocation11 + $0xc0] sm:$0xff] }
 0x1a2   : > { %1114 = vst [vmem:[#allocation2 + $0x10] sm:$0xff] %v1073_v15  ;;  %v787_v28 = vmax.f32 %v596_v18, 0.0  ;;  %5860 = vmatprep.mubr.f32.mxu0 %v1073_v15  ;;  %v1678_v18 = vld [vmem:[#allocation11 + $0xd8] sm:$0xff] }
 0x1a3   : > { %v600_v33 = vpop.f32.mrb[8].mxu0  ;;  %6638 = vmatpush3.bf16.msra.mxu0 %v6635_v34  ;;  %v6647_v34 = vpack.c.bf16 %v1676_v6, %v1675_v62 }
 0x1a4   : > { %v1074_v43 = vmul.f32 %v8251_v0, %v787_v28  ;;  %v601_v46 = vadd.f32 %v8313_v61, %v600_v33  ;;  %v5716_v63 = vpop.f32.mrb[9].mxu0  ;;  %6640 = vmatprep.subr.bf16.mxu0 %v6639_v29  ;;  %v1677_v0 = vld [vmem:[#allocation11 + $0xd0] sm:$0xff] }
 0x1a6   : > { %1115 = vst [vmem:[#allocation2 + $0x18] sm:$0xff] %v1074_v43  ;;  %v788_v14 = vmax.f32 %v601_v46, 0.0  ;;  %5861 = vmatmul.mubr.f32.gmra.mrb[84].mxu0 %v1074_v43  ;;  %v1680_v43 = vld [vmem:[#allocation11 + $0xe8] sm:$0xff] }
 0x1a7   : > { %v605_v9 = vpop.f32.mrb[10].mxu0  ;;  %6642 = vmatpush3.bf16.msra.mxu0 %v6639_v29  ;;  %v6651_v29 = vpack.c.bf16 %v1678_v18, %v1677_v0 }
 0x1a8   : > { %v1075_v10 = vmul.f32 %v8248_v4, %v788_v14  ;;  %v606_v19 = vadd.f32 %v8313_v61, %v605_v9  ;;  %v5719_v15 = vpop.f32.mrb[11].mxu0  ;;  %6644 = vmatprep.subr.bf16.mxu0 %v6643_v49  ;;  %v1679_v4 = vld [vmem:[#allocation11 + $0xe0] sm:$0xff]  ;;  %v1682_v9 = vld [vmem:[#allocation11 + $0xf8] sm:$0xff] }
 0x1aa   : > { %1116 = vst [vmem:[#allocation2 + $0x20] sm:$0xff] %v1075_v10  ;;  %v789_v23 = vmax.f32 %v606_v19, 0.0  ;;  %5863 = vmatprep.mubr.f32.mxu0 %v1075_v10 }
 0x1ab   : > { %v610_v32 = vpop.f32.mrb[12].mxu0  ;;  %6646 = vmatpush3.bf16.msra.mxu0 %v6643_v49  ;;  %v6655_v49 = vpack.c.bf16 %v1680_v43, %v1679_v4 }
 0x1ac   : > { %v1076_v24 = vmul.f32 %v8259_v11, %v789_v23  ;;  %v611_v28 = vadd.f32 %v8313_v61, %v610_v32  ;;  %v5722_v33 = vpop.f32.mrb[13].mxu0  ;;  %6648 = vmatprep.subr.bf16.mxu0 %v6647_v34  ;;  %v1681_v11 = vld [vmem:[#allocation11 + $0xf0] sm:$0xff] }
 0x1ae   : > { %1117 = vst [vmem:[#allocation2 + $0x28] sm:$0xff] %v1076_v24  ;;  %v790_v46 = vmax.f32 %v611_v28, 0.0  ;;  %5864 = vmatmul.mubr.f32.gmra.mrb[86].mxu0 %v1076_v24 }
 0x1af   : > { %v615_v63 = vpop.f32.mrb[14].mxu0  ;;  %6650 = vmatpush3.bf16.msra.mxu0 %v6647_v34  ;;  %v6659_v34 = vpack.c.bf16 %v1682_v9, %v1681_v11 }
 0x1b0   : > { %v1077_v62 = vmul.f32 %v8256_v8, %v790_v46  ;;  %v616_v6 = vadd.f32 %v8313_v61, %v615_v63  ;;  %v5725_v14 = vpop.f32.mrb[15].mxu0  ;;  %6652 = vmatprep.subr.bf16.mxu0 %v6651_v29 }
 0x1b2   : > { %1118 = vst [vmem:[#allocation2 + $0x30] sm:$0xff] %v1077_v62  ;;  %v791_v10 = vmax.f32 %v616_v6, 0.0  ;;  %5866 = vmatprep.mubr.f32.mxu0 %v1077_v62 }
 0x1b3   : > { %v620_v19 = vpop.f32.mrb[16].mxu0  ;;  %6654 = vmatpush3.bf16.msra.mxu0 %v6651_v29 }
 0x1b4   : > { %v1078_v15 = vmul.f32 %v8267_v16, %v791_v10  ;;  %v621_v0 = vadd.f32 %v8313_v61, %v620_v19  ;;  %v5728_v18 = vpop.f32.mrb[17].mxu0  ;;  %6656 = vmatprep.subr.bf16.mxu0 %v6655_v49 }
 0x1b6   : > { %1119 = vst [vmem:[#allocation2 + $0x38] sm:$0xff] %v1078_v15  ;;  %v792_v8 = vmax.f32 %v621_v0, 0.0  ;;  %5867 = vmatmul.mubr.f32.gmra.mrb[88].mxu0 %v1078_v15 }
 0x1b7   : > { %v625_v23 = vpop.f32.mrb[18].mxu0  ;;  %6658 = vmatpush3.bf16.msra.mxu0 %v6655_v49 }
 0x1b8   : > { %v1079_v32 = vmul.f32 %v8264_v13, %v792_v8  ;;  %v626_v24 = vadd.f32 %v8313_v61, %v625_v23  ;;  %v5731_v28 = vpop.f32.mrb[19].mxu0  ;;  %6660 = vmatprep.subr.bf16.mxu0 %v6659_v34 }
 0x1ba   : > { %1120 = vst [vmem:[#allocation2 + $0x40] sm:$0xff] %v1079_v32  ;;  %v793_v33 = vmax.f32 %v626_v24, 0.0  ;;  %5869 = vmatprep.mubr.f32.mxu0 %v1079_v32 }
 0x1bb   : > { %v630_v16 = vpop.f32.mrb[20].mxu0  ;;  %6662 = vmatpush3.bf16.msra.mxu0 %v6659_v34 }
 0x1bc   : > { %v1080_v29 = vmul.f32 %v8273_v20, %v793_v33  ;;  %v631_v4 = vadd.f32 %v8313_v61, %v630_v16  ;;  %v5734_v43 = vpop.f32.mrb[21].mxu0  ;;  %v2073_v16 = vld [vmem:[#allocation11 + $0x100] sm:$0xff] }
 0x1be   : > { %1121 = vst [vmem:[#allocation2 + $0x48] sm:$0xff] %v1080_v29  ;;  %v794_v46 = vmax.f32 %v631_v4, 0.0  ;;  %5870 = vmatmul.mubr.f32.gmra.mrb[90].mxu0 %v1080_v29  ;;  %v2074_v29 = vld [vmem:[#allocation11 + $0x108] sm:$0xff] }
 0x1bf   : > { %v635_v63 = vpop.f32.mrb[22].mxu0  ;;  %v8349_v4 = vpack.c.bf16 %v2074_v29, %v2073_v16 }
 0x1c0   : > { %v1081_v13 = vmul.f32 %v8277_v22, %v794_v46  ;;  %v636_v62 = vadd.f32 %v8313_v61, %v635_v63  ;;  %v5737_v6 = vpop.f32.mrb[23].mxu0 }
 0x1c1   : > { %6664 = vmatprep.subr.bf16.mxu0 %v8349_v4 }
 0x1c2   : > { %1122 = vst [vmem:[#allocation2 + $0x50] sm:$0xff] %v1081_v13  ;;  %v795_v14 = vmax.f32 %v636_v62, 0.0  ;;  %5872 = vmatprep.mubr.f32.mxu0 %v1081_v13 }
 0x1c3   : > { %v640_v49 = vpop.f32.mrb[24].mxu0 }
 0x1c4   : > { %v1082_v11 = vmul.f32 %v8283_v26, %v795_v14  ;;  %v641_v20 = vadd.f32 %v8313_v61, %v640_v49  ;;  %v5740_v9 = vpop.f32.mrb[25].mxu0 }
 0x1c6   : > { %1123 = vst [vmem:[#allocation2 + $0x58] sm:$0xff] %v1082_v11  ;;  %v796_v10 = vmax.f32 %v641_v20, 0.0  ;;  %5873 = vmatmul.mubr.f32.gmra.mrb[92].mxu0 %v1082_v11 }
 0x1c7   : > { %v645_v19 = vpop.f32.mrb[26].mxu0 }
 0x1c8   : > { %v1083_v15 = vmul.f32 %v8286_v27, %v796_v10  ;;  %v646_v22 = vadd.f32 %v8313_v61, %v645_v19  ;;  %v5743_v0 = vpop.f32.mrb[27].mxu0 }
 0x1ca   : > { %1124 = vst [vmem:[#allocation2 + $0x60] sm:$0xff] %v1083_v15  ;;  %v797_v18 = vmax.f32 %v646_v22, 0.0  ;;  %5875 = vmatprep.mubr.f32.mxu0 %v1083_v15 }
 0x1cb   : > { %v650_v34 = vpop.f32.mrb[28].mxu0 }
 0x1cc   : > { %v1084_v8 = vmul.f32 %v8292_v31, %v797_v18  ;;  %v651_v26 = vadd.f32 %v8313_v61, %v650_v34  ;;  %v5746_v23 = vpop.f32.mrb[29].mxu0 }
 0x1ce   : > { %1125 = vst [vmem:[#allocation2 + $0x68] sm:$0xff] %v1084_v8  ;;  %v798_v32 = vmax.f32 %v651_v26, 0.0  ;;  %5876 = vmatmul.mubr.f32.gmra.mrb[94].mxu0 %v1084_v8 }
 0x1cf   : > { %v655_v24 = vpop.f32.mrb[30].mxu0 }
 0x1d0   : > { %v1085_v28 = vmul.f32 %v8297_v35, %v798_v32  ;;  %v656_v27 = vadd.f32 %v8313_v61, %v655_v24  ;;  %v5749_v33 = vpop.f32.mrb[31].mxu0 }
 0x1d2   : > { %1126 = vst [vmem:[#allocation2 + $0x70] sm:$0xff] %v1085_v28  ;;  %v799_v43 = vmax.f32 %v656_v27, 0.0  ;;  %5878 = vmatprep.mubr.f32.mxu0 %v1085_v28 }
 0x1d3   : > { %v660_v31 = vpop.f32.mrb[32].mxu0 }
 0x1d4   : > { %v1086_v46 = vmul.f32 %v8301_v36, %v799_v43  ;;  %v661_v63 = vadd.f32 %v8313_v61, %v660_v31  ;;  %v5752_v13 = vpop.f32.mrb[33].mxu0 }
 0x1d6   : > { %1127 = vst [vmem:[#allocation2 + $0x78] sm:$0xff] %v1086_v46  ;;  %v800_v35 = vmax.f32 %v661_v63, 0.0  ;;  %5879 = vmatmul.mubr.f32.gmra.mrb[96].mxu0 %v1086_v46 }
 0x1d7   : > { %v665_v62 = vpop.f32.mrb[34].mxu0 }
 0x1d8   : > { %v1087_v6 = vmul.f32 %v8303_v37, %v800_v35  ;;  %v666_v14 = vadd.f32 %v8313_v61, %v665_v62  ;;  %v5755_v49 = vpop.f32.mrb[35].mxu0 }
 0x1da   : > { %1128 = vst [vmem:[#allocation2 + $0x80] sm:$0xff] %v1087_v6  ;;  %v801_v11 = vmax.f32 %v666_v14, 0.0  ;;  %5881 = vmatprep.mubr.f32.mxu0 %v1087_v6 }
 0x1db   : > { %v670_v20 = vpop.f32.mrb[36].mxu0 }
 0x1dc   : > { %v1088_v9 = vmul.f32 %v8305_v40, %v801_v11  ;;  %v671_v36 = vadd.f32 %v8313_v61, %v670_v20  ;;  %v5758_v10 = vpop.f32.mrb[37].mxu0 }
 0x1de   : > { %1129 = vst [vmem:[#allocation2 + $0x88] sm:$0xff] %v1088_v9  ;;  %v802_v19 = vmax.f32 %v671_v36, 0.0  ;;  %5882 = vmatmul.mubr.f32.gmra.mrb[98].mxu0 %v1088_v9 }
 0x1df   : > { %v675_v15 = vpop.f32.mrb[38].mxu0 }
 0x1e0   : > { %v1089_v22 = vmul.f32 %v8307_v52, %v802_v19  ;;  %v676_v37 = vadd.f32 %v8313_v61, %v675_v15  ;;  %v5761_v0 = vpop.f32.mrb[39].mxu0 }
 0x1e2   : > { %1130 = vst [vmem:[#allocation2 + $0x90] sm:$0xff] %v1089_v22  ;;  %v803_v18 = vmax.f32 %v676_v37, 0.0  ;;  %5884 = vmatprep.mubr.f32.mxu0 %v1089_v22  ;;  %v2887_v22 = vld [vmem:[#allocation11 + $0x210] sm:$0xff]  ;;  %v2888_v37 = vld [vmem:[#allocation11 + $0x218] sm:$0xff] }
 0x1e3   : > { %v680_v34 = vpop.f32.mrb[40].mxu0 }
 0x1e4   : > { %v1090_v8 = vmul.f32 %v8309_v55, %v803_v18  ;;  %v681_v40 = vadd.f32 %v8313_v61, %v680_v34  ;;  %v5764_v26 = vpop.f32.mrb[41].mxu0 }
 0x1e6   : > { %1131 = vst [vmem:[#allocation2 + $0x98] sm:$0xff] %v1090_v8  ;;  %v804_v23 = vmax.f32 %v681_v40, 0.0  ;;  %5885 = vmatmul.mubr.f32.gmra.mrb[100].mxu0 %v1090_v8  ;;  %v6731_v40 = vpack.c.bf16 %v2888_v37, %v2887_v22  ;;  %v2898_v22 = vld [vmem:[#allocation11 + $0x268] sm:$0xff] }
 0x1e7   : > { %v685_v32 = vpop.f32.mrb[42].mxu0 }
 0x1e8   : > { %v1091_v24 = vmul.f32 %v8311_v58, %v804_v23  ;;  %v686_v52 = vadd.f32 %v8313_v61, %v685_v32  ;;  %v5767_v28 = vpop.f32.mrb[43].mxu0  ;;  %v2889_v23 = vld [vmem:[#allocation11 + $0x220] sm:$0xff] }
 0x1ea   : > { %1132 = vst [vmem:[#allocation2 + $0xa0] sm:$0xff] %v1091_v24  ;;  %v805_v27 = vmax.f32 %v686_v52, 0.0  ;;  %5887 = vmatprep.mubr.f32.mxu0 %v1091_v24 }
 0x1eb   : > { %v690_v33 = vpop.f32.mrb[44].mxu0 }
 0x1ec   : > { %v1092_v16 = vmul.f32 %v8315_v1, %v805_v27  ;;  %v691_v55 = vadd.f32 %v8313_v61, %v690_v33  ;;  %v5770_v29 = vpop.f32.mrb[45].mxu0 }
 0x1ee   : > { %1133 = vst [vmem:[#allocation2 + $0xa8] sm:$0xff] %v1092_v16  ;;  %v806_v43 = vmax.f32 %v691_v55, 0.0  ;;  %5888 = vmatmul.mubr.f32.gmra.mrb[102].mxu0 %v1092_v16  ;;  %v2891_v16 = vld [vmem:[#allocation11 + $0x230] sm:$0xff]  ;;  %v2892_v55 = vld [vmem:[#allocation11 + $0x238] sm:$0xff] }
 0x1ef   : > { %v695_v31 = vpop.f32.mrb[46].mxu0 }
 0x1f0   : > { %v1093_v46 = vmul.f32 %v8179_v39, %v806_v43  ;;  %v696_v58 = vadd.f32 %v8313_v61, %v695_v31  ;;  %v5773_v63 = vpop.f32.mrb[47].mxu0 }
 0x1f1   : > { %v2893_v63 = vld [vmem:[#allocation11 + $0x240] sm:$0xff] }
 0x1f2   : > { %1134 = vst [vmem:[#allocation2 + $0xb0] sm:$0xff] %v1093_v46  ;;  %v807_v13 = vmax.f32 %v696_v58, 0.0  ;;  %5890 = vmatprep.mubr.f32.mxu0 %v1093_v46 }
 0x1f3   : > { %v700_v35 = vpop.f32.mrb[48].mxu0 }
 0x1f4   : > { %v1094_v62 = vmul.f32 %v8187_v42, %v807_v13  ;;  %v701_v1 = vadd.f32 %v8313_v61, %v700_v35  ;;  %v5776_v6 = vpop.f32.mrb[49].mxu0  ;;  %v2894_v13 = vld [vmem:[#allocation11 + $0x248] sm:$0xff] }
 0x1f6   : > { %1135 = vst [vmem:[#allocation2 + $0xb8] sm:$0xff] %v1094_v62  ;;  %v808_v14 = vmax.f32 %v701_v1, 0.0  ;;  %5891 = vmatmul.mubr.f32.gmra.mrb[104].mxu0 %v1094_v62 }
 0x1f7   : > { %v705_v49 = vpop.f32.mrb[50].mxu0 }
 0x1f8   : > { %v1095_v11 = vmul.f32 %v8176_v38, %v808_v14  ;;  %v706_v39 = vadd.f32 %v8313_v61, %v705_v49  ;;  %v5779_v20 = vpop.f32.mrb[51].mxu0 }
 0x1fa   : > { %1136 = vst [vmem:[#allocation2 + $0xc0] sm:$0xff] %v1095_v11  ;;  %v809_v9 = vmax.f32 %v706_v39, 0.0  ;;  %5893 = vmatprep.mubr.f32.mxu0 %v1095_v11  ;;  %v2895_v11 = vld [vmem:[#allocation11 + $0x250] sm:$0xff]  ;;  %v2896_v39 = vld [vmem:[#allocation11 + $0x258] sm:$0xff] }
 0x1fb   : > { %v710_v36 = vpop.f32.mrb[52].mxu0 }
 0x1fc   : > { %v1096_v10 = vmul.f32 %v8184_v41, %v809_v9  ;;  %v711_v42 = vadd.f32 %v8313_v61, %v710_v36  ;;  %v5782_v19 = vpop.f32.mrb[53].mxu0  ;;  %v2890_v41 = vld [vmem:[#allocation11 + $0x228] sm:$0xff] }
 0x1fd   : > { %v2462_v15 = vld [vmem:[#allocation2 + $0xb2] sm:$0xff] }
 0x1fe   : > { %1137 = vst [vmem:[#allocation2 + $0xc8] sm:$0xff] %v1096_v10  ;;  %v810_v0 = vmax.f32 %v711_v42, 0.0  ;;  %6145 = vmatprep.mubr.f32.mxu1 %v2462_v15  ;;  %5894 = vmatmul.mubr.f32.gmra.mrb[106].mxu0 %v1096_v10  ;;  %v2897_v15 = vld [vmem:[#allocation11 + $0x260] sm:$0xff] }
 0x1ff   : > { %v715_v38 = vpop.f32.mrb[54].mxu0 }
 0x200   : > { %v1097_v18 = vmul.f32 %v8195_v45, %v810_v0  ;;  %v716_v34 = vadd.f32 %v8313_v61, %v715_v38  ;;  %v5785_v8 = vpop.f32.mrb[55].mxu0  ;;  %v6735_v45 = vpack.c.bf16 %v2890_v41, %v2889_v23 }
 0x201   : > { %v2463_v26 = vld [vmem:[#allocation2 + $0xba] sm:$0xff] }
 0x202   : > { %1138 = vst [vmem:[#allocation2 + $0xd0] sm:$0xff] %v1097_v18  ;;  %v811_v32 = vmax.f32 %v716_v34, 0.0  ;;  %6146 = vmatmul.mubr.f32.vlgmr.msra.gmra.mrb[0].mxu1 %v2463_v26  ;;  %5896 = vmatprep.mubr.f32.mxu0 %v1097_v18  ;;  %v2900_v26 = vld [vmem:[#allocation11 + $0x278] sm:$0xff] }
 0x203   : > { %v720_v24 = vpop.f32.mrb[56].mxu0  ;;  %6730 = vmatpush3.bf16.msra.mxu1 %v8320_v5 }
 0x204   : > { %v1098_v52 = vmul.f32 %v8192_v44, %v811_v32  ;;  %v721_v28 = vadd.f32 %v8313_v61, %v720_v24  ;;  %v5788_v27 = vpop.f32.mrb[57].mxu0  ;;  %6732 = vmatprep.subr.bf16.mxu1 %v6731_v40  ;;  %v6739_v44 = vpack.c.bf16 %v2892_v55, %v2891_v16 }
 0x205   : > { %v2464_v33 = vld [vmem:[#allocation2 + $0xc2] sm:$0xff] }
 0x206   : > { %1139 = vst [vmem:[#allocation2 + $0xd8] sm:$0xff] %v1098_v52  ;;  %v812_v29 = vmax.f32 %v721_v28, 0.0  ;;  %6148 = vmatprep.mubr.f32.mxu1 %v2464_v33  ;;  %5897 = vmatmul.mubr.f32.gmra.mrb[108].mxu0 %v1098_v52  ;;  %v3291_v27 = vld [vmem:[#allocation11 + $0x280] sm:$0xff] }
 0x207   : > { %v725_v43 = vpop.f32.mrb[58].mxu0  ;;  %6734 = vmatpush3.bf16.msra.mxu1 %v6731_v40  ;;  %v2899_v40 = vld [vmem:[#allocation11 + $0x270] sm:$0xff] }
 0x208   : > { %v1099_v31 = vmul.f32 %v8203_v48, %v812_v29  ;;  %v726_v5 = vadd.f32 %v8313_v61, %v725_v43  ;;  %v5791_v46 = vpop.f32.mrb[59].mxu0  ;;  %6736 = vmatprep.subr.bf16.mxu1 %v6735_v45  ;;  %v6743_v48 = vpack.c.bf16 %v2894_v13, %v2893_v63  ;;  %v6755_v52 = vpack.c.bf16 %v2900_v26, %v2899_v40  ;;  %v2079_v40 = vld [vmem:[#allocation11 + $0x130] sm:$0xff]  ;;  %v2080_v26 = vld [vmem:[#allocation11 + $0x138] sm:$0xff] }
 0x209   : > { %v2465_v58 = vld [vmem:[#allocation2 + $0xca] sm:$0xff] }
 0x20a   : > { %1140 = vst [vmem:[#allocation2 + $0xe0] sm:$0xff] %v1099_v31  ;;  %v813_v35 = vmax.f32 %v726_v5, 0.0  ;;  %6149 = vmatmul.mubr.f32.gmra.mrb[2].mxu1 %v2465_v58  ;;  %5899 = vmatprep.mubr.f32.mxu0 %v1099_v31 }
 0x20b   : > { %v730_v62 = vpop.f32.mrb[60].mxu0  ;;  %6738 = vmatpush3.bf16.msra.mxu1 %v6735_v45  ;;  %v3292_v45 = vld [vmem:[#allocation11 + $0x288] sm:$0xff] }
 0x20c   : > { %v1100_v1 = vmul.f32 %v8200_v47, %v813_v35  ;;  %v731_v6 = vadd.f32 %v8313_v61, %v730_v62  ;;  %v5794_v14 = vpop.f32.mrb[61].mxu0  ;;  %6740 = vmatprep.subr.bf16.mxu1 %v6739_v44  ;;  %v6747_v47 = vpack.c.bf16 %v2896_v39, %v2895_v11  ;;  %v8397_v43 = vpack.c.bf16 %v3292_v45, %v3291_v27  ;;  %v1630_v11 = vld [vmem:[#allocation2 + $0x1] sm:$0xff] }
 0x20d   : > { %v2466_v49 = vld [vmem:[#allocation2 + $0xd2] sm:$0xff]  ;;  %v2081_v45 = vld [vmem:[#allocation11 + $0x140] sm:$0xff] }
 0x20e   : > { %1141 = vst [vmem:[#allocation2 + $0xe8] sm:$0xff] %v1100_v1  ;;  %v814_v20 = vmax.f32 %v731_v6, 0.0  ;;  %6151 = vmatprep.mubr.f32.mxu1 %v2466_v49  ;;  %5900 = vmatmul.mubr.f32.gmra.mrb[110].mxu0 %v1100_v1 }
 0x20f   : > { %v735_v9 = vpop.f32.mrb[62].mxu0  ;;  %6742 = vmatpush3.bf16.msra.mxu1 %v6739_v44 }
 0x210   : > { %v1101_v36 = vmul.f32 %v8211_v51, %v814_v20  ;;  %v736_v10 = vadd.f32 %v8313_v61, %v735_v9  ;;  %v5797_v42 = vpop.f32.mrb[63].mxu0  ;;  %6744 = vmatprep.subr.bf16.mxu1 %v6743_v48  ;;  %v6751_v51 = vpack.c.bf16 %v2898_v22, %v2897_v15  ;;  %v1632_v22 = vld [vmem:[#allocation2 + $0x11] sm:$0xff] }
 0x211   : > { %v2467_v19 = vld [vmem:[#allocation2 + $0xda] sm:$0xff] }
 0x212   : > { %1142 = vst [vmem:[#allocation2 + $0xf0] sm:$0xff] %v1101_v36  ;;  %v815_v37 = vmax.f32 %v736_v10, 0.0  ;;  %6152 = vmatmul.mubr.f32.gmra.mrb[4].mxu1 %v2467_v19  ;;  %5902 = vmatprep.mubr.f32.mxu0 %v1101_v36  ;;  %v1631_v36 = vld [vmem:[#allocation2 + $0x9] sm:$0xff] }
 0x213   : > { %v740_v0 = vpop.f32.mrb[64].mxu0  ;;  %6746 = vmatpush3.bf16.msra.mxu1 %v6743_v48  ;;  %v2076_v48 = vld [vmem:[#allocation11 + $0x118] sm:$0xff]  ;;  %v2078_v19 = vld [vmem:[#allocation11 + $0x128] sm:$0xff] }
 0x214   : > { %v1102_v38 = vmul.f32 %v8208_v50, %v815_v37  ;;  %v741_v18 = vadd.f32 %v8313_v61, %v740_v0  ;;  %v5800_v34 = vpop.f32.mrb[65].mxu0  ;;  %6748 = vmatprep.subr.bf16.mxu1 %v6747_v47 }
 0x215   : > { %v8387_v8 = vld [vmem:[#allocation2 + $0xe2] sm:$0xff] }
 0x216   : > { %1143 = vst [vmem:[#allocation2 + $0xf8] sm:$0xff] %v1102_v38  ;;  %v816_v23 = vmax.f32 %v741_v18, 0.0  ;;  %6154 = vmatprep.mubr.f32.mxu1 %v8387_v8  ;;  %5903 = vmatmul.mubr.f32.gmra.mrb[112].mxu0 %v1102_v38  ;;  %v1633_v18 = vld [vmem:[#allocation2 + $0x19] sm:$0xff] }
 0x217   : > { %v745_v41 = vpop.f32.mrb[66].mxu0  ;;  %6750 = vmatpush3.bf16.msra.mxu1 %v6747_v47  ;;  %v2077_v47 = vld [vmem:[#allocation11 + $0x120] sm:$0xff] }
 0x218   : > { %v1103_v32 = vmul.f32 %v8219_v54, %v816_v23  ;;  %v746_v50 = vadd.f32 %v8313_v61, %v745_v41  ;;  %v5803_v24 = vpop.f32.mrb[67].mxu0  ;;  %6752 = vmatprep.subr.bf16.mxu1 %v6751_v51  ;;  %v6671_v34 = vpack.c.bf16 %v2078_v19, %v2077_v47  ;;  %v1634_v41 = vld [vmem:[#allocation2 + $0x21] sm:$0xff]  ;;  %v3296_v19 = vld [vmem:[#allocation11 + $0x2a8] sm:$0xff] }
 0x219   : > { %v8392_v28 = vld [vmem:[#allocation2 + $0xea] sm:$0xff] }
 0x21a   : > { %1144 = vst [vmem:[#allocation2 + $0x100] sm:$0xff] %v1103_v32  ;;  %v817_v33 = vmax.f32 %v746_v50, 0.0  ;;  %6155 = vmatmul.mubr.f32.gmra.mrb[6].mxu1 %v8392_v28  ;;  %5905 = vmatprep.mubr.f32.mxu0 %v1103_v32  ;;  %v1635_v24 = vld [vmem:[#allocation2 + $0x29] sm:$0xff] }
 0x21b   : > { %v750_v16 = vpop.f32.mrb[68].mxu0  ;;  %6754 = vmatpush3.bf16.msra.mxu1 %v6751_v51  ;;  %v3295_v47 = vld [vmem:[#allocation11 + $0x2a0] sm:$0xff] }
 0x21c   : > { %v1104_v55 = vmul.f32 %v8216_v53, %v817_v33  ;;  %v751_v54 = vadd.f32 %v8313_v61, %v750_v16  ;;  %v5806_v29 = vpop.f32.mrb[69].mxu0  ;;  %6756 = vmatprep.subr.bf16.mxu1 %v6755_v52  ;;  %v2082_v33 = vld [vmem:[#allocation11 + $0x148] sm:$0xff] }
 0x21d   : > { %v8399_v31 = vld [vmem:[#allocation2 + $0xf2] sm:$0xff] }
 0x21e   : > { %1145 = vst [vmem:[#allocation2 + $0x108] sm:$0xff] %v1104_v55  ;;  %v818_v5 = vmax.f32 %v751_v54, 0.0  ;;  %6157 = vmatprep.mubr.f32.mxu1 %v8399_v31  ;;  %5906 = vmatmul.mubr.f32.gmra.mrb[114].mxu0 %v1104_v55  ;;  %v1636_v55 = vld [vmem:[#allocation2 + $0x31] sm:$0xff]  ;;  %v1064_v54 = vpop.permute.xlu1 %1063 }
 0x21f   : > { %v755_v46 = vpop.f32.mrb[70].mxu0  ;;  %6758 = vmatpush3.bf16.msra.mxu1 %v6755_v52  ;;  %v6675_v52 = vpack.c.bf16 %v2080_v26, %v2079_v40  ;;  %v3297_v40 = vld [vmem:[#allocation11 + $0x2b0] sm:$0xff] }
 0x220   : > { %v1105_v44 = vmul.f32 %v8227_v57, %v818_v5  ;;  %v756_v58 = vadd.f32 %v8313_v61, %v755_v46  ;;  %v5809_v53 = vpop.f32.mrb[71].mxu0  ;;  %6760 = vmatprep.subr.bf16.mxu1 %v8397_v43  ;;  %v2075_v57 = vld [vmem:[#allocation11 + $0x110] sm:$0xff]  ;;  %v6679_v46 = vpack.c.bf16 %v2082_v33, %v2081_v45  ;;  %v1646_v45 = vld [vmem:[#allocation2 + $0x81] sm:$0xff] }
 0x221   : > { %v8405_v63 = vld [vmem:[#allocation2 + $0xfa] sm:$0xff]  ;;  %v6667_v10 = vpack.c.bf16 %v2076_v48, %v2075_v57  ;;  %v3299_v33 = vld [vmem:[#allocation11 + $0x2c0] sm:$0xff] }
 0x222   : > { %1146 = vst [vmem:[#allocation2 + $0x110] sm:$0xff] %v1105_v44  ;;  %v819_v13 = vmax.f32 %v756_v58, 0.0  ;;  %6158 = vmatmul.mubr.f32.gmra.mrb[8].mxu1 %v8405_v63  ;;  %5908 = vmatprep.mubr.f32.mxu0 %v1105_v44  ;;  %v1637_v53 = vld [vmem:[#allocation2 + $0x39] sm:$0xff] }
 0x223   : > { %v760_v35 = vpop.f32.mrb[72].mxu0  ;;  %v3293_v48 = vld [vmem:[#allocation11 + $0x290] sm:$0xff] }
 0x224   : > { %v1106_v62 = vmul.f32 %v8224_v56, %v819_v13  ;;  %v761_v1 = vadd.f32 %v8313_v61, %v760_v35  ;;  %v5812_v6 = vpop.f32.mrb[73].mxu0  ;;  %v1638_v35 = vld [vmem:[#allocation2 + $0x41] sm:$0xff] }
 0x225   : > { %v8410_v14 = vld [vmem:[#allocation2 + $0x102] sm:$0xff]  ;;  %v1069_v6 = vpop.permute.xlu0 %1068 }
 0x226   : > { %1147 = vst [vmem:[#allocation2 + $0x118] sm:$0xff] %v1106_v62  ;;  %v820_v49 = vmax.f32 %v761_v1, 0.0  ;;  %6160 = vmatprep.mubr.f32.mxu1 %v8410_v14  ;;  %5909 = vmatmul.mubr.f32.gmra.mrb[116].mxu0 %v1106_v62  ;;  %v2083_v62 = vld [vmem:[#allocation11 + $0x150] sm:$0xff]  ;;  %v2084_v1 = vld [vmem:[#allocation11 + $0x158] sm:$0xff] }
 0x227   : > { %v765_v39 = vpop.f32.mrb[74].mxu0  ;;  %5943 = vmatprep.mubr.f32.mxu0 %v1630_v11  ;;  %v3294_v11 = vld [vmem:[#allocation11 + $0x298] sm:$0xff] }
 0x228   : > { %v1107_v20 = vmul.f32 %v8235_v60, %v820_v49  ;;  %v766_v9 = vadd.f32 %v8313_v61, %v765_v39  ;;  %v5815_v56 = vpop.f32.mrb[75].mxu0  ;;  %v6683_v39 = vpack.c.bf16 %v2084_v1, %v2083_v62  ;;  %v1650_v62 = vld [vmem:[#allocation2 + $0xa1] sm:$0xff] }
 0x229   : > { %v8415_v42 = vld [vmem:[#allocation2 + $0x10a] sm:$0xff]  ;;  %v2849_v56 = vld [vmem:[#allocation2 + $0x1b] sm:$0xff] }
 0x22a   : > { %1148 = vst [vmem:[#allocation2 + $0x120] sm:$0xff] %v1107_v20  ;;  %v821_v15 = vmax.f32 %v766_v9, 0.0  ;;  %6161 = vmatmul.mubr.f32.gmra.mrb[10].mxu1 %v8415_v42  ;;  %5944 = vmatmul.mubr.f32.vlgmr.msra.gmra.mrb[82].mxu0 %v1631_v36  ;;  %v2848_v20 = vld [vmem:[#allocation2 + $0x13] sm:$0xff]  ;;  %v6763_v36 = vpack.c.bf16 %v3294_v11, %v3293_v48  ;;  %v3303_v1 = vld [vmem:[#allocation11 + $0x2e0] sm:$0xff] }
 0x22b   : > { %v770_v37 = vpop.f32.mrb[76].mxu0  ;;  %5946 = vmatprep.mubr.f32.mxu0 %v1632_v22  ;;  %6666 = vmatpush3.bf16.msra.mxu0 %v8349_v4  ;;  %v1640_v9 = vld [vmem:[#allocation2 + $0x51] sm:$0xff]  ;;  %v2085_v22 = vld [vmem:[#allocation11 + $0x160] sm:$0xff] }
 0x22c   : > { %v1108_v60 = vmul.f32 %v8232_v59, %v821_v15  ;;  %v771_v0 = vadd.f32 %v8313_v61, %v770_v37  ;;  %v5818_v38 = vpop.f32.mrb[77].mxu0  ;;  %6668 = vmatprep.subr.bf16.mxu0 %v6667_v10  ;;  %v2850_v15 = vld [vmem:[#allocation2 + $0x23] sm:$0xff]  ;;  %v2086_v37 = vld [vmem:[#allocation11 + $0x168] sm:$0xff] }
 0x22d   : > { %v8421_v51 = vld [vmem:[#allocation2 + $0x112] sm:$0xff]  ;;  %v6767_v38 = vpack.c.bf16 %v3296_v19, %v3295_v47  ;;  %v6687_v26 = vpack.c.bf16 %v2086_v37, %v2085_v22  ;;  %v1654_v47 = vld [vmem:[#allocation2 + $0xc1] sm:$0xff]  ;;  %v1655_v37 = vld [vmem:[#allocation2 + $0xc9] sm:$0xff] }
 0x22e   : > { %1149 = vst [vmem:[#allocation2 + $0x128] sm:$0xff] %v1108_v60  ;;  %v822_v23 = vmax.f32 %v771_v0, 0.0  ;;  %6163 = vmatprep.mubr.f32.mxu1 %v8421_v51  ;;  %5947 = vmatmul.mubr.f32.gmra.mrb[84].mxu0 %v1633_v18  ;;  %v1642_v60 = vld [vmem:[#allocation2 + $0x61] sm:$0xff]  ;;  %v2851_v0 = vld [vmem:[#allocation2 + $0x2b] sm:$0xff]  ;;  %v2852_v18 = vld [vmem:[#allocation2 + $0x33] sm:$0xff] }
 0x22f   : > { %v775_v32 = vpop.f32.mrb[78].mxu0  ;;  %5949 = vmatprep.mubr.f32.mxu0 %v1634_v41  ;;  %6670 = vmatpush3.bf16.msra.mxu0 %v6667_v10  ;;  %v1641_v10 = vld [vmem:[#allocation2 + $0x59] sm:$0xff]  ;;  %v1652_v11 = vld [vmem:[#allocation2 + $0xb1] sm:$0xff]  ;;  %v3697_v19 = vld [vmem:[#allocation11 + $0x300] sm:$0xff] }
 0x230   : > { %v1109_v59 = vmul.f32 %v8243_v2, %v822_v23  ;;  %v776_v4 = vadd.f32 %v8313_v61, %v775_v32  ;;  %v5821_v50 = vpop.f32.mrb[79].mxu0  ;;  %6672 = vmatprep.subr.bf16.mxu0 %v6671_v34  ;;  %v3298_v23 = vld [vmem:[#allocation11 + $0x2b8] sm:$0xff]  ;;  %v2087_v41 = vld [vmem:[#allocation11 + $0x170] sm:$0xff]  ;;  %v2863_v22 = vld [vmem:[#allocation2 + $0x8b] sm:$0xff] }
 0x231   : > { %v8426_v27 = vld [vmem:[#allocation2 + $0x11a] sm:$0xff] }
 0x232   : > { %1150 = vst [vmem:[#allocation2 + $0x130] sm:$0xff] %v1109_v59  ;;  %v823_v16 = vmax.f32 %v776_v4, 0.0  ;;  %6164 = vmatmul.mubr.f32.gmra.mrb[12].mxu1 %v8426_v27  ;;  %5950 = vmatmul.mubr.f32.gmra.mrb[86].mxu0 %v1635_v24  ;;  %v2088_v32 = vld [vmem:[#allocation11 + $0x178] sm:$0xff]  ;;  %v1644_v59 = vld [vmem:[#allocation2 + $0x71] sm:$0xff]  ;;  %v6771_v24 = vpack.c.bf16 %v3298_v23, %v3297_v40 }
 0x233   : > { %v780_v29 = vpop.f32.mrb[80].mxu0  ;;  %5952 = vmatprep.mubr.f32.mxu0 %v1636_v55  ;;  %6674 = vmatpush3.bf16.msra.mxu0 %v6671_v34  ;;  %v1643_v34 = vld [vmem:[#allocation2 + $0x69] sm:$0xff]  ;;  %v1645_v50 = vld [vmem:[#allocation2 + $0x79] sm:$0xff] }
 0x234   : > { %v1110_v2 = vmul.f32 %v1064_v54, %v823_v16  ;;  %v781_v5 = vadd.f32 %v8313_v61, %v780_v29  ;;  %6676 = vmatprep.subr.bf16.mxu0 %v6675_v52  ;;  %v5824_v44 = vpop.f32.mrb[81].mxu0  ;;  %v1639_v61 = vld [vmem:[#allocation2 + $0x49] sm:$0xff]  ;;  %v2856_v54 = vld [vmem:[#allocation2 + $0x53] sm:$0xff] }
 0x235   : > { %v2476_v58 = vld [vmem:[#allocation2 + $0x122] sm:$0xff]  ;;  %v3300_v16 = vld [vmem:[#allocation11 + $0x2c8] sm:$0xff] }
 0x236   : > { %1151 = vst [vmem:[#allocation2 + $0x138] sm:$0xff] %v1110_v2  ;;  %v824_v13 = vmax.f32 %v781_v5, 0.0  ;;  %6166 = vmatprep.mubr.f32.mxu1 %v2476_v58  ;;  %5953 = vmatmul.mubr.f32.gmra.mrb[88].mxu0 %v1637_v53  ;;  %v2854_v4 = vld [vmem:[#allocation2 + $0x43] sm:$0xff]  ;;  %v2855_v55 = vld [vmem:[#allocation2 + $0x4b] sm:$0xff]  ;;  %v6775_v2 = vpack.c.bf16 %v3300_v16, %v3299_v33  ;;  %v2857_v58 = vld [vmem:[#allocation2 + $0x5b] sm:$0xff] }
 0x237   : > { %5955 = vmatprep.mubr.f32.mxu0 %v1638_v35  ;;  %6678 = vmatpush3.bf16.msra.mxu0 %v6675_v52  ;;  %v6691_v52 = vpack.c.bf16 %v2088_v32, %v2087_v41  ;;  %v1647_v29 = vld [vmem:[#allocation2 + $0x89] sm:$0xff]  ;;  %v1648_v5 = vld [vmem:[#allocation2 + $0x91] sm:$0xff]  ;;  %v3302_v44 = vld [vmem:[#allocation11 + $0x2d8] sm:$0xff] }
 0x238   : > { %v1111_v57 = vmul.f32 %v1069_v6, %v824_v13  ;;  %6680 = vmatprep.subr.bf16.mxu0 %v6679_v46  ;;  %v2858_v53 = vld [vmem:[#allocation2 + $0x63] sm:$0xff]  ;;  %v1649_v13 = vld [vmem:[#allocation2 + $0x99] sm:$0xff]  ;;  %v3304_v6 = vld [vmem:[#allocation11 + $0x2e8] sm:$0xff] }
 0x239   : > { %v2477_v49 = vld [vmem:[#allocation2 + $0x12a] sm:$0xff]  ;;  %v2860_v48 = vld [vmem:[#allocation2 + $0x73] sm:$0xff] }
 0x23a   : > { %1152 = vst [vmem:[#allocation2 + $0x140] sm:$0xff] %v1111_v57  ;;  %6167 = vmatmul.mubr.f32.gmra.mrb[14].mxu1 %v2477_v49  ;;  %5956 = vmatmul.mubr.f32.gmra.mrb[90].mxu0 %v1639_v61  ;;  %v2859_v57 = vld [vmem:[#allocation2 + $0x6b] sm:$0xff]  ;;  %v6783_v61 = vpack.c.bf16 %v3304_v6, %v3303_v1  ;;  %v2866_v40 = vld [vmem:[#allocation2 + $0xa3] sm:$0xff]  ;;  %v2868_v32 = vld [vmem:[#allocation2 + $0xb3] sm:$0xff] }
 0x23b   : > { %6201 = vmatprep.mubr.f32.mxu1 %v2848_v20  ;;  %5958 = vmatprep.mubr.f32.mxu0 %v1640_v9  ;;  %v1651_v49 = vld [vmem:[#allocation2 + $0xa9] sm:$0xff]  ;;  %v3306_v20 = vld [vmem:[#allocation11 + $0x2f8] sm:$0xff]  ;;  %v2872_v33 = vld [vmem:[#allocation2 + $0xd3] sm:$0xff] }
 0x23c   : > { %6682 = vmatpush3.bf16.msra.mxu0 %v6679_v46  ;;  %v3301_v46 = vld [vmem:[#allocation11 + $0x2d0] sm:$0xff]  ;;  %v2867_v23 = vld [vmem:[#allocation2 + $0xab] sm:$0xff] }
 0x23d   : > { %6684 = vmatprep.subr.bf16.mxu0 %v6683_v39  ;;  %v6779_v35 = vpack.c.bf16 %v3302_v44, %v3301_v46  ;;  %v2861_v9 = vld [vmem:[#allocation2 + $0x7b] sm:$0xff]  ;;  %v1659_v41 = vld [vmem:[#allocation2 + $0xe9] sm:$0xff]  ;;  %v1664_v16 = vld [vmem:[#allocation2 + $0x111] sm:$0xff] }
 0x23e   : > { %6202 = vmatmul.mubr.f32.vlgmr.msra.gmra.mrb[16].mxu1 %v2849_v56  ;;  %5959 = vmatmul.mubr.f32.gmra.mrb[92].mxu0 %v1641_v10  ;;  %v2862_v56 = vld [vmem:[#allocation2 + $0x83] sm:$0xff]  ;;  %v2876_v44 = vld [vmem:[#allocation2 + $0xf3] sm:$0xff]  ;;  %v2879_v1 = vld [vmem:[#allocation2 + $0x10b] sm:$0xff] }
 0x23f   : > { %6762 = vmatpush3.bf16.msra.mxu1 %v8397_v43  ;;  %6204 = vmatprep.mubr.f32.mxu1 %v2850_v15  ;;  %v2853_v43 = vld [vmem:[#allocation2 + $0x3b] sm:$0xff]  ;;  %v3698_v15 = vld [vmem:[#allocation11 + $0x308] sm:$0xff] }
 0x240   : > { %6764 = vmatprep.subr.bf16.mxu1 %v6763_v36  ;;  %5961 = vmatprep.mubr.f32.mxu0 %v1642_v60  ;;  %v8432_v60 = vpack.c.bf16 %v3698_v15, %v3697_v19  ;;  %v2037_v46 = vld [vmem:[#allocation2 + $0xa] sm:$0xff] }
 0x241   : > { %6686 = vmatpush3.bf16.msra.mxu0 %v6683_v39  ;;  %v3305_v39 = vld [vmem:[#allocation11 + $0x2f0] sm:$0xff]  ;;  %v8447_v6 = vld [vmem:[#allocation2 + $0x2a] sm:$0xff] }
 0x242   : > { %6205 = vmatmul.mubr.f32.gmra.mrb[18].mxu1 %v2851_v0  ;;  %5962 = vmatmul.mubr.f32.gmra.mrb[94].mxu0 %v1643_v34  ;;  %v6787_v10 = vpack.c.bf16 %v3306_v20, %v3305_v39  ;;  %v2864_v0 = vld [vmem:[#allocation2 + $0x93] sm:$0xff]  ;;  %v2883_v39 = vld [vmem:[#allocation2 + $0x12b] sm:$0xff]  ;;  %v3700_v20 = vld [vmem:[#allocation11 + $0x318] sm:$0xff] }
 0x243   : > { %6207 = vmatprep.mubr.f32.mxu1 %v2852_v18  ;;  %6766 = vmatpush3.bf16.msra.mxu1 %v6763_v36  ;;  %v1653_v36 = vld [vmem:[#allocation2 + $0xb9] sm:$0xff]  ;;  %v3702_v19 = vld [vmem:[#allocation11 + $0x328] sm:$0xff]  ;;  %v8474_v15 = vld [vmem:[#allocation2 + $0x24] sm:$0xff] }
 0x244   : > { %5964 = vmatprep.mubr.f32.mxu0 %v1644_v59  ;;  %6768 = vmatprep.subr.bf16.mxu1 %v6767_v38  ;;  %v2865_v18 = vld [vmem:[#allocation2 + $0x9b] sm:$0xff]  ;;  %v1660_v59 = vld [vmem:[#allocation2 + $0xf1] sm:$0xff] }
 0x245   : > { %6688 = vmatprep.subr.bf16.mxu0 %v6687_v26  ;;  %v1657_v34 = vld [vmem:[#allocation2 + $0xd9] sm:$0xff] }
 0x246   : > { %6208 = vmatmul.mubr.f32.gmra.mrb[20].mxu1 %v2853_v43  ;;  %5965 = vmatmul.mubr.f32.gmra.mrb[96].mxu0 %v1645_v50  ;;  %v2869_v43 = vld [vmem:[#allocation2 + $0xbb] sm:$0xff]  ;;  %v2870_v50 = vld [vmem:[#allocation2 + $0xc3] sm:$0xff] }
 0x247   : > { %6210 = vmatprep.mubr.f32.mxu1 %v2854_v4  ;;  %5967 = vmatprep.mubr.f32.mxu0 %v1646_v45  ;;  %v1661_v4 = vld [vmem:[#allocation2 + $0xf9] sm:$0xff]  ;;  %v1663_v45 = vld [vmem:[#allocation2 + $0x109] sm:$0xff] }
 0x248   : > { %6770 = vmatpush3.bf16.msra.mxu1 %v6767_v38  ;;  %6690 = vmatpush3.bf16.msra.mxu0 %v6687_v26  ;;  %v1656_v38 = vld [vmem:[#allocation2 + $0xd1] sm:$0xff]  ;;  %v1658_v26 = vld [vmem:[#allocation2 + $0xe1] sm:$0xff] }
 0x249   : > { %6772 = vmatprep.subr.bf16.mxu1 %v6771_v24  ;;  %6692 = vmatprep.subr.bf16.mxu0 %v6691_v52 }
 0x24a   : > { %6211 = vmatmul.mubr.f32.gmra.mrb[22].mxu1 %v2855_v55  ;;  %5968 = vmatmul.mubr.f32.gmra.mrb[98].mxu0 %v1647_v29  ;;  %v2873_v55 = vld [vmem:[#allocation2 + $0xdb] sm:$0xff]  ;;  %v2874_v29 = vld [vmem:[#allocation2 + $0xe3] sm:$0xff] }
 0x24b   : > { %6213 = vmatprep.mubr.f32.mxu1 %v2856_v54  ;;  %5970 = vmatprep.mubr.f32.mxu0 %v1648_v5  ;;  %v1665_v54 = vld [vmem:[#allocation2 + $0x119] sm:$0xff]  ;;  %v2875_v5 = vld [vmem:[#allocation2 + $0xeb] sm:$0xff] }
 0x24c   : > { %6774 = vmatpush3.bf16.msra.mxu1 %v6771_v24  ;;  %6694 = vmatpush3.bf16.msra.mxu0 %v6691_v52  ;;  %v1662_v24 = vld [vmem:[#allocation2 + $0x101] sm:$0xff]  ;;  %v2871_v52 = vld [vmem:[#allocation2 + $0xcb] sm:$0xff] }
 0x24d   : > { %6776 = vmatprep.subr.bf16.mxu1 %v6775_v2  ;;  %6696 = vmatprep.subr.bf16.mxu0 %v8245_v3 }
 0x24e   : > { %6214 = vmatmul.mubr.f32.gmra.mrb[24].mxu1 %v2857_v58  ;;  %5971 = vmatmul.mubr.f32.gmra.mrb[100].mxu0 %v1649_v13  ;;  %v8435_v58 = vld [vmem:[#allocation2 + $0x12] sm:$0xff]  ;;  %v8439_v13 = vld [vmem:[#allocation2 + $0x1a] sm:$0xff] }
 0x24f   : > { %6216 = vmatprep.mubr.f32.mxu1 %v2858_v53  ;;  %5973 = vmatprep.mubr.f32.mxu0 %v1650_v62  ;;  %v2877_v53 = vld [vmem:[#allocation2 + $0xfb] sm:$0xff] }
 0x250   : > { %6778 = vmatpush3.bf16.msra.mxu1 %v6775_v2  ;;  %v2036_v2 = vld [vmem:[#allocation2 + $0x2] sm:$0xff] }
 0x251   : > { %6780 = vmatprep.subr.bf16.mxu1 %v6779_v35  ;;  %v8443_v62 = vld [vmem:[#allocation2 + $0x22] sm:$0xff] }
 0x252   : > { %6217 = vmatmul.mubr.f32.gmra.mrb[26].mxu1 %v2859_v57  ;;  %5974 = vmatmul.mubr.f32.gmra.mrb[102].mxu0 %v1651_v49  ;;  %v8451_v57 = vld [vmem:[#allocation2 + $0x32] sm:$0xff]  ;;  %v8455_v49 = vld [vmem:[#allocation2 + $0x3a] sm:$0xff] }
 0x253   : > { %6219 = vmatprep.mubr.f32.mxu1 %v2860_v48  ;;  %5976 = vmatprep.mubr.f32.mxu0 %v1652_v11  ;;  %v2881_v48 = vld [vmem:[#allocation2 + $0x11b] sm:$0xff]  ;;  %v8462_v11 = vld [vmem:[#allocation2 + $0x4a] sm:$0xff] }
 0x254   : > { %6782 = vmatpush3.bf16.msra.mxu1 %v6779_v35  ;;  %v2878_v35 = vld [vmem:[#allocation2 + $0x103] sm:$0xff] }
 0x255   : > { %6784 = vmatprep.subr.bf16.mxu1 %v6783_v61 }
 0x256   : > { %6220 = vmatmul.mubr.f32.gmra.mrb[28].mxu1 %v2861_v9  ;;  %5977 = vmatmul.mubr.f32.gmra.mrb[104].mxu0 %v1653_v36  ;;  %v3254_v9 = vld [vmem:[#allocation2 + $0x14] sm:$0xff]  ;;  %v3255_v36 = vld [vmem:[#allocation2 + $0x1c] sm:$0xff] }
 0x257   : > { %6222 = vmatprep.mubr.f32.mxu1 %v2862_v56  ;;  %5979 = vmatprep.mubr.f32.mxu0 %v1654_v47  ;;  %v8467_v56 = vld [vmem:[#allocation2 + $0x52] sm:$0xff]  ;;  %v8471_v47 = vld [vmem:[#allocation2 + $0x5a] sm:$0xff] }
 0x258   : > { %6786 = vmatpush3.bf16.msra.mxu1 %v6783_v61  ;;  %v8459_v61 = vld [vmem:[#allocation2 + $0x42] sm:$0xff] }
 0x259   : > { %6788 = vmatprep.subr.bf16.mxu1 %v6787_v10 }
 0x25a   : > { %6223 = vmatmul.mubr.f32.gmra.mrb[30].mxu1 %v2863_v22  ;;  %5980 = vmatmul.mubr.f32.gmra.mrb[106].mxu0 %v1655_v37  ;;  %v8479_v22 = vld [vmem:[#allocation2 + $0x62] sm:$0xff]  ;;  %v8482_v37 = vld [vmem:[#allocation2 + $0x2c] sm:$0xff] }
 0x25b   : > { %6225 = vmatprep.mubr.f32.mxu1 %v2864_v0  ;;  %5982 = vmatprep.mubr.f32.mxu0 %v1656_v38  ;;  %v8484_v0 = vld [vmem:[#allocation2 + $0x6a] sm:$0xff]  ;;  %v8488_v38 = vld [vmem:[#allocation2 + $0x34] sm:$0xff] }
 0x25c   : > { %6790 = vmatpush3.bf16.msra.mxu1 %v6787_v10 }
 0x25d   : > { %6792 = vmatprep.subr.bf16.mxu1 %v8432_v60 }
 0x25e   : > { %6226 = vmatmul.mubr.f32.gmra.mrb[32].mxu1 %v2865_v18  ;;  %5983 = vmatmul.mubr.f32.gmra.mrb[108].mxu0 %v1657_v34  ;;  %v3704_v18 = vld [vmem:[#allocation11 + $0x338] sm:$0xff]  ;;  %v8492_v34 = vld [vmem:[#allocation2 + $0x72] sm:$0xff] }
 0x25f   : > { %6228 = vmatprep.mubr.f32.mxu1 %v2866_v40  ;;  %5985 = vmatprep.mubr.f32.mxu0 %v1658_v26  ;;  %v8495_v40 = vld [vmem:[#allocation2 + $0x3c] sm:$0xff]  ;;  %v8497_v26 = vld [vmem:[#allocation2 + $0x44] sm:$0xff] }
 0x262   : > { %6229 = vmatmul.mubr.f32.gmra.mrb[34].mxu1 %v2867_v23  ;;  %5986 = vmatmul.mubr.f32.gmra.mrb[110].mxu0 %v1659_v41  ;;  %v8504_v41 = vld [vmem:[#allocation2 + $0x82] sm:$0xff] }
 0x263   : > { %6231 = vmatprep.mubr.f32.mxu1 %v2868_v32  ;;  %5988 = vmatprep.mubr.f32.mxu0 %v1660_v59  ;;  %v3705_v32 = vld [vmem:[#allocation11 + $0x340] sm:$0xff]  ;;  %v3706_v59 = vld [vmem:[#allocation11 + $0x348] sm:$0xff] }
 0x266   : > { %6232 = vmatmul.mubr.f32.gmra.mrb[0].mxu1 %v2869_v43  ;;  %5989 = vmatmul.mubr.f32.gmra.mrb[112].mxu0 %v1661_v4  ;;  %v8509_v43 = vld [vmem:[#allocation2 + $0x4c] sm:$0xff]  ;;  %v8511_v4 = vld [vmem:[#allocation2 + $0x54] sm:$0xff] }
 0x267   : > { %6234 = vmatprep.mubr.f32.mxu1 %v2870_v50  ;;  %5991 = vmatprep.mubr.f32.mxu0 %v1662_v24  ;;  %v8513_v50 = vld [vmem:[#allocation2 + $0x8a] sm:$0xff]  ;;  %v6807_v24 = vpack.c.bf16 %v3706_v59, %v3705_v32  ;;  %v8558_v32 = vld [vmem:[#allocation2 + $0x9c] sm:$0xff] }
 0x268   : > { %v2063_v59 = vld [vmem:[#allocation2 + $0xda] sm:$0xff] }
 0x26a   : > { %6235 = vmatmul.mubr.f32.gmra.mrb[2].mxu1 %v2871_v52  ;;  %5992 = vmatmul.mubr.f32.gmra.mrb[114].mxu0 %v1663_v45  ;;  %v8914_v52 = vld [vmem:[#allocation20_spill] sm:$0xff]  ;;  %v8518_v45 = vld [vmem:[#allocation2 + $0x92] sm:$0xff] }
 0x26b   : > { %6237 = vmatprep.mubr.f32.mxu1 %v2872_v33  ;;  %5994 = vmatprep.mubr.f32.mxu0 %v1664_v16  ;;  %v3707_v33 = vld [vmem:[#allocation11 + $0x350] sm:$0xff]  ;;  %v3708_v16 = vld [vmem:[#allocation11 + $0x358] sm:$0xff] }
 0x26e   : > { %6238 = vmatmul.mubr.f32.gmra.mrb[4].mxu1 %v2873_v55  ;;  %5995 = vmatmul.mubr.f32.gmra.mrb[116].mxu0 %v1665_v54  ;;  %v8525_v55 = vld [vmem:[#allocation2 + $0x64] sm:$0xff]  ;;  %v8527_v54 = vld [vmem:[#allocation2 + $0x9a] sm:$0xff] }
 0x26f   : > { %6240 = vmatprep.mubr.f32.mxu1 %v2874_v29  ;;  %6029 = vmatprep.mubr.f32.mxu0 %v2036_v2  ;;  %v6811_v29 = vpack.c.bf16 %v3708_v16, %v3707_v33  ;;  %v8531_v2 = vld [vmem:[#allocation2 + $0xa2] sm:$0xff]  ;;  %v8569_v33 = vld [vmem:[#allocation2 + $0xb4] sm:$0xff] }
 0x270   : > { %v8574_v16 = vld [vmem:[#allocation2 + $0xbc] sm:$0xff] }
 0x272   : > { %6241 = vmatmul.mubr.f32.gmra.mrb[6].mxu1 %v2875_v5  ;;  %6030 = vmatmul.mubr.f32.vlgmr.msra.gmra.mrb[82].mxu0 %v2037_v46  ;;  %v3709_v5 = vld [vmem:[#allocation11 + $0x360] sm:$0xff]  ;;  %v3710_v46 = vld [vmem:[#allocation11 + $0x368] sm:$0xff] }
 0x273   : > { %6243 = vmatprep.mubr.f32.mxu1 %v2876_v44  ;;  %6032 = vmatprep.mubr.f32.mxu0 %v8435_v58  ;;  %v8535_v44 = vld [vmem:[#allocation2 + $0x6c] sm:$0xff] }
 0x274   : > { %6698 = vmatpush3.bf16.msra.mxu0 %v8245_v3  ;;  %v2880_v3 = vld [vmem:[#allocation2 + $0x113] sm:$0xff] }
 0x275   : > { %6700 = vmatprep.subr.bf16.mxu0 %v8253_v7 }
 0x276   : > { %6244 = vmatmul.mubr.f32.gmra.mrb[8].mxu1 %v2877_v53  ;;  %6033 = vmatmul.mubr.f32.gmra.mrb[84].mxu0 %v8439_v13  ;;  %v8537_v53 = vld [vmem:[#allocation2 + $0x74] sm:$0xff] }
 0x277   : > { %6246 = vmatprep.mubr.f32.mxu1 %v2878_v35  ;;  %6035 = vmatprep.mubr.f32.mxu0 %v8443_v62  ;;  %v8539_v35 = vld [vmem:[#allocation2 + $0xaa] sm:$0xff] }
 0x278   : > { %6702 = vmatpush3.bf16.msra.mxu0 %v8253_v7  ;;  %v2882_v7 = vld [vmem:[#allocation2 + $0x123] sm:$0xff] }
 0x279   : > { %6704 = vmatprep.subr.bf16.mxu0 %v8261_v12 }
 0x27a   : > { %6247 = vmatmul.mubr.f32.gmra.mrb[10].mxu1 %v2879_v1  ;;  %6036 = vmatmul.mubr.f32.gmra.mrb[86].mxu0 %v8447_v6  ;;  %v6815_v1 = vpack.c.bf16 %v3710_v46, %v3709_v5  ;;  %v4105_v5 = vld [vmem:[#allocation11 + $0x390] sm:$0xff]  ;;  %v4107_v46 = vld [vmem:[#allocation11 + $0x3a0] sm:$0xff] }
 0x27b   : > { %6249 = vmatprep.mubr.f32.mxu1 %v2880_v3  ;;  %6038 = vmatprep.mubr.f32.mxu0 %v8451_v57  ;;  %v2058_v3 = vld [vmem:[#allocation2 + $0xb2] sm:$0xff] }
 0x27c   : > { %6706 = vmatpush3.bf16.msra.mxu0 %v8261_v12  ;;  %v3699_v12 = vld [vmem:[#allocation11 + $0x310] sm:$0xff] }
 0x27d   : > { %6708 = vmatprep.subr.bf16.mxu0 %v8269_v17  ;;  %v6795_v10 = vpack.c.bf16 %v3700_v20, %v3699_v12  ;;  %v8546_v12 = vld [vmem:[#allocation2 + $0x84] sm:$0xff]  ;;  %v2059_v20 = vld [vmem:[#allocation2 + $0xba] sm:$0xff] }
 0x27e   : > { %6250 = vmatmul.mubr.f32.gmra.mrb[12].mxu1 %v2881_v48  ;;  %6039 = vmatmul.mubr.f32.gmra.mrb[88].mxu0 %v8455_v49  ;;  %v3711_v48 = vld [vmem:[#allocation11 + $0x370] sm:$0xff] }
 0x27f   : > { %6252 = vmatprep.mubr.f32.mxu1 %v2882_v7  ;;  %6041 = vmatprep.mubr.f32.mxu0 %v8459_v61  ;;  %v3712_v7 = vld [vmem:[#allocation11 + $0x378] sm:$0xff] }
 0x280   : > { %6710 = vmatpush3.bf16.msra.mxu0 %v8269_v17  ;;  %v3701_v17 = vld [vmem:[#allocation11 + $0x320] sm:$0xff] }
 0x281   : > { %6712 = vmatprep.subr.bf16.mxu0 %v8275_v21 }
 0x282   : > { %6253 = vmatmul.mubr.f32.gmra.mrb[14].mxu1 %v2883_v39  ;;  %6042 = vmatmul.mubr.f32.gmra.mrb[90].mxu0 %v8462_v11  ;;  %v8544_v39 = vld [vmem:[#allocation2 + $0x7c] sm:$0xff] }
 0x283   : > { %6287 = vmatprep.mubr.f32.mxu1 %v3254_v9  ;;  %6044 = vmatprep.mubr.f32.mxu0 %v8467_v56  ;;  %v6819_v9 = vpack.c.bf16 %v3712_v7, %v3711_v48  ;;  %v4067_v48 = vld [vmem:[#allocation2 + $0x2d] sm:$0xff] }
 0x284   : > { %6714 = vmatpush3.bf16.msra.mxu0 %v8275_v21  ;;  %v6799_v21 = vpack.c.bf16 %v3702_v19, %v3701_v17  ;;  %v4104_v17 = vld [vmem:[#allocation11 + $0x388] sm:$0xff]  ;;  %v4513_v7 = vld [vmem:[#allocation11 + $0x420] sm:$0xff] }
 0x285   : > { %6716 = vmatprep.subr.bf16.mxu0 %v8281_v25  ;;  %v8550_v19 = vld [vmem:[#allocation2 + $0x8c] sm:$0xff] }
 0x286   : > { %6288 = vmatmul.mubr.f32.vlgmr.msra.gmra.mrb[16].mxu1 %v3255_v36  ;;  %6045 = vmatmul.mubr.f32.gmra.mrb[92].mxu0 %v8471_v47  ;;  %v2060_v36 = vld [vmem:[#allocation2 + $0xc2] sm:$0xff] }
 0x287   : > { %6794 = vmatpush3.bf16.msra.mxu1 %v8432_v60  ;;  %6290 = vmatprep.mubr.f32.mxu1 %v8474_v15  ;;  %v3703_v60 = vld [vmem:[#allocation11 + $0x330] sm:$0xff] }
 0x288   : > { %6796 = vmatprep.subr.bf16.mxu1 %v6795_v10  ;;  %6047 = vmatprep.mubr.f32.mxu0 %v8479_v22  ;;  %v6803_v23 = vpack.c.bf16 %v3704_v18, %v3703_v60  ;;  %v8555_v18 = vld [vmem:[#allocation2 + $0x94] sm:$0xff] }
 0x289   : > { %6718 = vmatpush3.bf16.msra.mxu0 %v8281_v25  ;;  %v8499_v25 = vld [vmem:[#allocation2 + $0x7a] sm:$0xff] }
 0x28a   : > { %6291 = vmatmul.mubr.f32.gmra.mrb[18].mxu1 %v8482_v37  ;;  %6048 = vmatmul.mubr.f32.gmra.mrb[94].mxu0 %v8484_v0 }
 0x28b   : > { %6293 = vmatprep.mubr.f32.mxu1 %v8488_v38  ;;  %6798 = vmatpush3.bf16.msra.mxu1 %v6795_v10  ;;  %v4103_v10 = vld [vmem:[#allocation11 + $0x380] sm:$0xff] }
 0x28c   : > { %6050 = vmatprep.mubr.f32.mxu0 %v8492_v34  ;;  %6800 = vmatprep.subr.bf16.mxu1 %v6799_v21  ;;  %v8552_v60 = vpack.c.bf16 %v4104_v17, %v4103_v10  ;;  %v4516_v10 = vld [vmem:[#allocation11 + $0x438] sm:$0xff] }
 0x28d   : > { %6720 = vmatprep.subr.bf16.mxu0 %v8289_v30  ;;  %v4070_v17 = vld [vmem:[#allocation2 + $0x45] sm:$0xff] }
 0x28e   : > { %6294 = vmatmul.mubr.f32.gmra.mrb[20].mxu1 %v8495_v40  ;;  %6051 = vmatmul.mubr.f32.gmra.mrb[96].mxu0 %v8499_v25 }
 0x28f   : > { %6296 = vmatprep.mubr.f32.mxu1 %v8497_v26  ;;  %6053 = vmatprep.mubr.f32.mxu0 %v8504_v41 }
 0x290   : > { %6802 = vmatpush3.bf16.msra.mxu1 %v6799_v21  ;;  %6722 = vmatpush3.bf16.msra.mxu0 %v8289_v30  ;;  %v8523_v30 = vld [vmem:[#allocation2 + $0x5c] sm:$0xff]  ;;  %v2061_v21 = vld [vmem:[#allocation2 + $0xca] sm:$0xff] }
 0x291   : > { %6804 = vmatprep.subr.bf16.mxu1 %v6803_v23  ;;  %6724 = vmatprep.subr.bf16.mxu0 %v8914_v52 }
 0x292   : > { %6297 = vmatmul.mubr.f32.gmra.mrb[22].mxu1 %v8509_v43  ;;  %6054 = vmatmul.mubr.f32.gmra.mrb[98].mxu0 %v8513_v50 }
 0x293   : > { %6299 = vmatprep.mubr.f32.mxu1 %v8511_v4  ;;  %6056 = vmatprep.mubr.f32.mxu0 %v8518_v45 }
 0x294   : > { %6806 = vmatpush3.bf16.msra.mxu1 %v6803_v23  ;;  %6726 = vmatpush3.bf16.msra.mxu0 %v8914_v52  ;;  %v2062_v23 = vld [vmem:[#allocation2 + $0xd2] sm:$0xff] }
 0x295   : > { %6808 = vmatprep.subr.bf16.mxu1 %v6807_v24  ;;  %v8566_v52 = vld [vmem:[#allocation2 + $0xac] sm:$0xff] }
 0x296   : > { %6300 = vmatmul.mubr.f32.gmra.mrb[24].mxu1 %v8523_v30  ;;  %6057 = vmatmul.mubr.f32.gmra.mrb[100].mxu0 %v8527_v54 }
 0x297   : > { %6302 = vmatprep.mubr.f32.mxu1 %v8525_v55  ;;  %6059 = vmatprep.mubr.f32.mxu0 %v8531_v2 }
 0x298   : > { %6810 = vmatpush3.bf16.msra.mxu1 %v6807_v24  ;;  %v8562_v24 = vld [vmem:[#allocation2 + $0xa4] sm:$0xff] }
 0x299   : > { %6812 = vmatprep.subr.bf16.mxu1 %v6811_v29 }
 0x29a   : > { %6303 = vmatmul.mubr.f32.gmra.mrb[26].mxu1 %v8535_v44  ;;  %6060 = vmatmul.mubr.f32.gmra.mrb[102].mxu0 %v8539_v35 }
 0x29b   : > { %6305 = vmatprep.mubr.f32.mxu1 %v8537_v53  ;;  %6062 = vmatprep.mubr.f32.mxu0 %v2058_v3 }
 0x29c   : > { %6814 = vmatpush3.bf16.msra.mxu1 %v6811_v29  ;;  %v8577_v29 = vld [vmem:[#allocation2 + $0xc4] sm:$0xff] }
 0x29d   : > { %6816 = vmatprep.subr.bf16.mxu1 %v6815_v1 }
 0x29e   : > { %6306 = vmatmul.mubr.f32.gmra.mrb[28].mxu1 %v8544_v39  ;;  %6063 = vmatmul.mubr.f32.gmra.mrb[104].mxu0 %v2059_v20 }
 0x29f   : > { %6308 = vmatprep.mubr.f32.mxu1 %v8546_v12  ;;  %6065 = vmatprep.mubr.f32.mxu0 %v2060_v36  ;;  %v4515_v36 = vld [vmem:[#allocation11 + $0x430] sm:$0xff] }
 0x2a0   : > { %6818 = vmatpush3.bf16.msra.mxu1 %v6815_v1  ;;  %v4108_v1 = vld [vmem:[#allocation11 + $0x3a8] sm:$0xff] }
 0x2a1   : > { %6820 = vmatprep.subr.bf16.mxu1 %v6819_v9 }
 0x2a2   : > { %6309 = vmatmul.mubr.f32.gmra.mrb[30].mxu1 %v8550_v19  ;;  %6066 = vmatmul.mubr.f32.gmra.mrb[106].mxu0 %v2061_v21  ;;  %v4071_v21 = vld [vmem:[#allocation2 + $0x4d] sm:$0xff] }
 0x2a3   : > { %6311 = vmatprep.mubr.f32.mxu1 %v8555_v18  ;;  %6068 = vmatprep.mubr.f32.mxu0 %v2062_v23  ;;  %v4072_v23 = vld [vmem:[#allocation2 + $0x55] sm:$0xff] }
 0x2a4   : > { %6822 = vmatpush3.bf16.msra.mxu1 %v6819_v9  ;;  %v4069_v9 = vld [vmem:[#allocation2 + $0x3d] sm:$0xff] }
 0x2a5   : > { %6824 = vmatprep.subr.bf16.mxu1 %v8552_v60 }
 0x2a6   : > { %6312 = vmatmul.mubr.f32.gmra.mrb[32].mxu1 %v8558_v32  ;;  %6069 = vmatmul.mubr.f32.gmra.mrb[108].mxu0 %v2063_v59  ;;  %v4073_v59 = vld [vmem:[#allocation2 + $0x5d] sm:$0xff] }
 0x2a7   : > { %6314 = vmatprep.mubr.f32.mxu1 %v8562_v24  ;;  %6071 = vmatprep.mubr.f32.mxu0 %v8387_v8  ;;  %v8582_v8 = vld [vmem:[#allocation2 + $0xcc] sm:$0xff] }
 0x2aa   : > { %6315 = vmatmul.mubr.f32.gmra.mrb[34].mxu1 %v8566_v52  ;;  %6072 = vmatmul.mubr.f32.gmra.mrb[110].mxu0 %v8392_v28  ;;  %v8585_v28 = vld [vmem:[#allocation2 + $0xd4] sm:$0xff] }
 0x2ab   : > { %6317 = vmatprep.mubr.f32.mxu1 %v8569_v33  ;;  %6074 = vmatprep.mubr.f32.mxu0 %v8399_v31  ;;  %v8590_v31 = vld [vmem:[#allocation2 + $0xdc] sm:$0xff] }
 0x2ae   : > { %6318 = vmatmul.mubr.f32.gmra.mrb[0].mxu1 %v8574_v16  ;;  %6075 = vmatmul.mubr.f32.gmra.mrb[112].mxu0 %v8405_v63  ;;  %v8593_v63 = vld [vmem:[#allocation2 + $0xe4] sm:$0xff] }
 0x2af   : > { %6320 = vmatprep.mubr.f32.mxu1 %v8577_v29  ;;  %6077 = vmatprep.mubr.f32.mxu0 %v8410_v14  ;;  %v8598_v14 = vld [vmem:[#allocation2 + $0xec] sm:$0xff] }
 0x2b2   : > { %6321 = vmatmul.mubr.f32.gmra.mrb[2].mxu1 %v8582_v8  ;;  %6078 = vmatmul.mubr.f32.gmra.mrb[114].mxu0 %v8415_v42  ;;  %v8601_v42 = vld [vmem:[#allocation2 + $0xf4] sm:$0xff] }
 0x2b3   : > { %6323 = vmatprep.mubr.f32.mxu1 %v8585_v28  ;;  %6080 = vmatprep.mubr.f32.mxu0 %v8421_v51  ;;  %v8606_v51 = vld [vmem:[#allocation2 + $0xfc] sm:$0xff] }
 0x2b6   : > { %6324 = vmatmul.mubr.f32.gmra.mrb[4].mxu1 %v8590_v31  ;;  %6081 = vmatmul.mubr.f32.gmra.mrb[116].mxu0 %v8426_v27  ;;  %v8609_v27 = vld [vmem:[#allocation2 + $0x104] sm:$0xff] }
 0x2b7   : > { %6326 = vmatprep.mubr.f32.mxu1 %v8593_v63  ;;  %6115 = vmatprep.mubr.f32.mxu0 %v8435_v58  ;;  %v8614_v58 = vld [vmem:[#allocation2 + $0x10c] sm:$0xff] }
 0x2ba   : > { %6327 = vmatmul.mubr.f32.gmra.mrb[6].mxu1 %v8598_v14  ;;  %6116 = vmatmul.mubr.f32.vlgmr.msra.gmra.mrb[82].mxu0 %v8439_v13  ;;  %v8617_v13 = vld [vmem:[#allocation2 + $0x114] sm:$0xff] }
 0x2bb   : > { %6329 = vmatprep.mubr.f32.mxu1 %v8601_v42  ;;  %6118 = vmatprep.mubr.f32.mxu0 %v8443_v62  ;;  %v8622_v62 = vld [vmem:[#allocation2 + $0x11c] sm:$0xff] }
 0x2be   : > { %6330 = vmatmul.mubr.f32.gmra.mrb[8].mxu1 %v8606_v51  ;;  %6119 = vmatmul.mubr.f32.gmra.mrb[84].mxu0 %v8447_v6  ;;  %v8625_v6 = vld [vmem:[#allocation2 + $0x124] sm:$0xff] }
 0x2bf   : > { %6332 = vmatprep.mubr.f32.mxu1 %v8609_v27  ;;  %6121 = vmatprep.mubr.f32.mxu0 %v8451_v57  ;;  %v8630_v57 = vld [vmem:[#allocation2 + $0x12c] sm:$0xff] }
 0x2c2   : > { %6333 = vmatmul.mubr.f32.gmra.mrb[10].mxu1 %v8614_v58  ;;  %6122 = vmatmul.mubr.f32.gmra.mrb[86].mxu0 %v8455_v49  ;;  %v4106_v49 = vld [vmem:[#allocation11 + $0x398] sm:$0xff] }
 0x2c3   : > { %6335 = vmatprep.mubr.f32.mxu1 %v8617_v13  ;;  %6124 = vmatprep.mubr.f32.mxu0 %v8459_v61  ;;  %v6827_v61 = vpack.c.bf16 %v4106_v49, %v4105_v5  ;;  %v4083_v5 = vld [vmem:[#allocation2 + $0xad] sm:$0xff]  ;;  %v4084_v49 = vld [vmem:[#allocation2 + $0xb5] sm:$0xff] }
 0x2c6   : > { %6336 = vmatmul.mubr.f32.gmra.mrb[12].mxu1 %v8622_v62  ;;  %6125 = vmatmul.mubr.f32.gmra.mrb[88].mxu0 %v8462_v11  ;;  %v6831_v11 = vpack.c.bf16 %v4108_v1, %v4107_v46  ;;  %v4086_v46 = vld [vmem:[#allocation2 + $0xc5] sm:$0xff]  ;;  %v4087_v1 = vld [vmem:[#allocation2 + $0xcd] sm:$0xff] }
 0x2c7   : > { %6338 = vmatprep.mubr.f32.mxu1 %v8625_v6  ;;  %6127 = vmatprep.mubr.f32.mxu0 %v8467_v56  ;;  %v4109_v56 = vld [vmem:[#allocation11 + $0x3b0] sm:$0xff] }
 0x2ca   : > { %6339 = vmatmul.mubr.f32.gmra.mrb[14].mxu1 %v8630_v57  ;;  %6128 = vmatmul.mubr.f32.gmra.mrb[90].mxu0 %v8471_v47  ;;  %v4110_v47 = vld [vmem:[#allocation11 + $0x3b8] sm:$0xff] }
 0x2cb   : > { %6373 = vmatprep.mubr.f32.mxu1 %v8474_v15  ;;  %6130 = vmatprep.mubr.f32.mxu0 %v8479_v22  ;;  %v6835_v15 = vpack.c.bf16 %v4110_v47, %v4109_v56  ;;  %v4111_v22 = vld [vmem:[#allocation11 + $0x3c0] sm:$0xff]  ;;  %v4089_v56 = vld [vmem:[#allocation2 + $0xdd] sm:$0xff] }
 0x2cc   : > { %v4090_v47 = vld [vmem:[#allocation2 + $0xe5] sm:$0xff] }
 0x2ce   : > { %6374 = vmatmul.mubr.f32.vlgmr.msra.gmra.mrb[16].mxu1 %v8482_v37  ;;  %6131 = vmatmul.mubr.f32.gmra.mrb[92].mxu0 %v8484_v0  ;;  %v4112_v37 = vld [vmem:[#allocation11 + $0x3c8] sm:$0xff] }
 0x2cf   : > { %6826 = vmatpush3.bf16.msra.mxu1 %v8552_v60  ;;  %6376 = vmatprep.mubr.f32.mxu1 %v8488_v38  ;;  %v6839_v0 = vpack.c.bf16 %v4112_v37, %v4111_v22  ;;  %v4113_v38 = vld [vmem:[#allocation11 + $0x3d0] sm:$0xff]  ;;  %v4517_v60 = vld [vmem:[#allocation11 + $0x440] sm:$0xff] }
 0x2d0   : > { %6828 = vmatprep.subr.bf16.mxu1 %v6827_v61  ;;  %6133 = vmatprep.mubr.f32.mxu0 %v8492_v34  ;;  %v4114_v34 = vld [vmem:[#allocation11 + $0x3d8] sm:$0xff]  ;;  %v4092_v22 = vld [vmem:[#allocation2 + $0xf5] sm:$0xff] }
 0x2d1   : > { %v4093_v37 = vld [vmem:[#allocation2 + $0xfd] sm:$0xff] }
 0x2d2   : > { %6377 = vmatmul.mubr.f32.gmra.mrb[18].mxu1 %v8495_v40  ;;  %6134 = vmatmul.mubr.f32.gmra.mrb[94].mxu0 %v8499_v25  ;;  %v6843_v40 = vpack.c.bf16 %v4114_v34, %v4113_v38  ;;  %v4116_v25 = vld [vmem:[#allocation11 + $0x3e8] sm:$0xff] }
 0x2d3   : > { %6379 = vmatprep.mubr.f32.mxu1 %v8497_v26  ;;  %6830 = vmatpush3.bf16.msra.mxu1 %v6827_v61  ;;  %v4115_v26 = vld [vmem:[#allocation11 + $0x3e0] sm:$0xff]  ;;  %v4085_v61 = vld [vmem:[#allocation2 + $0xbd] sm:$0xff]  ;;  %v4096_v34 = vld [vmem:[#allocation2 + $0x115] sm:$0xff] }
 0x2d4   : > { %6136 = vmatprep.mubr.f32.mxu0 %v8504_v41  ;;  %6832 = vmatprep.subr.bf16.mxu1 %v6831_v11  ;;  %v6847_v41 = vpack.c.bf16 %v4116_v25, %v4115_v26  ;;  %v4095_v38 = vld [vmem:[#allocation2 + $0x10d] sm:$0xff]  ;;  %v4098_v26 = vld [vmem:[#allocation2 + $0x125] sm:$0xff] }
 0x2d5   : > { %v4099_v25 = vld [vmem:[#allocation2 + $0x12d] sm:$0xff] }
 0x2d6   : > { %6380 = vmatmul.mubr.f32.gmra.mrb[20].mxu1 %v8509_v43  ;;  %6137 = vmatmul.mubr.f32.gmra.mrb[96].mxu0 %v8513_v50  ;;  %v4117_v43 = vld [vmem:[#allocation11 + $0x3f0] sm:$0xff] }
 0x2d7   : > { %6382 = vmatprep.mubr.f32.mxu1 %v8511_v4  ;;  %6139 = vmatprep.mubr.f32.mxu0 %v8518_v45  ;;  %v4118_v4 = vld [vmem:[#allocation11 + $0x3f8] sm:$0xff]  ;;  %v4509_v45 = vld [vmem:[#allocation11 + $0x400] sm:$0xff] }
 0x2d8   : > { %6834 = vmatpush3.bf16.msra.mxu1 %v6831_v11  ;;  %v6851_v50 = vpack.c.bf16 %v4118_v4, %v4117_v43  ;;  %v4088_v11 = vld [vmem:[#allocation2 + $0xd5] sm:$0xff]  ;;  %v4101_v43 = vld [vmem:[#allocation2 + $0x13d] sm:$0xff]  ;;  %v4472_v4 = vld [vmem:[#allocation2 + $0x26] sm:$0xff] }
 0x2d9   : > { %6836 = vmatprep.subr.bf16.mxu1 %v6835_v15 }
 0x2da   : > { %6383 = vmatmul.mubr.f32.gmra.mrb[22].mxu1 %v8523_v30  ;;  %6140 = vmatmul.mubr.f32.gmra.mrb[98].mxu0 %v8527_v54  ;;  %v4510_v30 = vld [vmem:[#allocation11 + $0x408] sm:$0xff] }
 0x2db   : > { %6385 = vmatprep.mubr.f32.mxu1 %v8525_v55  ;;  %6142 = vmatprep.mubr.f32.mxu0 %v8531_v2  ;;  %v6855_v55 = vpack.c.bf16 %v4510_v30, %v4509_v45  ;;  %v3694_v54 = vld [vmem:[#allocation2 + $0x134] sm:$0xff]  ;;  %v3695_v2 = vld [vmem:[#allocation2 + $0x13c] sm:$0xff] }
 0x2dc   : > { %6838 = vmatpush3.bf16.msra.mxu1 %v6835_v15  ;;  %v4091_v15 = vld [vmem:[#allocation2 + $0xed] sm:$0xff]  ;;  %v4474_v45 = vld [vmem:[#allocation2 + $0x36] sm:$0xff]  ;;  %v4475_v30 = vld [vmem:[#allocation2 + $0x3e] sm:$0xff] }
 0x2dd   : > { %6840 = vmatprep.subr.bf16.mxu1 %v6839_v0 }
 0x2de   : > { %6386 = vmatmul.mubr.f32.gmra.mrb[24].mxu1 %v8535_v44  ;;  %6143 = vmatmul.mubr.f32.gmra.mrb[100].mxu0 %v8539_v35  ;;  %v4511_v44 = vld [vmem:[#allocation11 + $0x410] sm:$0xff]  ;;  %v4066_v35 = vld [vmem:[#allocation2 + $0x25] sm:$0xff] }
 0x2df   : > { %6388 = vmatprep.mubr.f32.mxu1 %v8537_v53  ;;  %v4512_v53 = vld [vmem:[#allocation11 + $0x418] sm:$0xff] }
 0x2e0   : > { %6842 = vmatpush3.bf16.msra.mxu1 %v6839_v0  ;;  %v6859_v3 = vpack.c.bf16 %v4512_v53, %v4511_v44  ;;  %v4094_v0 = vld [vmem:[#allocation2 + $0x105] sm:$0xff] }
 0x2e1   : > { %6844 = vmatprep.subr.bf16.mxu1 %v6843_v40  ;;  %v4479_v44 = vld [vmem:[#allocation2 + $0x5e] sm:$0xff]  ;;  %v4480_v53 = vld [vmem:[#allocation2 + $0x66] sm:$0xff] }
 0x2e2   : > { %6389 = vmatmul.mubr.f32.gmra.mrb[26].mxu1 %v8544_v39  ;;  %v4514_v39 = vld [vmem:[#allocation11 + $0x428] sm:$0xff] }
 0x2e3   : > { %6391 = vmatprep.mubr.f32.mxu1 %v8546_v12  ;;  %v4068_v12 = vld [vmem:[#allocation2 + $0x35] sm:$0xff]  ;;  %v6863_v20 = vpack.c.bf16 %v4514_v39, %v4513_v7  ;;  %v4483_v39 = vld [vmem:[#allocation2 + $0x7e] sm:$0xff] }
 0x2e4   : > { %6846 = vmatpush3.bf16.msra.mxu1 %v6843_v40  ;;  %v4097_v40 = vld [vmem:[#allocation2 + $0x11d] sm:$0xff] }
 0x2e5   : > { %6848 = vmatprep.subr.bf16.mxu1 %v6847_v41 }
 0x2e6   : > { %6392 = vmatmul.mubr.f32.gmra.mrb[28].mxu1 %v8550_v19  ;;  %v6867_v19 = vpack.c.bf16 %v4516_v10, %v4515_v36  ;;  %v4485_v36 = vld [vmem:[#allocation2 + $0x8e] sm:$0xff] }
 0x2e7   : > { %6394 = vmatprep.mubr.f32.mxu1 %v8555_v18  ;;  %v4518_v18 = vld [vmem:[#allocation11 + $0x448] sm:$0xff] }
 0x2e8   : > { %6850 = vmatpush3.bf16.msra.mxu1 %v6847_v41  ;;  %v4100_v41 = vld [vmem:[#allocation2 + $0x135] sm:$0xff] }
 0x2e9   : > { %6852 = vmatprep.subr.bf16.mxu1 %v6851_v50 }
 0x2ea   : > { %6395 = vmatmul.mubr.f32.gmra.mrb[30].mxu1 %v8558_v32  ;;  %v6871_v32 = vpack.c.bf16 %v4518_v18, %v4517_v60  ;;  %v4488_v18 = vld [vmem:[#allocation2 + $0xa6] sm:$0xff] }
 0x2eb   : > { %6397 = vmatprep.mubr.f32.mxu1 %v8562_v24  ;;  %v4519_v24 = vld [vmem:[#allocation11 + $0x450] sm:$0xff] }
 0x2ec   : > { %6854 = vmatpush3.bf16.msra.mxu1 %v6851_v50  ;;  %v4473_v50 = vld [vmem:[#allocation2 + $0x2e] sm:$0xff] }
 0x2ed   : > { %6856 = vmatprep.subr.bf16.mxu1 %v6855_v55 }
 0x2ee   : > { %6398 = vmatmul.mubr.f32.gmra.mrb[32].mxu1 %v8566_v52  ;;  %v4520_v52 = vld [vmem:[#allocation11 + $0x458] sm:$0xff] }
 0x2ef   : > { %6400 = vmatprep.mubr.f32.mxu1 %v8569_v33  ;;  %v4074_v33 = vld [vmem:[#allocation2 + $0x65] sm:$0xff] }
 0x2f2   : > { %6401 = vmatmul.mubr.f32.gmra.mrb[34].mxu1 %v8574_v16  ;;  %v6875_v16 = vpack.c.bf16 %v4520_v52, %v4519_v24  ;;  %v4490_v24 = vld [vmem:[#allocation2 + $0xb6] sm:$0xff] }
 0x2f3   : > { %6403 = vmatprep.mubr.f32.mxu1 %v8577_v29  ;;  %v4075_v29 = vld [vmem:[#allocation2 + $0x6d] sm:$0xff] }
 0x2f6   : > { %6404 = vmatmul.mubr.f32.gmra.mrb[0].mxu1 %v8582_v8  ;;  %v4521_v8 = vld [vmem:[#allocation11 + $0x460] sm:$0xff] }
 0x2f7   : > { %6406 = vmatprep.mubr.f32.mxu1 %v8585_v28  ;;  %v4522_v28 = vld [vmem:[#allocation11 + $0x468] sm:$0xff] }
 0x2fa   : > { %6407 = vmatmul.mubr.f32.gmra.mrb[2].mxu1 %v8590_v31  ;;  %v4076_v31 = vld [vmem:[#allocation2 + $0x75] sm:$0xff] }
 0x2fb   : > { %6409 = vmatprep.mubr.f32.mxu1 %v8593_v63  ;;  %v6879_v63 = vpack.c.bf16 %v4522_v28, %v4521_v8  ;;  %v4493_v28 = vld [vmem:[#allocation2 + $0xce] sm:$0xff] }
 0x2fe   : > { %6410 = vmatmul.mubr.f32.gmra.mrb[4].mxu1 %v8598_v14  ;;  %v4077_v14 = vld [vmem:[#allocation2 + $0x7d] sm:$0xff] }
 0x2ff   : > { %6412 = vmatprep.mubr.f32.mxu1 %v8601_v42  ;;  %v4523_v42 = vld [vmem:[#allocation11 + $0x470] sm:$0xff] }
 0x302   : > { %6413 = vmatmul.mubr.f32.gmra.mrb[6].mxu1 %v8606_v51  ;;  %v4524_v51 = vld [vmem:[#allocation11 + $0x478] sm:$0xff] }
 0x303   : > { %6415 = vmatprep.mubr.f32.mxu1 %v8609_v27  ;;  %v4078_v27 = vld [vmem:[#allocation2 + $0x85] sm:$0xff] }
 0x306   : > { %6416 = vmatmul.mubr.f32.gmra.mrb[8].mxu1 %v8614_v58  ;;  %v6883_v58 = vpack.c.bf16 %v4524_v51, %v4523_v42  ;;  %v4495_v42 = vld [vmem:[#allocation2 + $0xde] sm:$0xff] }
 0x307   : > { %6418 = vmatprep.mubr.f32.mxu1 %v8617_v13  ;;  %v4079_v13 = vld [vmem:[#allocation2 + $0x8d] sm:$0xff] }
 0x30a   : > { %6419 = vmatmul.mubr.f32.gmra.mrb[10].mxu1 %v8622_v62  ;;  %v4080_v62 = vld [vmem:[#allocation2 + $0x95] sm:$0xff] }
 0x30b   : > { %6421 = vmatprep.mubr.f32.mxu1 %v8625_v6  ;;  %v4081_v6 = vld [vmem:[#allocation2 + $0x9d] sm:$0xff] }
 0x30e   : > { %6422 = vmatmul.mubr.f32.gmra.mrb[12].mxu1 %v8630_v57  ;;  %v4082_v57 = vld [vmem:[#allocation2 + $0xa5] sm:$0xff] }
 0x30f   : > { %6424 = vmatprep.mubr.f32.mxu1 %v3694_v54  ;;  %v4477_v54 = vld [vmem:[#allocation2 + $0x4e] sm:$0xff] }
 0x312   : > { %6425 = vmatmul.mubr.f32.gmra.mrb[14].mxu1 %v3695_v2  ;;  %v4478_v2 = vld [vmem:[#allocation2 + $0x56] sm:$0xff] }
 0x313   : > { %6459 = vmatprep.mubr.f32.mxu1 %v4066_v35  ;;  %v4481_v35 = vld [vmem:[#allocation2 + $0x6e] sm:$0xff] }
 0x316   : > { %6460 = vmatmul.mubr.f32.vlgmr.msra.gmra.mrb[16].mxu1 %v4067_v48  ;;  %v4482_v48 = vld [vmem:[#allocation2 + $0x76] sm:$0xff] }
 0x317   : > { %6858 = vmatpush3.bf16.msra.mxu1 %v6855_v55  ;;  %6462 = vmatprep.mubr.f32.mxu1 %v4068_v12  ;;  %v4476_v55 = vld [vmem:[#allocation2 + $0x46] sm:$0xff] }
 0x318   : > { %6860 = vmatprep.subr.bf16.mxu1 %v6859_v3 }
 0x31a   : > { %6463 = vmatmul.mubr.f32.gmra.mrb[18].mxu1 %v4069_v9 }
 0x31b   : > { %6465 = vmatprep.mubr.f32.mxu1 %v4070_v17  ;;  %6862 = vmatpush3.bf16.msra.mxu1 %v6859_v3  ;;  %v4486_v17 = vld [vmem:[#allocation2 + $0x96] sm:$0xff] }
 0x31c   : > { %6864 = vmatprep.subr.bf16.mxu1 %v6863_v20 }
 0x31e   : > { %6466 = vmatmul.mubr.f32.gmra.mrb[20].mxu1 %v4071_v21  ;;  %v4487_v21 = vld [vmem:[#allocation2 + $0x9e] sm:$0xff] }
 0x31f   : > { %6468 = vmatprep.mubr.f32.mxu1 %v4072_v23  ;;  %6866 = vmatpush3.bf16.msra.mxu1 %v6863_v20  ;;  %v4484_v20 = vld [vmem:[#allocation2 + $0x86] sm:$0xff] }
 0x320   : > { %6868 = vmatprep.subr.bf16.mxu1 %v6867_v19 }
 0x322   : > { %6469 = vmatmul.mubr.f32.gmra.mrb[22].mxu1 %v4073_v59 }
 0x323   : > { %6471 = vmatprep.mubr.f32.mxu1 %v4074_v33  ;;  %6870 = vmatpush3.bf16.msra.mxu1 %v6867_v19  ;;  %v4491_v33 = vld [vmem:[#allocation2 + $0xbe] sm:$0xff] }
 0x324   : > { %6872 = vmatprep.subr.bf16.mxu1 %v6871_v32 }
 0x326   : > { %6472 = vmatmul.mubr.f32.gmra.mrb[24].mxu1 %v4075_v29  ;;  %v4492_v29 = vld [vmem:[#allocation2 + $0xc6] sm:$0xff] }
 0x327   : > { %6474 = vmatprep.mubr.f32.mxu1 %v4076_v31  ;;  %6874 = vmatpush3.bf16.msra.mxu1 %v6871_v32  ;;  %v4489_v32 = vld [vmem:[#allocation2 + $0xae] sm:$0xff] }
 0x328   : > { %6876 = vmatprep.subr.bf16.mxu1 %v6875_v16 }
 0x32a   : > { %6475 = vmatmul.mubr.f32.gmra.mrb[26].mxu1 %v4077_v14 }
 0x32b   : > { %6477 = vmatprep.mubr.f32.mxu1 %v4078_v27  ;;  %6878 = vmatpush3.bf16.msra.mxu1 %v6875_v16  ;;  %v4496_v27 = vld [vmem:[#allocation2 + $0xe6] sm:$0xff] }
 0x32c   : > { %6880 = vmatprep.subr.bf16.mxu1 %v6879_v63 }
 0x32e   : > { %6478 = vmatmul.mubr.f32.gmra.mrb[28].mxu1 %v4079_v13  ;;  %v4497_v13 = vld [vmem:[#allocation2 + $0xee] sm:$0xff] }
 0x32f   : > { %6480 = vmatprep.mubr.f32.mxu1 %v4080_v62  ;;  %6882 = vmatpush3.bf16.msra.mxu1 %v6879_v63  ;;  %v4494_v63 = vld [vmem:[#allocation2 + $0xd6] sm:$0xff] }
 0x330   : > { %6884 = vmatprep.subr.bf16.mxu1 %v6883_v58 }
 0x332   : > { %6481 = vmatmul.mubr.f32.gmra.mrb[30].mxu1 %v4081_v6  ;;  %v4498_v6 = vld [vmem:[#allocation2 + $0xf6] sm:$0xff] }
 0x333   : > { %6483 = vmatprep.mubr.f32.mxu1 %v4082_v57  ;;  %6886 = vmatpush3.bf16.msra.mxu1 %v6883_v58 }
 0x336   : > { %6484 = vmatmul.mubr.f32.gmra.mrb[32].mxu1 %v4083_v5  ;;  %v4499_v5 = vld [vmem:[#allocation2 + $0xfe] sm:$0xff] }
 0x337   : > { %6486 = vmatprep.mubr.f32.mxu1 %v4084_v49 }
 0x33a   : > { %6487 = vmatmul.mubr.f32.gmra.mrb[34].mxu1 %v4085_v61  ;;  %v4500_v61 = vld [vmem:[#allocation2 + $0x106] sm:$0xff] }
 0x33b   : > { %6489 = vmatprep.mubr.f32.mxu1 %v4086_v46 }
 0x33e   : > { %6490 = vmatmul.mubr.f32.gmra.mrb[0].mxu1 %v4087_v1  ;;  %v4501_v1 = vld [vmem:[#allocation2 + $0x10e] sm:$0xff] }
 0x33f   : > { %6492 = vmatprep.mubr.f32.mxu1 %v4088_v11 }
 0x342   : > { %6493 = vmatmul.mubr.f32.gmra.mrb[2].mxu1 %v4089_v56  ;;  %v4502_v56 = vld [vmem:[#allocation2 + $0x116] sm:$0xff] }
 0x343   : > { %6495 = vmatprep.mubr.f32.mxu1 %v4090_v47 }
 0x346   : > { %6496 = vmatmul.mubr.f32.gmra.mrb[4].mxu1 %v4091_v15  ;;  %v4503_v15 = vld [vmem:[#allocation2 + $0x11e] sm:$0xff] }
 0x347   : > { %6498 = vmatprep.mubr.f32.mxu1 %v4092_v22 }
 0x34a   : > { %6499 = vmatmul.mubr.f32.gmra.mrb[6].mxu1 %v4093_v37  ;;  %v4504_v37 = vld [vmem:[#allocation2 + $0x126] sm:$0xff] }
 0x34b   : > { %6501 = vmatprep.mubr.f32.mxu1 %v4094_v0 }
 0x34e   : > { %6502 = vmatmul.mubr.f32.gmra.mrb[8].mxu1 %v4095_v38  ;;  %v4505_v38 = vld [vmem:[#allocation2 + $0x12e] sm:$0xff] }
 0x34f   : > { %6504 = vmatprep.mubr.f32.mxu1 %v4096_v34 }
 0x352   : > { %6505 = vmatmul.mubr.f32.gmra.mrb[10].mxu1 %v4097_v40  ;;  %v4506_v40 = vld [vmem:[#allocation2 + $0x136] sm:$0xff] }
 0x353   : > { %6507 = vmatprep.mubr.f32.mxu1 %v4098_v26 }
 0x356   : > { %6508 = vmatmul.mubr.f32.gmra.mrb[12].mxu1 %v4099_v25  ;;  %v4507_v25 = vld [vmem:[#allocation2 + $0x13e] sm:$0xff] }
 0x357   : > { %6510 = vmatprep.mubr.f32.mxu1 %v4100_v41 }
 0x35a   : > { %6511 = vmatmul.mubr.f32.gmra.mrb[14].mxu1 %v4101_v43 }
 0x35b   : > { %6545 = vmatprep.mubr.f32.mxu1 %v4472_v4 }
 0x35e   : > { %6546 = vmatmul.mubr.f32.vlgmr.msra.gmra.mrb[16].mxu1 %v4473_v50 }
 0x35f   : > { %6548 = vmatprep.mubr.f32.mxu1 %v4474_v45 }
 0x362   : > { %6549 = vmatmul.mubr.f32.gmra.mrb[18].mxu1 %v4475_v30 }
 0x363   : > { %6551 = vmatprep.mubr.f32.mxu1 %v4476_v55 }
 0x366   : > { %6552 = vmatmul.mubr.f32.gmra.mrb[20].mxu1 %v4477_v54 }
 0x367   : > { %6554 = vmatprep.mubr.f32.mxu1 %v4478_v2 }
 0x36a   : > { %6555 = vmatmul.mubr.f32.gmra.mrb[22].mxu1 %v4479_v44 }
 0x36b   : > { %6557 = vmatprep.mubr.f32.mxu1 %v4480_v53 }
 0x36d   : > { %v8679_v3 = vpop.f32.mrb[102].mxu0 }
 0x36e   : > { %6558 = vmatmul.mubr.f32.gmra.mrb[24].mxu1 %v4481_v35  ;;  %v8681_v7 = vpop.f32.mrb[103].mxu0  ;;  %v8730_v35 = vld [vmem:[#allocation12] ss:$0 sm:$0xff] }
 0x36f   : > { %6560 = vmatprep.mubr.f32.mxu1 %v4482_v48 }
 0x371   : > { %v8683_v12 = vpop.f32.mrb[104].mxu0 }
 0x372   : > { %6561 = vmatmul.mubr.f32.gmra.mrb[26].mxu1 %v4483_v39  ;;  %v8685_v9 = vpop.f32.mrb[105].mxu0 }
 0x373   : > { %6563 = vmatprep.mubr.f32.mxu1 %v4484_v20 }
 0x375   : > { %v8687_v10 = vpop.f32.mrb[106].mxu0 }
 0x376   : > { %6564 = vmatmul.mubr.f32.gmra.mrb[28].mxu1 %v4485_v36  ;;  %v8689_v19 = vpop.f32.mrb[107].mxu0 }
 0x377   : > { %6566 = vmatprep.mubr.f32.mxu1 %v4486_v17 }
 0x379   : > { %v8691_v60 = vpop.f32.mrb[108].mxu0 }
 0x37a   : > { %6567 = vmatmul.mubr.f32.gmra.mrb[30].mxu1 %v4487_v21  ;;  %v8693_v23 = vpop.f32.mrb[109].mxu0 }
 0x37b   : > { %6569 = vmatprep.mubr.f32.mxu1 %v4488_v18 }
 0x37d   : > { %v8695_v59 = vpop.f32.mrb[110].mxu0 }
 0x37e   : > { %6570 = vmatmul.mubr.f32.gmra.mrb[32].mxu1 %v4489_v32  ;;  %v8697_v52 = vpop.f32.mrb[111].mxu0 }
 0x37f   : > { %6572 = vmatprep.mubr.f32.mxu1 %v4490_v24 }
 0x381   : > { %v8699_v16 = vpop.f32.mrb[112].mxu0 }
 0x382   : > { %6573 = vmatmul.mubr.f32.gmra.mrb[34].mxu1 %v4491_v33  ;;  %v8701_v8 = vpop.f32.mrb[113].mxu0 }
 0x383   : > { %6575 = vmatprep.mubr.f32.mxu1 %v4492_v29 }
 0x385   : > { %v8703_v31 = vpop.f32.mrb[114].mxu0 }
 0x386   : > { %6576 = vmatmul.mubr.f32.gmra.mrb[0].mxu1 %v4493_v28  ;;  %v8705_v14 = vpop.f32.mrb[115].mxu0 }
 0x387   : > { %6578 = vmatprep.mubr.f32.mxu1 %v4494_v63 }
 0x389   : > { %v8707_v51 = vpop.f32.mrb[116].mxu0 }
 0x38a   : > { %6579 = vmatmul.mubr.f32.gmra.mrb[2].mxu1 %v4495_v42  ;;  %v8709_v58 = vpop.f32.mrb[117].mxu0 }
 0x38b   : > { %6581 = vmatprep.mubr.f32.mxu1 %v4496_v27 }
 0x38d   : > { %v6117_v62 = vpop.f32.mrb[82].mxu0 }
 0x38e   : > { %6582 = vmatmul.mubr.f32.gmra.mrb[4].mxu1 %v4497_v13  ;;  %v2561_v57 = vpop.f32.mrb[83].mxu0 }
 0x38f   : > { %6584 = vmatprep.mubr.f32.mxu1 %v4498_v6 }
 0x391   : > { %v6120_v49 = vpop.f32.mrb[84].mxu0 }
 0x392   : > { %6585 = vmatmul.mubr.f32.gmra.mrb[6].mxu1 %v4499_v5  ;;  %v2571_v46 = vpop.f32.mrb[85].mxu0 }
 0x393   : > { %6587 = vmatprep.mubr.f32.mxu1 %v4500_v61 }
 0x395   : > { %v6123_v11 = vpop.f32.mrb[86].mxu0 }
 0x396   : > { %6588 = vmatmul.mubr.f32.gmra.mrb[8].mxu1 %v4501_v1  ;;  %v2581_v47 = vpop.f32.mrb[87].mxu0 }
 0x397   : > { %6590 = vmatprep.mubr.f32.mxu1 %v4502_v56 }
 0x399   : > { %v6126_v22 = vpop.f32.mrb[88].mxu0 }
 0x39a   : > { %6591 = vmatmul.mubr.f32.gmra.mrb[10].mxu1 %v4503_v15  ;;  %v2591_v0 = vpop.f32.mrb[89].mxu0 }
 0x39b   : > { %6593 = vmatprep.mubr.f32.mxu1 %v4504_v37 }
 0x39d   : > { %v6129_v34 = vpop.f32.mrb[90].mxu0 }
 0x39e   : > { %6594 = vmatmul.mubr.f32.gmra.mrb[12].mxu1 %v4505_v38  ;;  %v2601_v26 = vpop.f32.mrb[91].mxu0 }
 0x39f   : > { %6596 = vmatprep.mubr.f32.mxu1 %v4506_v40 }
 0x3a1   : > { %v6132_v41 = vpop.f32.mrb[92].mxu0 }
 0x3a2   : > { %6597 = vmatmul.mubr.f32.gmra.mrb[14].mxu1 %v4507_v25  ;;  %v8711_v43 = vpop.f32.mrb[93].mxu0 }
 0x3a5   : > { %v8713_v4 = vpop.f32.mrb[94].mxu0 }
 0x3a6   : > { %v8715_v50 = vpop.f32.mrb[95].mxu0 }
 0x3a9   : > { %v8717_v45 = vpop.f32.mrb[96].mxu0 }
 0x3aa   : > { %v8719_v30 = vpop.f32.mrb[97].mxu0 }
 0x3ad   : > { %v8721_v55 = vpop.f32.mrb[98].mxu0 }
 0x3ae   : > { %v8723_v54 = vpop.f32.mrb[99].mxu0 }
 0x3b1   : > { %v8725_v2 = vpop.f32.mrb[100].mxu0 }
 0x3b2   : > { %v8727_v44 = vpop.f32.mrb[101].mxu0 }
 0x431   : > { %v6547_v53 = vpop.f32.mrb[16].mxu1 }
 0x432   : > { %v6908_v48 = vadd.f32 %v6547_v53, %v6117_v62  ;;  %v4591_v39 = vpop.f32.mrb[17].mxu1 }
 0x433   : > { %v6914_v20 = vadd.f32 %v4591_v39, %v2561_v57 }
 0x434   : > { %v4886_v36 = vadd.f32 %v6908_v48, %v8730_v35 }
 0x435   : > { %v4885_v17 = vadd.f32 %v6914_v20, %v8730_v35  ;;  %v6550_v21 = vpop.f32.mrb[18].mxu1 }
 0x436   : > { %v4922_v18 = vmax.f32 %v4886_v36, 0.0  ;;  %v6920_v32 = vadd.f32 %v6550_v21, %v6120_v49  ;;  %v4601_v24 = vpop.f32.mrb[19].mxu1 }
 0x437   : > { %v4921_v33 = vmax.f32 %v4885_v17, 0.0  ;;  %v6926_v29 = vadd.f32 %v4601_v24, %v2571_v46 }
 0x438   : > { %4958 = vst [vmem:[%s8734_s25 + $0x8] sm:$0xff] %v4922_v18  ;;  %v4888_v28 = vadd.f32 %v6920_v32, %v8730_v35 }
 0x439   : > { %4957 = vst [vmem:[%s8734_s25] sm:$0xff] %v4921_v33  ;;  %v4887_v63 = vadd.f32 %v6926_v29, %v8730_v35  ;;  %v6553_v42 = vpop.f32.mrb[20].mxu1 }
 0x43a   : > { %v4924_v27 = vmax.f32 %v4888_v28, 0.0  ;;  %v6932_v13 = vadd.f32 %v6553_v42, %v6123_v11  ;;  %v4611_v62 = vpop.f32.mrb[21].mxu1 }
 0x43b   : > { %v4923_v6 = vmax.f32 %v4887_v63, 0.0  ;;  %v6938_v57 = vadd.f32 %v4611_v62, %v2581_v47 }
 0x43c   : > { %4960 = vst [vmem:[%s8734_s25 + $0x18] sm:$0xff] %v4924_v27  ;;  %v4890_v5 = vadd.f32 %v6932_v13, %v8730_v35 }
 0x43d   : > { %4959 = vst [vmem:[%s8734_s25 + $0x10] sm:$0xff] %v4923_v6  ;;  %v4889_v49 = vadd.f32 %v6938_v57, %v8730_v35  ;;  %v6556_v61 = vpop.f32.mrb[22].mxu1 }
 0x43e   : > { %v4926_v46 = vmax.f32 %v4890_v5, 0.0  ;;  %v6944_v1 = vadd.f32 %v6556_v61, %v6126_v22  ;;  %v4621_v56 = vpop.f32.mrb[23].mxu1 }
 0x43f   : > { %v4925_v15 = vmax.f32 %v4889_v49, 0.0  ;;  %v6950_v37 = vadd.f32 %v4621_v56, %v2591_v0 }
 0x440   : > { %4962 = vst [vmem:[%s8734_s25 + $0x28] sm:$0xff] %v4926_v46  ;;  %v4892_v11 = vadd.f32 %v6944_v1, %v8730_v35 }
 0x441   : > { %4961 = vst [vmem:[%s8734_s25 + $0x20] sm:$0xff] %v4925_v15  ;;  %v4891_v47 = vadd.f32 %v6950_v37, %v8730_v35  ;;  %v6559_v38 = vpop.f32.mrb[24].mxu1 }
 0x442   : > { %v4928_v40 = vmax.f32 %v4892_v11, 0.0  ;;  %v6956_v25 = vadd.f32 %v6559_v38, %v6129_v34  ;;  %v4631_v53 = vpop.f32.mrb[25].mxu1 }
 0x443   : > { %v4927_v48 = vmax.f32 %v4891_v47, 0.0  ;;  %v6962_v39 = vadd.f32 %v4631_v53, %v2601_v26 }
 0x444   : > { %4964 = vst [vmem:[%s8734_s25 + $0x38] sm:$0xff] %v4928_v40  ;;  %v4894_v22 = vadd.f32 %v6956_v25, %v8730_v35 }
 0x445   : > { %4963 = vst [vmem:[%s8734_s25 + $0x30] sm:$0xff] %v4927_v48  ;;  %v4893_v0 = vadd.f32 %v6962_v39, %v8730_v35  ;;  %v6562_v20 = vpop.f32.mrb[26].mxu1 }
 0x446   : > { %v4930_v36 = vmax.f32 %v4894_v22, 0.0  ;;  %v6968_v17 = vadd.f32 %v6562_v20, %v6132_v41  ;;  %v4641_v21 = vpop.f32.mrb[27].mxu1 }
 0x447   : > { %v4929_v18 = vmax.f32 %v4893_v0, 0.0  ;;  %v6974_v32 = vadd.f32 %v4641_v21, %v8711_v43 }
 0x448   : > { %4966 = vst [vmem:[%s8734_s25 + $0x48] sm:$0xff] %v4930_v36  ;;  %v4896_v34 = vadd.f32 %v6968_v17, %v8730_v35 }
 0x449   : > { %4965 = vst [vmem:[%s8734_s25 + $0x40] sm:$0xff] %v4929_v18  ;;  %v4895_v26 = vadd.f32 %v6974_v32, %v8730_v35  ;;  %v6565_v24 = vpop.f32.mrb[28].mxu1 }
 0x44a   : > { %v4932_v33 = vmax.f32 %v4896_v34, 0.0  ;;  %v6980_v29 = vadd.f32 %v6565_v24, %v8713_v4  ;;  %v4651_v28 = vpop.f32.mrb[29].mxu1 }
 0x44b   : > { %v4931_v63 = vmax.f32 %v4895_v26, 0.0  ;;  %v6986_v41 = vadd.f32 %v4651_v28, %v8715_v50 }
 0x44c   : > { %4968 = vst [vmem:[%s8734_s25 + $0x58] sm:$0xff] %v4932_v33  ;;  %v4898_v42 = vadd.f32 %v6980_v29, %v8730_v35 }
 0x44d   : > { %4967 = vst [vmem:[%s8734_s25 + $0x50] sm:$0xff] %v4931_v63  ;;  %v4897_v43 = vadd.f32 %v6986_v41, %v8730_v35  ;;  %v6568_v27 = vpop.f32.mrb[30].mxu1 }
 0x44e   : > { %v4934_v13 = vmax.f32 %v4898_v42, 0.0  ;;  %v6992_v62 = vadd.f32 %v6568_v27, %v8717_v45  ;;  %v4661_v6 = vpop.f32.mrb[31].mxu1 }
 0x44f   : > { %v4933_v57 = vmax.f32 %v4897_v43, 0.0  ;;  %v6998_v4 = vadd.f32 %v4661_v6, %v8719_v30 }
 0x450   : > { %4970 = vst [vmem:[%s8734_s25 + $0x68] sm:$0xff] %v4934_v13  ;;  %v4900_v5 = vadd.f32 %v6992_v62, %v8730_v35 }
 0x451   : > { %4969 = vst [vmem:[%s8734_s25 + $0x60] sm:$0xff] %v4933_v57  ;;  %v4899_v50 = vadd.f32 %v6998_v4, %v8730_v35  ;;  %v6571_v49 = vpop.f32.mrb[32].mxu1 }
 0x452   : > { %v4936_v61 = vmax.f32 %v4900_v5, 0.0  ;;  %v7004_v46 = vadd.f32 %v6571_v49, %v8721_v55  ;;  %v4671_v1 = vpop.f32.mrb[33].mxu1 }
 0x453   : > { %v4935_v56 = vmax.f32 %v4899_v50, 0.0  ;;  %v7010_v45 = vadd.f32 %v4671_v1, %v8723_v54 }
 0x454   : > { %4972 = vst [vmem:[%s8734_s25 + $0x78] sm:$0xff] %v4936_v61  ;;  %v4902_v15 = vadd.f32 %v7004_v46, %v8730_v35 }
 0x455   : > { %4971 = vst [vmem:[%s8734_s25 + $0x70] sm:$0xff] %v4935_v56  ;;  %v4901_v30 = vadd.f32 %v7010_v45, %v8730_v35  ;;  %v6574_v37 = vpop.f32.mrb[34].mxu1 }
 0x456   : > { %v4938_v11 = vmax.f32 %v4902_v15, 0.0  ;;  %v7016_v47 = vadd.f32 %v6574_v37, %v8725_v2  ;;  %v4681_v38 = vpop.f32.mrb[35].mxu1 }
 0x457   : > { %v4937_v40 = vmax.f32 %v4901_v30, 0.0  ;;  %v7022_v55 = vadd.f32 %v4681_v38, %v8727_v44 }
 0x458   : > { %4974 = vst [vmem:[%s8734_s25 + $0x88] sm:$0xff] %v4938_v11  ;;  %v4904_v25 = vadd.f32 %v7016_v47, %v8730_v35 }
 0x459   : > { %4973 = vst [vmem:[%s8734_s25 + $0x80] sm:$0xff] %v4937_v40  ;;  %v4903_v54 = vadd.f32 %v7022_v55, %v8730_v35  ;;  %v6577_v53 = vpop.f32.mrb[0].mxu1 }
 0x45a   : > { %v4940_v48 = vmax.f32 %v4904_v25, 0.0  ;;  %v7028_v39 = vadd.f32 %v6577_v53, %v8679_v3  ;;  %v4691_v22 = vpop.f32.mrb[1].mxu1 }
 0x45b   : > { %v4939_v0 = vmax.f32 %v4903_v54, 0.0  ;;  %v7034_v2 = vadd.f32 %v4691_v22, %v8681_v7 }
 0x45c   : > { %4976 = vst [vmem:[%s8734_s25 + $0x98] sm:$0xff] %v4940_v48  ;;  %v4906_v20 = vadd.f32 %v7028_v39, %v8730_v35 }
 0x45d   : > { %4975 = vst [vmem:[%s8734_s25 + $0x90] sm:$0xff] %v4939_v0  ;;  %v4905_v44 = vadd.f32 %v7034_v2, %v8730_v35  ;;  %v6580_v36 = vpop.f32.mrb[2].mxu1 }
 0x45e   : > { %v4942_v17 = vmax.f32 %v4906_v20, 0.0  ;;  %v7040_v21 = vadd.f32 %v6580_v36, %v8683_v12  ;;  %v4701_v18 = vpop.f32.mrb[3].mxu1 }
 0x45f   : > { %v4941_v32 = vmax.f32 %v4905_v44, 0.0  ;;  %v7046_v3 = vadd.f32 %v4701_v18, %v8685_v9 }
 0x460   : > { %4978 = vst [vmem:[%s8734_s25 + $0xa8] sm:$0xff] %v4942_v17  ;;  %v4908_v34 = vadd.f32 %v7040_v21, %v8730_v35 }
 0x461   : > { %4977 = vst [vmem:[%s8734_s25 + $0xa0] sm:$0xff] %v4941_v32  ;;  %v4907_v7 = vadd.f32 %v7046_v3, %v8730_v35  ;;  %v6583_v26 = vpop.f32.mrb[4].mxu1 }
 0x462   : > { %v4944_v24 = vmax.f32 %v4908_v34, 0.0  ;;  %v7052_v33 = vadd.f32 %v6583_v26, %v8687_v10  ;;  %v4711_v29 = vpop.f32.mrb[5].mxu1 }
 0x463   : > { %v4943_v28 = vmax.f32 %v4907_v7, 0.0  ;;  %v7058_v12 = vadd.f32 %v4711_v29, %v8689_v19 }
 0x464   : > { %4980 = vst [vmem:[%s8734_s25 + $0xb8] sm:$0xff] %v4944_v24  ;;  %v4910_v63 = vadd.f32 %v7052_v33, %v8730_v35 }
 0x465   : > { %4979 = vst [vmem:[%s8734_s25 + $0xb0] sm:$0xff] %v4943_v28  ;;  %v4909_v9 = vadd.f32 %v7058_v12, %v8730_v35  ;;  %v6586_v41 = vpop.f32.mrb[6].mxu1 }
 0x466   : > { %v4946_v42 = vmax.f32 %v4910_v63, 0.0  ;;  %v7064_v43 = vadd.f32 %v6586_v41, %v8691_v60  ;;  %v4721_v27 = vpop.f32.mrb[7].mxu1 }
 0x467   : > { %v4945_v13 = vmax.f32 %v4909_v9, 0.0  ;;  %v7070_v10 = vadd.f32 %v4721_v27, %v8693_v23 }
 0x468   : > { %4982 = vst [vmem:[%s8734_s25 + $0xc8] sm:$0xff] %v4946_v42  ;;  %v4912_v62 = vadd.f32 %v7064_v43, %v8730_v35 }
 0x469   : > { %4981 = vst [vmem:[%s8734_s25 + $0xc0] sm:$0xff] %v4945_v13  ;;  %v4911_v19 = vadd.f32 %v7070_v10, %v8730_v35  ;;  %v6589_v6 = vpop.f32.mrb[8].mxu1 }
 0x46a   : > { %v4948_v57 = vmax.f32 %v4912_v62, 0.0  ;;  %v7076_v4 = vadd.f32 %v6589_v6, %v8695_v59  ;;  %v4731_v5 = vpop.f32.mrb[9].mxu1 }
 0x46b   : > { %v4947_v50 = vmax.f32 %v4911_v19, 0.0  ;;  %v7082_v60 = vadd.f32 %v4731_v5, %v8697_v52 }
 0x46c   : > { %4984 = vst [vmem:[%s8734_s25 + $0xd8] sm:$0xff] %v4948_v57  ;;  %v4914_v49 = vadd.f32 %v7076_v4, %v8730_v35 }
 0x46d   : > { %4983 = vst [vmem:[%s8734_s25 + $0xd0] sm:$0xff] %v4947_v50  ;;  %v4913_v23 = vadd.f32 %v7082_v60, %v8730_v35  ;;  %v6592_v61 = vpop.f32.mrb[10].mxu1 }
 0x46e   : > { %v4950_v46 = vmax.f32 %v4914_v49, 0.0  ;;  %v7088_v1 = vadd.f32 %v6592_v61, %v8699_v16  ;;  %v4741_v56 = vpop.f32.mrb[11].mxu1 }
 0x46f   : > { %v4949_v45 = vmax.f32 %v4913_v23, 0.0  ;;  %v7094_v59 = vadd.f32 %v4741_v56, %v8701_v8 }
 0x470   : > { %4986 = vst [vmem:[%s8734_s25 + $0xe8] sm:$0xff] %v4950_v46  ;;  %v4916_v15 = vadd.f32 %v7088_v1, %v8730_v35 }
 0x471   : > { %4985 = vst [vmem:[%s8734_s25 + $0xe0] sm:$0xff] %v4949_v45  ;;  %v4915_v52 = vadd.f32 %v7094_v59, %v8730_v35  ;;  %v6595_v30 = vpop.f32.mrb[12].mxu1 }
 0x472   : > { %v4952_v37 = vmax.f32 %v4916_v15, 0.0  ;;  %v7100_v11 = vadd.f32 %v6595_v30, %v8703_v31  ;;  %v4751_v47 = vpop.f32.mrb[13].mxu1 }
 0x473   : > { %v4951_v16 = vmax.f32 %v4915_v52, 0.0  ;;  %v7106_v38 = vadd.f32 %v4751_v47, %v8705_v14 }
 0x474   : > { %4988 = vst [vmem:[%s8734_s25 + $0xf8] sm:$0xff] %v4952_v37  ;;  %v4918_v8 = vadd.f32 %v7100_v11, %v8730_v35 }
 0x475   : > { %4987 = vst [vmem:[%s8734_s25 + $0xf0] sm:$0xff] %v4951_v16  ;;  %v4917_v40 = vadd.f32 %v7106_v38, %v8730_v35  ;;  %v6598_v55 = vpop.f32.mrb[14].mxu1 }
 0x476   : > { %v4954_v25 = vmax.f32 %v4918_v8, 0.0  ;;  %v7112_v54 = vadd.f32 %v6598_v55, %v8707_v51  ;;  %v4761_v31 = vpop.f32.mrb[15].mxu1 }
 0x477   : > { %v4953_v53 = vmax.f32 %v4917_v40, 0.0  ;;  %v7118_v48 = vadd.f32 %v4761_v31, %v8709_v58 }
 0x478   : > { %4990 = vst [vmem:[%s8734_s25 + $0x108] sm:$0xff] %v4954_v25  ;;  %v4920_v14 = vadd.f32 %v7112_v54, %v8730_v35 }
 0x479   : > { %4989 = vst [vmem:[%s8734_s25 + $0x100] sm:$0xff] %v4953_v53  ;;  %v4919_v39 = vadd.f32 %v7118_v48, %v8730_v35 }
 0x47a   : > { %v4956_v22 = vmax.f32 %v4920_v14, 0.0 }
 0x47b   : > { %v4955_v51 = vmax.f32 %v4919_v39, 0.0 }
 0x47c   : > { %4992 = vst [vmem:[%s8734_s25 + $0x118] sm:$0xff] %v4956_v22 }
 0x47d   : > { %4991 = vst [vmem:[%s8734_s25 + $0x110] sm:$0xff] %v4955_v51 }
 0x47e   : > { %7665 = shalt.err (!%p7662_p8)
}
 0x47f   : > { %s7666_s14 = scalar_lea.hbm %s8834_s11, 4608  ;;  %s7670_s28 = scalar_lea.hbm %s8888_s6, 9216 }
 0x480   : > { %p7667_p6 = scmp.ne.s32.totalorder %s8834_s11, %s7666_s14  ;;  %p7671_p3 = scmp.lt.u32.totalorder %s8834_s11, %s8888_s6 }
 0x481   : > { %p7672_p5 = scmp.lt.u32.totalorder %s7670_s28, %s7666_s14  ;;  %p7674_p7 = scmp.lt.u32.totalorder %s7666_s14, %s8834_s11 }
 0x482   : > { %p7668_p10 = pnand %p7667_p6, %p8915_p4 }
 0x483   : > { %p7673_p9 = por %p7672_p5, %p7671_p3 }
 0x484   : > { %p7669_p11 = pneg %p7668_p10 }
 0x485   : > { %p7675_p12 = por %p7674_p7, %p7673_p9 }
 0x487   : > { %p7676_p1 = pnand %p7675_p12, %p7669_p11 }
 0x489   : > { %7679 = shalt.err (!%p7676_p1)
}
 0x48a   : > { %s7744_s15 = smov 128   ;;  %s7745_s16 = smov 8  }
 0x48b   : > { %7398 = dma.vmem_to_hbm [thread:$0]  (%p8915_p4), %s8836_s30, 4608, %s8834_s11, %s4994_s27, %s7744_s15, %s7744_s15, %s7745_s16  }
 0x48c PF: > { %s5022_s9 = sand.u32 1, %s7718_s21   ;;  %p8916_p13 = scmp.ne.s32.totalorder %s8902_s10, 0 }
 0x48d   : > { %p8917_p0 = scmp.ge.s32.totalorder %s7730_s24, 2  ;;  %s5023_s19 = scalar_lea.sflag [#allocation5], %s5022_s9 }
 0x48f   : > { %p7421_p2 = pnand %p8917_p0, %p8916_p13 }
 0x491   : > { %7713 = dma.done.wait (!%p7421_p2), %s5023_s19, 4608  }
 0x492   : > { %7715 = vsyncadd (!%p7421_p2), %s5023_s19, 4294962688  ;;  %p22_p8 = scmp.ge.s32.totalorder %s7946_s7, 4   ;;  %s8918_s21 = smov %s7722_s22 }
 0x493   : > { %s8919_s22 = smov %s7726_s23  ;;  %s8920_s23 = smov %s7958_s17 }
 0x494   : > { %s8921_s24 = smov %s7946_s7  ;;  %24 = sbr.rel (!%p22_p8) target bundleno = 8 (0x8), region = 117 }
 0x49b   :  { %5028 = vsyncpa [#allocation4], 1 }
 0x49c   :  { %5030 = vsyncpa [#allocation4 + $0x1], 1 }
 0x49d   :  { %5031 = vsyncpa [#allocation7], 1 }
 0x49e   :  { %5032 = vsyncpa [#allocation10], 1 }
 0x49f   :  { %5033 = vsyncpa [#allocation13], 1 }
 0x4a0   :  { %5034 = vsyncpa [#allocation5], 1 }
 0x4a1   :  { %5036 = vsyncpa [#allocation5 + $0x1], 1 }

</bundles_post_ra>
